<compile_context>
chip_gen: v7x
topology: tpu7x:2x2x1
jax: 0.10.0
libtpu: 0.0.40
codegen_flags: <defaults>
</compile_context>

<pallas_src>
import jax
import jax.numpy as jnp
from jax.experimental import pallas as pl
from jax.experimental.pallas import tpu as pltpu


# ----------------------------------------------------------------------------
# In-kernel helper: 3x3 'same' conv from a zero-padded VMEM tile, as one matmul
# ----------------------------------------------------------------------------
def _conv3x3_from_padded(pad_ref, w_ref, b_ref, H, W):
    """pad_ref: (H+2, W+2, Cin) bf16 zero-padded activation tile (VMEM scratch)
       w_ref:   (9*Cin, Cout)   bf16 weights, BN scale pre-folded,
                                K laid out as (dy, dx, cin) row-major
       b_ref:   (1, Cout)       f32 folded BN bias
       returns  (H*W, Cout)     f32, bias + ReLU applied
    """
    Cin = pad_ref.shape[-1]
    taps = []
    for dy in range(3):                       # static 3x3 tap loop (views only)
        for dx in range(3):
            taps.append(pad_ref[dy:dy + H, dx:dx + W, :])
    # im2col patch (H, W, 9*Cin) -> (H*W, 9*Cin): one deep-K MXU matmul keeps
    # the systolic array fed instead of 9 shallow K=Cin matmuls.
    patch = jnp.concatenate(taps, axis=-1).reshape(H * W, 9 * Cin)
    acc = jnp.dot(patch, w_ref[...], preferred_element_type=jnp.float32)
    return jnp.maximum(acc + b_ref[...], 0.0)      # folded-BN bias + ReLU (f32)


# ----------------------------------------------------------------------------
# Fused stage kernel: [2x2 maxpool] -> conv+BN+ReLU -> conv+BN+ReLU
# ----------------------------------------------------------------------------
def _make_stage_kernel(pool, H, W):
    """H, W are the post-pool spatial dims of this stage."""

    def kernel(x_ref, w1_ref, b1_ref, w2_ref, b2_ref, o_ref,
               pad1_ref, pad2_ref):
        x = x_ref[0]                                   # (Hin, Win, Cin) f32
        if pool:
            # 2x2 max-pool, stride 2, done on loaded values (no strided ds).
            Cin = x.shape[-1]
            xr = x.reshape(H, 2, 2 * W, Cin)           # split rows (major dim)
            xh = jnp.maximum(xr[:, 0], xr[:, 1])       # (H, 2W, Cin)
            xc = xh.reshape(H, W, 2, Cin)              # split cols
            x = jnp.maximum(xc[:, :, 0], xc[:, :, 1])  # (H, W, Cin)

        # ---- conv1 + folded BN1 + ReLU -------------------------------------
        # Zero halo built in VMEM scratch (no jnp.pad HBM pass); cast to bf16
        # here so the matmul operands are bf16 while the epilogue stays f32.
        pad1_ref[...] = jnp.zeros(pad1_ref.shape, pad1_ref.dtype)
        pad1_ref[1:H + 1, 1:W + 1, :] = x.astype(jnp.bfloat16)
        y1 = _conv3x3_from_padded(pad1_ref, w1_ref, b1_ref, H, W)  # (H*W, Cmid)

        # ---- conv2 + folded BN2 + ReLU (intermediate never leaves VMEM) ----
        Cmid = pad2_ref.shape[-1]
        pad2_ref[...] = jnp.zeros(pad2_ref.shape, pad2_ref.dtype)
        pad2_ref[1:H + 1, 1:W + 1, :] = y1.reshape(H, W, Cmid).astype(jnp.bfloat16)
        y2 = _conv3x3_from_padded(pad2_ref, w2_ref, b2_ref, H, W)  # (H*W, Cout)

        o_ref[0] = y2                                  # flat spatial, f32

    return kernel


def unet_stage(x, c1, c2, pool):
    """One encoder stage as a single fused pallas_call.

    x: (N, Hin, Win, Cin) f32  ->  (N, H, W, Cout) f32
    """
    N, Hin, Win, Cin = x.shape
    H, W = (Hin // 2, Win // 2) if pool else (Hin, Win)
    Cmid = c1['w'].shape[-1]
    Cout = c2['w'].shape[-1]

    out_flat = pl.pallas_call(
        _make_stage_kernel(pool, H, W),
        out_shape=jax.ShapeDtypeStruct((N, H * W, Cout), jnp.float32),
        grid=(N,),
        in_specs=[
            pl.BlockSpec((1, Hin, Win, Cin), lambda n: (n, 0, 0, 0)),
            pl.BlockSpec((9 * Cin, Cmid), lambda n: (0, 0)),   # dense 2D weights
            pl.BlockSpec((1, Cmid), lambda n: (0, 0)),
            pl.BlockSpec((9 * Cmid, Cout), lambda n: (0, 0)),
            pl.BlockSpec((1, Cout), lambda n: (0, 0)),
        ],
        # Spatially-flattened output block: sublane-dense stores; reshape back
        # in the wrapper is free (identical row-major layout).
        out_specs=pl.BlockSpec((1, H * W, Cout), lambda n: (n, 0, 0)),
        scratch_shapes=[
            pltpu.VMEM((H + 2, W + 2, Cin), jnp.bfloat16),     # padded conv1 in
            pltpu.VMEM((H + 2, W + 2, Cmid), jnp.bfloat16),    # padded conv2 in
        ],
        compiler_params=pltpu.CompilerParams(
            dimension_semantics=("parallel",)),
    )(x, c1['w'], c1['bias'], c2['w'], c2['bias'])

    return out_flat.reshape(N, H, W, Cout)


# ----------------------------------------------------------------------------
# Parameter init (deterministic, synthetic) with BN folding done once at init
# ----------------------------------------------------------------------------
def _init_conv_bn(key, cin, cout, eps=1e-5):
    # Conv2d(cin, cout, 3, padding=1, bias=False) + BatchNorm2d(cout),
    # weights in HWIO. BN (running stats of a fresh BatchNorm2d) is folded:
    # scale into the conv weights, shift into a bias vector.
    w = jax.random.normal(key, (3, 3, cin, cout), jnp.float32) * (
        1.0 / jnp.sqrt(9.0 * cin))
    gamma = jnp.ones((cout,), jnp.float32)
    beta = jnp.zeros((cout,), jnp.float32)
    running_mean = jnp.zeros((cout,), jnp.float32)
    running_var = jnp.ones((cout,), jnp.float32)
    scale = gamma / jnp.sqrt(running_var + eps)
    w_folded = (w * scale[None, None, None, :]).reshape(9 * cin, cout)
    bias = (beta - running_mean * scale).reshape(1, cout)
    return dict(w=w_folded.astype(jnp.bfloat16),      # bf16 MXU operand
                bias=bias.astype(jnp.float32))        # f32 epilogue


def init_unet_encoder_params(key, n_channels, base=8):
    widths = [base, base * 2, base * 4, base * 8, base * 16]
    keys = jax.random.split(key, 2 * len(widths))
    params, cin, ki = [], n_channels, 0
    for cout in widths:
        c1 = _init_conv_bn(keys[ki], cin, cout); ki += 1
        c2 = _init_conv_bn(keys[ki], cout, cout); ki += 1
        params.append((c1, c2))
        cin = cout
    return params


def unet_encoder_forward(x_nchw, params):
    # NCHW (PyTorch) -> NHWC (kernel layout)
    x = jnp.transpose(x_nchw, (0, 2, 3, 1)).astype(jnp.float32)
    for i, (c1, c2) in enumerate(params):
        x = unet_stage(x, c1, c2, pool=(i > 0))    # Down = MaxPool -> DoubleConv
    # encoder(x)['out'] = deepest feature map, returned NCHW like PyTorch
    return jnp.transpose(x, (0, 3, 1, 2))


class BaseEncoder:
    """JAX/Pallas mirror of camcontrast.model.BaseEncoder."""

    def __init__(self, n_channels):
        self.n_channels = n_channels
        self.encoder_params = None

    def init(self, backbone, imagenet_init=False, *, key=None, base=8):
        if backbone == 'u-net-encoder':
            if key is None:
                key = jax.random.PRNGKey(0)
            self.encoder_params = init_unet_encoder_params(
                key, self.n_channels, base=base)
        elif 'resnet' in backbone:
            # TODO(synk): resnet backbone (torchvision + ImageNet weights) not implemented.
            raise NotImplementedError(
                "resnet backbone not implemented in this kernel demo")
        else:
            raise ValueError(f"Unknown backbone '{backbone}'.")

    def forward(self, x):
        if self.encoder_params is None:
            raise RuntimeError(
                'Model is not initialized. Call `init` to initialize the model.')
        return unet_encoder_forward(x, self.encoder_params)

    __call__ = forward


if __name__ == "__main__":
    key = jax.random.PRNGKey(0)
    k_x, k_p = jax.random.split(key)

    n_channels = 4
    x = jax.random.normal(k_x, (2, n_channels, 16, 16), jnp.float32)  # NCHW

    model = BaseEncoder(n_channels)
    model.init('u-net-encoder', imagenet_init=False, key=k_p, base=8)

    out = jax.block_until_ready(model(x))     # deepest feature map, NCHW
    assert out.shape == (2, 128, 1, 1), out.shape
    assert out.dtype == jnp.float32
    assert bool(jnp.all(jnp.isfinite(out)))
    print("KERNEL_OK")
</pallas_src>

<mosaic_0001>
module attributes {stable_mosaic.version = 11 : i64} {
  func.func @kernel(%arg0: i32, %arg1: memref<1x16x16x4xf32, #tpu.memory_space<vmem>>, %arg2: memref<36x8xbf16, #tpu.memory_space<vmem>>, %arg3: memref<1x8xf32, #tpu.memory_space<vmem>>, %arg4: memref<72x8xbf16, #tpu.memory_space<vmem>>, %arg5: memref<1x8xf32, #tpu.memory_space<vmem>>, %arg6: memref<1x256x8xf32, #tpu.memory_space<vmem>>, %arg7: memref<18x18x4xbf16, #tpu.memory_space<vmem>>, %arg8: memref<18x18x8xbf16, #tpu.memory_space<vmem>>) attributes {dimension_semantics = [#tpu.dimension_semantics<parallel>], iteration_bounds = array<i64: 2>, scalar_prefetch = 0 : i64, scratch_operands = 2 : i64, tpu.core_type = #tpu.core_type<tc>, window_params = [{transform_indices = @transform_0, window_bounds = array<i64: 1, 16, 16, 4>}, {pipeline_mode = #tpu.pipeline_mode<synchronous>, transform_indices = @transform_1, window_bounds = array<i64: 36, 8>}, {pipeline_mode = #tpu.pipeline_mode<synchronous>, transform_indices = @transform_2, window_bounds = array<i64: 1, 8>}, {pipeline_mode = #tpu.pipeline_mode<synchronous>, transform_indices = @transform_3, window_bounds = array<i64: 72, 8>}, {pipeline_mode = #tpu.pipeline_mode<synchronous>, transform_indices = @transform_4, window_bounds = array<i64: 1, 8>}, {transform_indices = @transform_5, window_bounds = array<i64: 1, 256, 8>}]} {
    %c0 = arith.constant 0 : index
    %c0_0 = arith.constant 0 : index
    %c0_1 = arith.constant 0 : index
    %c0_2 = arith.constant 0 : index
    %0 = vector.load %arg1[%c0, %c0_0, %c0_1, %c0_2] : memref<1x16x16x4xf32, #tpu.memory_space<vmem>>, vector<1x16x16x4xf32>
    %1 = vector.shape_cast %0 : vector<1x16x16x4xf32> to vector<16x16x4xf32>
    %cst = arith.constant 0.000000e+00 : bf16
    %2 = vector.broadcast %cst : bf16 to vector<18x18x4xbf16>
    %c0_3 = arith.constant 0 : index
    %c0_4 = arith.constant 0 : index
    %c0_5 = arith.constant 0 : index
    %3 = vector.load %arg7[%c0_3, %c0_4, %c0_5] : memref<18x18x4xbf16, #tpu.memory_space<vmem>>, vector<18x18x4xbf16>
    tpu.vector_store %arg7[%c0_3, %c0_4, %c0_5], %2 {strides = array<i32>} : memref<18x18x4xbf16, #tpu.memory_space<vmem>>, vector<18x18x4xbf16>,
    %4 = arith.truncf %1 : vector<16x16x4xf32> to vector<16x16x4xbf16>
    %c1 = arith.constant 1 : index
    %c1_6 = arith.constant 1 : index
    %c0_7 = arith.constant 0 : index
    %5 = vector.load %arg7[%c1, %c1_6, %c0_7] : memref<18x18x4xbf16, #tpu.memory_space<vmem>>, vector<16x16x4xbf16>
    tpu.vector_store %arg7[%c1, %c1_6, %c0_7], %4 {strides = array<i32>} : memref<18x18x4xbf16, #tpu.memory_space<vmem>>, vector<16x16x4xbf16>,
    %c0_8 = arith.constant 0 : index
    %c0_9 = arith.constant 0 : index
    %c0_10 = arith.constant 0 : index
    %6 = vector.load %arg7[%c0_8, %c0_9, %c0_10] : memref<18x18x4xbf16, #tpu.memory_space<vmem>>, vector<16x16x4xbf16>
    %c0_11 = arith.constant 0 : index
    %c1_12 = arith.constant 1 : index
    %c0_13 = arith.constant 0 : index
    %7 = vector.load %arg7[%c0_11, %c1_12, %c0_13] : memref<18x18x4xbf16, #tpu.memory_space<vmem>>, vector<16x16x4xbf16>
    %c0_14 = arith.constant 0 : index
    %c2 = arith.constant 2 : index
    %c0_15 = arith.constant 0 : index
    %8 = vector.load %arg7[%c0_14, %c2, %c0_15] : memref<18x18x4xbf16, #tpu.memory_space<vmem>>, vector<16x16x4xbf16>
    %c1_16 = arith.constant 1 : index
    %c0_17 = arith.constant 0 : index
    %c0_18 = arith.constant 0 : index
    %9 = vector.load %arg7[%c1_16, %c0_17, %c0_18] : memref<18x18x4xbf16, #tpu.memory_space<vmem>>, vector<16x16x4xbf16>
    %c1_19 = arith.constant 1 : index
    %c1_20 = arith.constant 1 : index
    %c0_21 = arith.constant 0 : index
    %10 = vector.load %arg7[%c1_19, %c1_20, %c0_21] : memref<18x18x4xbf16, #tpu.memory_space<vmem>>, vector<16x16x4xbf16>
    %c1_22 = arith.constant 1 : index
    %c2_23 = arith.constant 2 : index
    %c0_24 = arith.constant 0 : index
    %11 = vector.load %arg7[%c1_22, %c2_23, %c0_24] : memref<18x18x4xbf16, #tpu.memory_space<vmem>>, vector<16x16x4xbf16>
    %c2_25 = arith.constant 2 : index
    %c0_26 = arith.constant 0 : index
    %c0_27 = arith.constant 0 : index
    %12 = vector.load %arg7[%c2_25, %c0_26, %c0_27] : memref<18x18x4xbf16, #tpu.memory_space<vmem>>, vector<16x16x4xbf16>
    %c2_28 = arith.constant 2 : index
    %c1_29 = arith.constant 1 : index
    %c0_30 = arith.constant 0 : index
    %13 = vector.load %arg7[%c2_28, %c1_29, %c0_30] : memref<18x18x4xbf16, #tpu.memory_space<vmem>>, vector<16x16x4xbf16>
    %c2_31 = arith.constant 2 : index
    %c2_32 = arith.constant 2 : index
    %c0_33 = arith.constant 0 : index
    %14 = vector.load %arg7[%c2_31, %c2_32, %c0_33] : memref<18x18x4xbf16, #tpu.memory_space<vmem>>, vector<16x16x4xbf16>
    %15 = tpu.concatenate %6, %7, %8, %9, %10, %11, %12, %13, %14 in 2 : vector<16x16x4xbf16>, vector<16x16x4xbf16>, vector<16x16x4xbf16>, vector<16x16x4xbf16>, vector<16x16x4xbf16>, vector<16x16x4xbf16>, vector<16x16x4xbf16>, vector<16x16x4xbf16>, vector<16x16x4xbf16> -> vector<16x16x36xbf16>
    %16 = vector.shape_cast %15 : vector<16x16x36xbf16> to vector<256x36xbf16>
    %c0_34 = arith.constant 0 : index
    %c0_35 = arith.constant 0 : index
    %17 = vector.load %arg2[%c0_34, %c0_35] : memref<36x8xbf16, #tpu.memory_space<vmem>>, vector<36x8xbf16>
    %cst_36 = arith.constant dense<0.000000e+00> : vector<256x8xf32>
    %18 = tpu.matmul %16, %17, %cst_36 {dimension_numbers = #tpu.dot_dimension_numbers<[1], [0], [0], [1], [0, 0, 1, 1], [], []>} : vector<256x36xbf16>, vector<36x8xbf16>, vector<256x8xf32> -> vector<256x8xf32>
    %c0_37 = arith.constant 0 : index
    %c0_38 = arith.constant 0 : index
    %19 = vector.load %arg3[%c0_37, %c0_38] : memref<1x8xf32, #tpu.memory_space<vmem>>, vector<1x8xf32>
    %20 = vector.broadcast %19 : vector<1x8xf32> to vector<256x8xf32>
    %21 = arith.addf %18, %20 : vector<256x8xf32>
    %cst_39 = arith.constant 0.000000e+00 : f32
    %22 = vector.broadcast %cst_39 : f32 to vector<256x8xf32>
    %23 = arith.maximumf %21, %22 : vector<256x8xf32>
    %cst_40 = arith.constant 0.000000e+00 : bf16
    %24 = vector.broadcast %cst_40 : bf16 to vector<18x18x8xbf16>
    %c0_41 = arith.constant 0 : index
    %c0_42 = arith.constant 0 : index
    %c0_43 = arith.constant 0 : index
    %25 = vector.load %arg8[%c0_41, %c0_42, %c0_43] : memref<18x18x8xbf16, #tpu.memory_space<vmem>>, vector<18x18x8xbf16>
    tpu.vector_store %arg8[%c0_41, %c0_42, %c0_43], %24 {strides = array<i32>} : memref<18x18x8xbf16, #tpu.memory_space<vmem>>, vector<18x18x8xbf16>,
    %26 = vector.shape_cast %23 : vector<256x8xf32> to vector<16x16x8xf32>
    %27 = arith.truncf %26 : vector<16x16x8xf32> to vector<16x16x8xbf16>
    %c1_44 = arith.constant 1 : index
    %c1_45 = arith.constant 1 : index
    %c0_46 = arith.constant 0 : index
    %28 = vector.load %arg8[%c1_44, %c1_45, %c0_46] : memref<18x18x8xbf16, #tpu.memory_space<vmem>>, vector<16x16x8xbf16>
    tpu.vector_store %arg8[%c1_44, %c1_45, %c0_46], %27 {strides = array<i32>} : memref<18x18x8xbf16, #tpu.memory_space<vmem>>, vector<16x16x8xbf16>,
    %c0_47 = arith.constant 0 : index
    %c0_48 = arith.constant 0 : index
    %c0_49 = arith.constant 0 : index
    %29 = vector.load %arg8[%c0_47, %c0_48, %c0_49] : memref<18x18x8xbf16, #tpu.memory_space<vmem>>, vector<16x16x8xbf16>
    %c0_50 = arith.constant 0 : index
    %c1_51 = arith.constant 1 : index
    %c0_52 = arith.constant 0 : index
    %30 = vector.load %arg8[%c0_50, %c1_51, %c0_52] : memref<18x18x8xbf16, #tpu.memory_space<vmem>>, vector<16x16x8xbf16>
    %c0_53 = arith.constant 0 : index
    %c2_54 = arith.constant 2 : index
    %c0_55 = arith.constant 0 : index
    %31 = vector.load %arg8[%c0_53, %c2_54, %c0_55] : memref<18x18x8xbf16, #tpu.memory_space<vmem>>, vector<16x16x8xbf16>
    %c1_56 = arith.constant 1 : index
    %c0_57 = arith.constant 0 : index
    %c0_58 = arith.constant 0 : index
    %32 = vector.load %arg8[%c1_56, %c0_57, %c0_58] : memref<18x18x8xbf16, #tpu.memory_space<vmem>>, vector<16x16x8xbf16>
    %c1_59 = arith.constant 1 : index
    %c1_60 = arith.constant 1 : index
    %c0_61 = arith.constant 0 : index
    %33 = vector.load %arg8[%c1_59, %c1_60, %c0_61] : memref<18x18x8xbf16, #tpu.memory_space<vmem>>, vector<16x16x8xbf16>
    %c1_62 = arith.constant 1 : index
    %c2_63 = arith.constant 2 : index
    %c0_64 = arith.constant 0 : index
    %34 = vector.load %arg8[%c1_62, %c2_63, %c0_64] : memref<18x18x8xbf16, #tpu.memory_space<vmem>>, vector<16x16x8xbf16>
    %c2_65 = arith.constant 2 : index
    %c0_66 = arith.constant 0 : index
    %c0_67 = arith.constant 0 : index
    %35 = vector.load %arg8[%c2_65, %c0_66, %c0_67] : memref<18x18x8xbf16, #tpu.memory_space<vmem>>, vector<16x16x8xbf16>
    %c2_68 = arith.constant 2 : index
    %c1_69 = arith.constant 1 : index
    %c0_70 = arith.constant 0 : index
    %36 = vector.load %arg8[%c2_68, %c1_69, %c0_70] : memref<18x18x8xbf16, #tpu.memory_space<vmem>>, vector<16x16x8xbf16>
    %c2_71 = arith.constant 2 : index
    %c2_72 = arith.constant 2 : index
    %c0_73 = arith.constant 0 : index
    %37 = vector.load %arg8[%c2_71, %c2_72, %c0_73] : memref<18x18x8xbf16, #tpu.memory_space<vmem>>, vector<16x16x8xbf16>
    %38 = tpu.concatenate %29, %30, %31, %32, %33, %34, %35, %36, %37 in 2 : vector<16x16x8xbf16>, vector<16x16x8xbf16>, vector<16x16x8xbf16>, vector<16x16x8xbf16>, vector<16x16x8xbf16>, vector<16x16x8xbf16>, vector<16x16x8xbf16>, vector<16x16x8xbf16>, vector<16x16x8xbf16> -> vector<16x16x72xbf16>
    %39 = vector.shape_cast %38 : vector<16x16x72xbf16> to vector<256x72xbf16>
    %c0_74 = arith.constant 0 : index
    %c0_75 = arith.constant 0 : index
    %40 = vector.load %arg4[%c0_74, %c0_75] : memref<72x8xbf16, #tpu.memory_space<vmem>>, vector<72x8xbf16>
    %cst_76 = arith.constant dense<0.000000e+00> : vector<256x8xf32>
    %41 = tpu.matmul %39, %40, %cst_76 {dimension_numbers = #tpu.dot_dimension_numbers<[1], [0], [0], [1], [0, 0, 1, 1], [], []>} : vector<256x72xbf16>, vector<72x8xbf16>, vector<256x8xf32> -> vector<256x8xf32>
    %c0_77 = arith.constant 0 : index
    %c0_78 = arith.constant 0 : index
    %42 = vector.load %arg5[%c0_77, %c0_78] : memref<1x8xf32, #tpu.memory_space<vmem>>, vector<1x8xf32>
    %43 = vector.broadcast %42 : vector<1x8xf32> to vector<256x8xf32>
    %44 = arith.addf %41, %43 : vector<256x8xf32>
    %cst_79 = arith.constant 0.000000e+00 : f32
    %45 = vector.broadcast %cst_79 : f32 to vector<256x8xf32>
    %46 = arith.maximumf %44, %45 : vector<256x8xf32>
    %c0_80 = arith.constant 0 : index
    %c0_81 = arith.constant 0 : index
    %c0_82 = arith.constant 0 : index
    %47 = vector.load %arg6[%c0_80, %c0_81, %c0_82] : memref<1x256x8xf32, #tpu.memory_space<vmem>>, vector<1x256x8xf32>
    %48 = vector.shape_cast %47 : vector<1x256x8xf32> to vector<256x8xf32>
    %49 = vector.shape_cast %46 : vector<256x8xf32> to vector<1x256x8xf32>
    tpu.vector_store %arg6[%c0_80, %c0_81, %c0_82], %49 {strides = array<i32>} : memref<1x256x8xf32, #tpu.memory_space<vmem>>, vector<1x256x8xf32>,
    return
  }
  func.func @transform_0(%arg0: i32) -> (i32, i32, i32, i32) {
    %c0_i32 = arith.constant 0 : i32
    %c0_i32_0 = arith.constant 0 : i32
    %c0_i32_1 = arith.constant 0 : i32
    %c0_i32_2 = arith.constant 0 : i32
    return %arg0, %c0_i32, %c0_i32_0, %c0_i32_1 : i32, i32, i32, i32
  }
  func.func @transform_1(%arg0: i32) -> (i32, i32) {
    %c0_i32 = arith.constant 0 : i32
    %c0_i32_0 = arith.constant 0 : i32
    %c0_i32_1 = arith.constant 0 : i32
    return %c0_i32, %c0_i32_0 : i32, i32
  }
  func.func @transform_2(%arg0: i32) -> (i32, i32) {
    %c0_i32 = arith.constant 0 : i32
    %c0_i32_0 = arith.constant 0 : i32
    %c0_i32_1 = arith.constant 0 : i32
    return %c0_i32, %c0_i32_0 : i32, i32
  }
  func.func @transform_3(%arg0: i32) -> (i32, i32) {
    %c0_i32 = arith.constant 0 : i32
    %c0_i32_0 = arith.constant 0 : i32
    %c0_i32_1 = arith.constant 0 : i32
    return %c0_i32, %c0_i32_0 : i32, i32
  }
  func.func @transform_4(%arg0: i32) -> (i32, i32) {
    %c0_i32 = arith.constant 0 : i32
    %c0_i32_0 = arith.constant 0 : i32
    %c0_i32_1 = arith.constant 0 : i32
    return %c0_i32, %c0_i32_0 : i32, i32
  }
  func.func @transform_5(%arg0: i32) -> (i32, i32, i32) {
    %c0_i32 = arith.constant 0 : i32
    %c0_i32_0 = arith.constant 0 : i32
    %c0_i32_1 = arith.constant 0 : i32
    return %arg0, %c0_i32, %c0_i32_0 : i32, i32, i32
  }
}

</mosaic_0001>

<bundles_post_ra>
// kernel: tpu_custom_call.1
= control target key start
LH: loop header
LB: loop body
LE: loop exit
PB: predicated region body
PF: predicated region fallthrough
CT: control target
= control target key end

     0   :  { %s6921_s18 = smov 0   ;;  %s9666_s0 = inlined_call_operand.vmem [shape: f32[2,16,16,4], index: 0, kind: input, shape index: {}]   ;;  %s9667_s1 = inlined_call_operand.vmem [shape: bf16[36,8], index: 1, kind: input, shape index: {}]   ;;  %s9668_s2 = inlined_call_operand.vmem [shape: f32[1,8], index: 2, kind: input, shape index: {}]   ;;  %s9669_s3 = inlined_call_operand.vmem [shape: bf16[72,8], index: 3, kind: input, shape index: {}]   ;;  %s9670_s4 = inlined_call_operand.vmem [shape: f32[1,8], index: 4, kind: input, shape index: {}]   ;;  %s9671_s5 = inlined_call_operand.vmem [shape: f32[2,256,8], index: 5, kind: output, shape index: {}]  }
   0x1 LB: > { %s5977_s19 = sadd.s32 4294967295, %s6876_s18   ;;  %p5981_p0 = scmp.ge.s32.totalorder %s6876_s18, 1  ;;  %s6876_s18 = sphi %s6921_s18, %s15_s18  }
   0x2   : > { %p187_p1 = scmp.lt.s32.totalorder %s6876_s18, 3 }
   0x4   : > { %p188_p2 = pnand %p5981_p0, %p187_p1 }
   0x5   : > { %vm258_vm0 = vcmask (!%p188_p2), 27648   ;;  %vm261_vm1 = vcmask (!%p188_p2), 24576   ;;  %v9673_v0 = vmov (!%p188_p2), 0   ;;  %p215_p3 = scmp.lt.s32.totalorder (!%p188_p2), %s5977_s19, 1  ;;  %vm9672_vm2 = vsmask.f32 (!%p188_p2), 256 }
   0x6   : > { %191 = sbr.rel (%p188_p2) target bundleno = 1033 (0x409), region = 40  ;;  %259 = vst.msk [vmem:[#allocation2] sm:$0xf] (!%p188_p2), %vm258_vm0, %v9673_v0  ;;  %260 = vst.msk [vmem:[#allocation2 + $0x4] sm:$0xf] (!%p188_p2), %vm258_vm0, %v9673_v0  ;;  %vm1445_vm6 = vcmask (!%p188_p2), 1046528  }
   0x7   : > { %262 = vst.msk [vmem:[#allocation2 + $0x8] sm:$0x1] (!%p188_p2), %vm261_vm1, %v9673_v0  ;;  %265 = vst.msk [vmem:[#allocation2 + $0x14] sm:$0x1] (!%p188_p2), %vm261_vm1, %v9673_v0  ;;  %vm411_vm3 = vsmask.f32 (!%p188_p2), 4368 }
   0x8   : > { %263 = vst.msk [vmem:[#allocation2 + $0xc] sm:$0xf] (!%p188_p2), %vm258_vm0, %v9673_v0  ;;  %264 = vst.msk [vmem:[#allocation2 + $0x10] sm:$0xf] (!%p188_p2), %vm258_vm0, %v9673_v0  ;;  %vm1172_vm4 = vsmask.f32 (!%p188_p2), 7424 }
   0x9   : > { %266 = vst.msk [vmem:[#allocation2 + $0x18] sm:$0xf] (!%p188_p2), %vm258_vm0, %v9673_v0  ;;  %267 = vst.msk [vmem:[#allocation2 + $0x1c] sm:$0xf] (!%p188_p2), %vm258_vm0, %v9673_v0  ;;  %vm735_vm5 = vsmask.f32 (!%p188_p2), 7938 }
   0xa   : > { %268 = vst.msk [vmem:[#allocation2 + $0x20] sm:$0x1] (!%p188_p2), %vm261_vm1, %v9673_v0  ;;  %271 = vst.msk [vmem:[#allocation2 + $0x2c] sm:$0x1] (!%p188_p2), %vm261_vm1, %v9673_v0  ;;  %s6879_s24 = smov (!%p188_p2), 8   ;;  %s6880_s25 = smov (!%p188_p2), 4  }
   0xb   : > { %269 = vst.msk [vmem:[#allocation2 + $0x24] sm:$0xf] (!%p188_p2), %vm258_vm0, %v9673_v0  ;;  %270 = vst.msk [vmem:[#allocation2 + $0x28] sm:$0xf] (!%p188_p2), %vm258_vm0, %v9673_v0  ;;  %s6881_s26 = smov (!%p188_p2), 12   ;;  %s6882_s27 = smov (!%p188_p2), 24  }
   0xc   : > { %272 = vst.msk [vmem:[#allocation2 + $0x30] sm:$0xf] (!%p188_p2), %vm258_vm0, %v9673_v0  ;;  %273 = vst.msk [vmem:[#allocation2 + $0x34] sm:$0xf] (!%p188_p2), %vm258_vm0, %v9673_v0  ;;  %s6883_s28 = smov (!%p188_p2), 20   ;;  %s6884_s6 = smov (!%p188_p2), 32  }
   0xd   : > { %274 = vst.msk [vmem:[#allocation2 + $0x38] sm:$0x1] %vm261_vm1, %v9673_v0  ;;  %277 = vst.msk [vmem:[#allocation2 + $0x44] sm:$0x1] %vm261_vm1, %v9673_v0  ;;  %s9688_s19 = smov (!%p215_p3, %s5977_s19), 1  ;;  %s6885_s9 = smov 16  }
   0xe   : > { %275 = vst.msk [vmem:[#allocation2 + $0x3c] sm:$0xf] %vm258_vm0, %v9673_v0  ;;  %276 = vst.msk [vmem:[#allocation2 + $0x40] sm:$0xf] %vm258_vm0, %v9673_v0  ;;  %s6382_s20 = sshll.u32 %s9688_s19, 8  ;;  %s6886_s10 = smov 28  }
   0xf   : > { %278 = vst.msk [vmem:[#allocation2 + $0x48] sm:$0xf] %vm258_vm0, %v9673_v0  ;;  %279 = vst.msk [vmem:[#allocation2 + $0x4c] sm:$0xf] %vm258_vm0, %v9673_v0  ;;  %s7049_s23 = scalar_lea.vmem %s9666_s0, %s6382_s20  ;;  %v852_v4 = vld [vmem:[#allocation2 + $0x4] sm:$0xf] }
  0x10   : > { %280 = vst.msk [vmem:[#allocation2 + $0x50] sm:$0x1] %vm261_vm1, %v9673_v0  ;;  %283 = vst.msk [vmem:[#allocation2 + $0x5c] sm:$0x1] %vm261_vm1, %v9673_v0  ;;  %v228_v1 = vld [vmem:[%s7049_s23 + $0x10] sm:$0xff]  ;;  %v229_v2 = vld [vmem:[%s7049_s23 + $0x18] sm:$0xff] }
  0x11   : > { %281 = vst.msk [vmem:[#allocation2 + $0x54] sm:$0xf] %vm258_vm0, %v9673_v0  ;;  %282 = vst.msk [vmem:[#allocation2 + $0x58] sm:$0xf] %vm258_vm0, %v9673_v0  ;;  %v226_v3 = vld [vmem:[%s7049_s23] sm:$0xff]  ;;  %v6386_v6 = vpack.c.bf16 %v228_v1, %v228_v1  ;;  %v6387_v7 = vpack.c.bf16 %v229_v2, %v229_v2  ;;  %v227_v16 = vld [vmem:[%s7049_s23 + $0x8] sm:$0xff] }
  0x12   : > { %284 = vst.msk [vmem:[#allocation2 + $0x60] sm:$0xf] %vm258_vm0, %v9673_v0  ;;  %285 = vst.msk [vmem:[#allocation2 + $0x64] sm:$0xf] %vm258_vm0, %v9673_v0  ;;  %v899_v5 = vld [vmem:[#allocation2] sm:$0xe]  ;;  %v6384_v11 = vpack.c.bf16 %v226_v3, %v226_v3  ;;  %v6385_v30 = vpack.c.bf16 %v227_v16, %v227_v16 }
  0x13   : > { %286 = vst.msk [vmem:[#allocation2 + $0x68] sm:$0x1] %vm261_vm1, %v9673_v0  ;;  %289 = vst.msk [vmem:[#allocation2 + $0x74] sm:$0x1] %vm261_vm1, %v9673_v0  ;;  %v6050_v9 = vcombine.low %v899_v5, %v852_v4  ;;  %v851_v10 = vld [vmem:[#allocation2] sm:$0xf] }
  0x14   : > { %287 = vst.msk [vmem:[#allocation2 + $0x6c] sm:$0xf] %vm258_vm0, %v9673_v0  ;;  %288 = vst.msk [vmem:[#allocation2 + $0x70] sm:$0xf] %vm258_vm0, %v9673_v0  ;;  %v7054_v12 = vcombine.low %v851_v10, %v852_v4  ;;  %v431_v13 = vshrl.u32 %v6386_v6, 16  ;;  %v434_v14 = vshll.u32 %v6386_v6, 16 }
  0x15   : > { %290 = vst.msk [vmem:[#allocation2 + $0x78] sm:$0xf] %vm258_vm0, %v9673_v0  ;;  %291 = vst.msk [vmem:[#allocation2 + $0x7c] sm:$0xf] %vm258_vm0, %v9673_v0  ;;  %v439_v15 = vshrl.u32 %v6387_v7, 16  ;;  %v1446_v17 = vrot.slane %v6050_v9, 1 }
  0x16   : > { %292 = vst.msk [vmem:[#allocation2 + $0x80] sm:$0x1] %vm261_vm1, %v9673_v0  ;;  %295 = vst.msk [vmem:[#allocation2 + $0x8c] sm:$0x1] %vm261_vm1, %v9673_v0  ;;  %v442_v20 = vshll.u32 %v6387_v7, 16  ;;  %v1174_v21 = vshrl.u32 %v7054_v12, 16 }
  0x17   : > { %293 = vst.msk [vmem:[#allocation2 + $0x84] sm:$0xf] %vm258_vm0, %v9673_v0  ;;  %294 = vst.msk [vmem:[#allocation2 + $0x88] sm:$0xf] %vm258_vm0, %v9673_v0  ;;  %v1176_v22 = vshll.u32 %v7054_v12, 16  ;;  %v433_v24 = vrot.slane %v431_v13, 7 }
  0x18   : > { %296 = vst.msk [vmem:[#allocation2 + $0x90] sm:$0xf] %vm258_vm0, %v9673_v0  ;;  %297 = vst.msk [vmem:[#allocation2 + $0x94] sm:$0xf] %vm258_vm0, %v9673_v0  ;;  %v441_v25 = vrot.slane %v439_v15, 7  ;;  %v414_v31 = vshrl.u32 %v6384_v11, 16 }
  0x19   : > { %298 = vst.msk [vmem:[#allocation2 + $0x98] sm:$0x1] %vm261_vm1, %v9673_v0  ;;  %301 = vst.msk [vmem:[#allocation2 + $0xa4] sm:$0x1] %vm261_vm1, %v9673_v0  ;;  %v746_v29 = vld [vmem:[#allocation2 + $0x18] sm:$0xf]  ;;  %v436_v34 = vor.u32 %v434_v14, %v433_v24 }
  0x1a   : > { %299 = vst.msk [vmem:[#allocation2 + $0x9c] sm:$0xf] %vm258_vm0, %v9673_v0  ;;  %300 = vst.msk [vmem:[#allocation2 + $0xa0] sm:$0xf] %vm258_vm0, %v9673_v0  ;;  %v230_v32 = vld [vmem:[%s7049_s23 + $0x20] sm:$0xff]  ;;  %v1178_v33 = vrot.slane %v1176_v22, 1  ;;  %v444_v36 = vor.u32 %v442_v20, %v441_v25 }
  0x1b   : > { %302 = vst.msk [vmem:[#allocation2 + $0xa8] sm:$0xf] %vm258_vm0, %v9673_v0  ;;  %303 = vst.msk [vmem:[#allocation2 + $0xac] sm:$0xf] %vm258_vm0, %v9673_v0  ;;  %v437_v35 = vrot.slane %v433_v24, 4  ;;  %v231_v37 = vld [vmem:[%s7049_s23 + $0x28] sm:$0xff]  ;;  %v6388_v46 = vpack.c.bf16 %v230_v32, %v230_v32 }
  0x1c   : > { %304 = vst.msk [vmem:[#allocation2 + $0xb0] sm:$0x1] %vm261_vm1, %v9673_v0  ;;  %307 = vst.msk [vmem:[#allocation2 + $0xbc] sm:$0x1] %vm261_vm1, %v9673_v0  ;;  %v416_v38 = vrot.slane %v414_v31, 7  ;;  %v417_v39 = vshll.u32 %v6384_v11, 16  ;;  %v1179_v42 = vor.u32 %v1178_v33, %v1174_v21  ;;  %v6389_v50 = vpack.c.bf16 %v231_v37, %v231_v37 }
  0x1d   : > { %305 = vst.msk [vmem:[#allocation2 + $0xb4] sm:$0xf] %vm258_vm0, %v9673_v0  ;;  %306 = vst.msk [vmem:[#allocation2 + $0xb8] sm:$0xf] %vm258_vm0, %v9673_v0  ;;  %v422_v40 = vshrl.u32 %v6385_v30, 16  ;;  %v425_v41 = vshll.u32 %v6385_v30, 16 }
  0x1e   : > { %308 = vst.msk [vmem:[#allocation2 + $0xc0] sm:$0xf] %vm258_vm0, %v9673_v0  ;;  %309 = vst.msk [vmem:[#allocation2 + $0xc4] sm:$0xf] %vm258_vm0, %v9673_v0  ;;  %v737_v45 = vld [vmem:[#allocation2 + $0xc] sm:$0xf]  ;;  %v419_v47 = vor.u32 %v417_v39, %v416_v38 }
  0x1f   : > { %310 = vst.msk [vmem:[#allocation2 + $0xc8] sm:$0x1] %vm261_vm1, %v9673_v0  ;;  %313 = vst.msk [vmem:[#allocation2 + $0xd4] sm:$0x1] %vm261_vm1, %v9673_v0  ;;  %v420_v48 = vrot.slane %v416_v38, 4  ;;  %v424_v49 = vrot.slane %v422_v40, 7 }
  0x20   : > { %311 = vst.msk [vmem:[#allocation2 + $0xcc] sm:$0xf] %vm258_vm0, %v9673_v0  ;;  %312 = vst.msk [vmem:[#allocation2 + $0xd0] sm:$0xf] %vm258_vm0, %v9673_v0  ;;  %v750_v51 = vld [vmem:[#allocation2 + $0x20] sm:$0x1] }
  0x21   : > { %v6591_v8 = vld [vmem:[#allocation2 + $0x8] ss:$0 sps:$4 sm:$0x11]   ;;  %vm7061_vm7 = vmor %vm9672_vm2, %vm411_vm3  ;;  %v448_v53 = vshrl.u32 %v6388_v46, 16  ;;  %v451_v54 = vshll.u32 %v6388_v46, 16  ;;  %v446_v55 = vrot.slane %v441_v25, 4  ;;  %v427_v56 = vor.u32 %v425_v41, %v424_v49 }
  0x22   : > { %v1447_v18 = vrot.slane %v6591_v8, 1  ;;  %v1181_v19 = vshll.u32 %v6591_v8, 16  ;;  %vm7068_vm8 = vmand %vm258_vm0, %vm735_vm5  ;;  %v445_v43 = vsel %vm7061_vm7, %v437_v35, %v444_v36  ;;  %v456_v58 = vshrl.u32 %v6389_v50, 16  ;;  %v743_v61 = vld [vmem:[#allocation2 + $0x14] sm:$0x1]  ;;  %v233_v6 = vld [vmem:[%s7049_s23 + $0x38] sm:$0xff] }
  0x23   : > { %v747_v44 = vsel %vm7068_vm8, %v436_v34, %v746_v29  ;;  %749 = vst.msk [vmem:[#allocation2 + $0x1c] sm:$0xf] %vm258_vm0, %v445_v43  ;;  %v738_v57 = vsel %vm7068_vm8, %v419_v47, %v737_v45  ;;  %v459_v59 = vshll.u32 %v6389_v50, 16  ;;  %vm7086_vm9 = vmand %vm261_vm1, %vm9672_vm2  ;;  %v232_v62 = vld [vmem:[%s7049_s23 + $0x30] sm:$0xff]  ;;  %v450_v63 = vrot.slane %v448_v53, 7  ;;  %v234_v47 = vld [vmem:[%s7049_s23 + $0x40] sm:$0xff] }
  0x24   : > { %v1448_v26 = vsel %vm1445_vm6, %v1446_v17, %v1447_v18  ;;  %v1183_v27 = vrot.slane %v1181_v19, 1  ;;  %748 = vst [vmem:[#allocation2 + $0x18] sm:$0xf] %v747_v44  ;;  %739 = vst [vmem:[#allocation2 + $0xc] sm:$0xf] %v738_v57  ;;  %v429_v1 = vrot.slane %v424_v49, 4  ;;  %v751_v2 = vsel %vm7086_vm9, %v446_v55, %v750_v51 }
  0x25   : > { %1494 = vrot.lane.b32.xlu1 %v1448_v26, %s6879_s24  ;;  %v428_v3 = vsel %vm7061_vm7, %v420_v48, %v427_v56  ;;  %v458_v4 = vrot.slane %v456_v58, 7  ;;  %v753_v5 = vld [vmem:[#allocation2 + $0x24] sm:$0xf]  ;;  %752 = vst [vmem:[#allocation2 + $0x20] sm:$0x1] %v751_v2  ;;  %v453_v7 = vor.u32 %v451_v54, %v450_v63  ;;  %v454_v8 = vrot.slane %v450_v63, 4 }
  0x26   : > { %v1184_v52 = vsel %vm1172_vm4, %v1179_v42, %v1183_v27  ;;  %740 = vst.msk [vmem:[#allocation2 + $0x10] sm:$0xf] %vm258_vm0, %v428_v3  ;;  %v744_v9 = vsel %vm7086_vm9, %v429_v1, %v743_v61  ;;  %v757_v10 = vld [vmem:[#allocation2 + $0x2c] sm:$0x1]  ;;  %v7099_v11 = vpack.c.bf16 %v232_v62, %v232_v62  ;;  %v7103_v19 = vpack.c.bf16 %v233_v6, %v233_v6  ;;  %s6887_s15 = smov 48   ;;  %s6888_s16 = smov 40  }
  0x27   : > { %1365 = vrot.lane.b32.xlu0 %v1184_v52, %s6880_s25  ;;  %v461_v13 = vor.u32 %v459_v59, %v458_v4  ;;  %745 = vst [vmem:[#allocation2 + $0x14] sm:$0x1] %v744_v9  ;;  %v463_v14 = vrot.slane %v458_v4, 4  ;;  %v754_v18 = vsel %vm7068_vm8, %v453_v7, %v753_v5  ;;  %v7143_v6 = vpack.c.bf16 %v234_v47, %v234_v47  ;;  %v236_v47 = vld [vmem:[%s7049_s23 + $0x50] sm:$0xff]  ;;  %s6889_s17 = smov 64   ;;  %s6890_s21 = smov 56  }
  0x28   : > { %755 = vst [vmem:[#allocation2 + $0x24] sm:$0xf] %v754_v18  ;;  %v465_v27 = vshrl.u32 %v7099_v11, 16  ;;  %v468_v29 = vshll.u32 %v7099_v11, 16  ;;  %v473_v37 = vshrl.u32 %v7103_v19, 16  ;;  %vm2874_vm10 = vcmask 1041408  }
  0x29   : > { %v462_v21 = vsel %vm7061_vm7, %v454_v8, %v461_v13  ;;  %v758_v24 = vsel %vm7086_vm9, %v463_v14, %v757_v10  ;;  %v235_v14 = vld [vmem:[%s7049_s23 + $0x48] sm:$0xff]  ;;  %vm2550_vm11 = vcmask 31744   ;;  %vm2583_vm12 = vcmask 64512  }
  0x2a   : > { %v918_v16 = vld [vmem:[#allocation2 + $0x1c] sm:$0xf]  ;;  %756 = vst.msk [vmem:[#allocation2 + $0x28] sm:$0xf] %vm258_vm0, %v462_v21  ;;  %759 = vst [vmem:[#allocation2 + $0x2c] sm:$0x1] %v758_v24 }
  0x2b   : > { %v917_v15 = vld [vmem:[#allocation2 + $0x18] sm:$0xf]  ;;  %v981_v26 = vld [vmem:[#allocation2 + $0x1c] sm:$0xf]  ;;  %v915_v30 = vld [vmem:[#allocation2 + $0xc] sm:$0xf] }
  0x2c   : > { %v964_v17 = vld [vmem:[#allocation2 + $0x18] sm:$0xe]  ;;  %v7105_v20 = vcombine.low %v917_v15, %v918_v16  ;;  %v963_v31 = vld [vmem:[#allocation2 + $0xc] sm:$0xe]  ;;  %v7122_v46 = vld [vmem:[#allocation2 + $0x1c] sm:$0xf] }
  0x2d   : > { %v1028_v22 = vld [vmem:[#allocation2 + $0x18] sm:$0xe]  ;;  %v6099_v25 = vcombine.low %v964_v17, %v918_v16  ;;  %v900_v35 = vld [vmem:[#allocation2 + $0xc] sm:$0xe]  ;;  %v916_v38 = vld [vmem:[#allocation2 + $0x10] sm:$0xf] }
  0x2e   : > { %1608 = vrot.lane.b32.xlu1 %v7105_v20, %s6881_s26  ;;  %v980_v32 = vld [vmem:[#allocation2 + $0x18] sm:$0xf]  ;;  %v6146_v33 = vcombine.low %v1028_v22, %v981_v26  ;;  %v1701_v34 = vshll.u32 %v7105_v20, 16  ;;  %v853_v36 = vld [vmem:[#allocation2 + $0xc] sm:$0xf]  ;;  %v7118_v40 = vcombine.low %v915_v30, %v916_v38  ;;  %v6098_v41 = vcombine.low %v963_v31, %v916_v38 }
  0x2f   : > { %v854_v39 = vld [vmem:[#allocation2 + $0x10] sm:$0xf]  ;;  %v7120_v42 = vld [vmem:[#allocation2 + $0x14] ss:$0 sps:$4 sm:$0x11]   ;;  %v1961_v44 = vrot.slane %v6099_v25, 1  ;;  %v7131_v53 = vcombine.low %v980_v32, %v981_v26  ;;  %v7157_v32 = vpack.c.bf16 %v235_v14, %v235_v14 }
  0x30   : > { %v6051_v43 = vcombine.low %v900_v35, %v854_v39  ;;  %v855_v45 = vld [vmem:[#allocation2 + $0x18] sm:$0xf]  ;;  %v7125_v48 = vld [vmem:[#allocation2 + $0x14] ss:$0 sps:$4 sm:$0x11]   ;;  %v7127_v49 = vcombine.low %v853_v36, %v854_v39  ;;  %v2470_v50 = vrot.slane %v6146_v33, 1  ;;  %1606 = vrot.lane.b32.xlu0 %v7118_v40, %s6881_s26 }
  0x31   : > { %v982_v51 = vld [vmem:[#allocation2 + $0x24] sm:$0xf]  ;;  %v1958_v54 = vrot.slane %v6098_v41, 1  ;;  %v1699_v55 = vshrl.u32 %v7105_v20, 16  ;;  %v983_v56 = vld [vmem:[#allocation2 + $0x28] sm:$0xf]  ;;  %v7141_v5 = vcombine.low %v855_v45, %v7122_v46 }
  0x32   : > { %v1029_v52 = vld [vmem:[#allocation2 + $0x24] sm:$0xe]  ;;  %v1959_v57 = vrot.slane %v7120_v42, 1  ;;  %v1449_v58 = vrot.slane %v6051_v43, 1  ;;  %v1450_v59 = vrot.slane %v7125_v48, 1  ;;  %v1703_v61 = vrot.slane %v1701_v34, 1 }
  0x33   : > { %v6115_v62 = vcombine.low %v982_v51, %v983_v56  ;;  %v7136_v63 = vld [vmem:[#allocation2 + $0x20] ss:$0 sps:$4 sm:$0x11]   ;;  %v1186_v1 = vshrl.u32 %v7127_v49, 16  ;;  %v6147_v2 = vcombine.low %v1029_v52, %v983_v56  ;;  %v1188_v4 = vshll.u32 %v7127_v49, 16 }
  0x34   : > { %v6607_v3 = vld [vmem:[#allocation2 + $0x20] ss:$0 sps:$4 sm:$0x11]   ;;  %2118 = vrot.lane.b32.xlu0 %v7131_v53, %s6882_s27  ;;  %v1960_v8 = vsel %vm1445_vm6, %v1958_v54, %v1959_v57  ;;  %v1451_v9 = vsel %vm1445_vm6, %v1449_v58, %v1450_v59  ;;  %v2471_v10 = vrot.slane %v7136_v63, 1  ;;  %v1689_v20 = vshll.u32 %v7118_v40, 16 }
  0x35   : > { %v2213_v7 = vshll.u32 %v6115_v62, 16  ;;  %2120 = vrot.lane.b32.xlu1 %v6115_v62, %s6882_s27  ;;  %v6608_v13 = vld [vmem:[#allocation2 + $0x2c] ss:$0 sps:$4 sm:$0x11]   ;;  %v1962_v15 = vrot.slane %v6607_v3, 1  ;;  %v1706_v16 = vshll.u32 %v6607_v3, 16  ;;  %v1704_v35 = vor.u32 %v1703_v61, %v1699_v55 }
  0x36   : > { %v2211_v17 = vshrl.u32 %v6115_v62, 16  ;;  %v1190_v18 = vrot.slane %v1188_v4, 1  ;;  %v2201_v21 = vshll.u32 %v7131_v53, 16  ;;  %v2218_v24 = vshll.u32 %v6608_v13, 16  ;;  %v857_v36 = vld [vmem:[#allocation2 + $0x24] sm:$0xf] }
  0x37   : > { %v2215_v22 = vrot.slane %v2213_v7, 1  ;;  %v2473_v25 = vrot.slane %v6147_v2, 1  ;;  %v2474_v26 = vrot.slane %v6608_v13, 1  ;;  %v1193_v30 = vshll.u32 %v7125_v48, 16  ;;  %v858_v38 = vld [vmem:[#allocation2 + $0x28] sm:$0xf] }
  0x38   : > { %v7155_v31 = vld [vmem:[#allocation2 + $0x20] ss:$0 sps:$4 sm:$0x11]   ;;  %2006 = vrot.lane.b32.xlu0 %v1960_v8, %s6883_s28  ;;  %v2472_v33 = vsel %vm1445_vm6, %v2470_v50, %v2471_v10  ;;  %v1963_v34 = vsel %vm1445_vm6, %v1961_v44, %v1962_v15  ;;  %v1708_v39 = vrot.slane %v1706_v16, 1  ;;  %v1191_v43 = vor.u32 %v1190_v18, %v1186_v1  ;;  %v237_v48 = vld [vmem:[%s7049_s23 + $0x58] sm:$0xff]  ;;  %v6676_v2 = vld [vmem:[%s9667_s1 + $0x8] sm:$0xff]  }
  0x39   : > { %1496 = vrot.lane.b32.xlu1 %v1451_v9, %s6879_s24  ;;  %v2216_v41 = vor.u32 %v2215_v22, %v2211_v17  ;;  %v1200_v45 = vshll.u32 %v7141_v5, 16  ;;  %v2220_v51 = vrot.slane %v2218_v24, 1  ;;  %v1687_v52 = vshrl.u32 %v7118_v40, 16  ;;  %v7168_v57 = vld [vmem:[#allocation2 + $0x18] sm:$0xe]  ;;  %v6673_v44 = vld [vmem:[%s9667_s1] sm:$0xff]  }
  0x3a   : > { %v1691_v54 = vrot.slane %v1689_v20, 1  ;;  %v1694_v56 = vshll.u32 %v7120_v42, 16  ;;  %v1195_v50 = vrot.slane %v1193_v30, 1  ;;  %v1198_v55 = vshrl.u32 %v7141_v5, 16  ;;  %v902_v61 = vld [vmem:[#allocation2 + $0x24] sm:$0xe]  ;;  %6488 = vmatprep.subr.bf16.mxu0 %v6673_v44 }
  0x3b   : > { %v1205_v58 = vshll.u32 %v7155_v31, 16  ;;  %v7175_v59 = vcombine.low %v857_v36, %v858_v38  ;;  %v2475_v40 = vsel %vm1445_vm6, %v2473_v25, %v2474_v26  ;;  %v7180_v42 = vld [vmem:[#allocation2 + $0x2c] ss:$0 sps:$4 sm:$0x11]   ;;  %v7182_v62 = vpack.c.bf16 %v236_v47, %v236_v47  ;;  %6489 = vmatpush3.bf16.msra.mxu0 %v6673_v44  ;;  %v919_v22 = vld [vmem:[#allocation2 + $0x24] sm:$0xf] }
  0x3c   : > { %2518 = vrot.lane.b32.xlu0 %v2472_v33, %s6884_s6  ;;  %v7184_v1 = vpack.c.bf16 %v237_v48, %v237_v48  ;;  %v1709_v3 = vsel %vm1172_vm4, %v1704_v35, %v1708_v39  ;;  %v1202_v4 = vrot.slane %v1200_v45, 1  ;;  %v1692_v7 = vor.u32 %v1691_v54, %v1687_v52  ;;  %6490 = vmatprep.subr.bf16.mxu0 %v6676_v2  ;;  %v7206_v30 = vld [vmem:[#allocation2 + $0x28] sm:$0xf]  ;;  %v764_v39 = vld [vmem:[#allocation2 + $0x38] sm:$0x1] }
  0x3d   : > { %2008 = vrot.lane.b32.xlu1 %v1963_v34, %s6883_s28  ;;  %v1212_v8 = vshll.u32 %v7175_v59, 16  ;;  %v1696_v9 = vrot.slane %v1694_v56, 1  ;;  %v2199_v10 = vshrl.u32 %v7131_v53, 16  ;;  %v2203_v13 = vrot.slane %v2201_v21, 1 }
  0x3e   : > { %v2206_v14 = vshll.u32 %v7136_v63, 16  ;;  %v2221_v15 = vsel %vm1172_vm4, %v2216_v41, %v2220_v51  ;;  %v1196_v16 = vsel %vm1172_vm4, %v1191_v43, %v1195_v50  ;;  %v6053_v17 = vcombine.low %v902_v61, %v858_v38  ;;  %v760_v38 = vld [vmem:[#allocation2 + $0x30] sm:$0xf]  ;;  %v7222_v54 = vld [vmem:[#allocation2 + $0x2c] ss:$0 sps:$4 sm:$0x11]  }
  0x3f   : > { %v6052_v18 = vcombine.low %v7168_v57, %v7122_v46  ;;  %v1207_v20 = vrot.slane %v1205_v58, 1  ;;  %v1210_v53 = vshrl.u32 %v7175_v59, 16  ;;  %v1214_v21 = vrot.slane %v1212_v8, 1  ;;  %6491 = vmatpush3.bf16.msra.mxu0 %v6676_v2 }
  0x40   : > { %2520 = vrot.lane.b32.xlu0 %v2475_v40, %s6884_s6  ;;  %v1217_v63 = vshll.u32 %v7180_v42, 16  ;;  %v1203_v24 = vor.u32 %v1202_v4, %v1198_v55  ;;  %v467_v25 = vrot.slane %v465_v27, 7  ;;  %v475_v46 = vrot.slane %v473_v37, 7 }
  0x41   : > { %1880 = vrot.lane.b32.xlu1 %v1709_v3, %s6885_s9  ;;  %v476_v26 = vshll.u32 %v7103_v19, 16  ;;  %v1697_v33 = vsel %vm1172_vm4, %v1692_v7, %v1696_v9  ;;  %v2204_v34 = vor.u32 %v2203_v13, %v2199_v10  ;;  %v2208_v35 = vrot.slane %v2206_v14, 1  ;;  %v767_v7 = vld [vmem:[#allocation2 + $0x3c] sm:$0xf]  ;;  %v771_v14 = vld [vmem:[#allocation2 + $0x44] sm:$0x1] }
  0x42   : > { %v1456_v36 = vrot.slane %v7180_v42, 1  ;;  %v1455_v41 = vrot.slane %v6053_v17, 1  ;;  %v470_v27 = vor.u32 %v468_v29, %v467_v25  ;;  %v471_v43 = vrot.slane %v467_v25, 4 }
  0x43   : > { %v478_v45 = vor.u32 %v476_v26, %v475_v46  ;;  %v1215_v19 = vor.u32 %v1214_v21, %v1210_v53  ;;  %v1219_v37 = vrot.slane %v1217_v63, 1  ;;  %v7215_v47 = vcombine.low %v919_v22, %v7206_v30  ;;  %v774_v53 = vld [vmem:[#allocation2 + $0x48] sm:$0xf] }
  0x44   : > { %1367 = vrot.lane.b32.xlu0 %v1196_v16, %s6880_s25  ;;  %v480_v48 = vrot.slane %v475_v46, 4  ;;  %v1208_v51 = vsel %vm1172_vm4, %v1203_v24, %v1207_v20  ;;  %v1452_v52 = vrot.slane %v6052_v18, 1  ;;  %v761_v29 = vsel %vm7068_vm8, %v470_v27, %v760_v38  ;;  %v778_v24 = vld [vmem:[#allocation2 + $0x50] sm:$0x1] }
  0x45   : > { %2392 = vrot.lane.b32.xlu1 %v2221_v15, %s6886_s10  ;;  %v479_v11 = vsel %vm7061_vm7, %v471_v43, %v478_v45  ;;  %v2209_v56 = vsel %vm1172_vm4, %v2204_v34, %v2208_v35  ;;  %v1453_v57 = vrot.slane %v7155_v31, 1  ;;  %762 = vst [vmem:[#allocation2 + $0x30] sm:$0xf] %v761_v29  ;;  %v482_v50 = vshrl.u32 %v7143_v6, 16 }
  0x46   : > { %763 = vst.msk [vmem:[#allocation2 + $0x34] sm:$0xf] %vm258_vm0, %v479_v11  ;;  %v765_v44 = vsel %vm7086_vm9, %v480_v48, %v764_v39  ;;  %v1457_v55 = vsel %vm1445_vm6, %v1455_v41, %v1456_v36  ;;  %v485_v58 = vshll.u32 %v7143_v6, 16  ;;  %v490_v61 = vshrl.u32 %v7157_v32, 16 }
  0x47   : > { %766 = vst [vmem:[#allocation2 + $0x38] sm:$0x1] %v765_v44  ;;  %v493_v40 = vshll.u32 %v7157_v32, 16  ;;  %v1220_v31 = vsel %vm1172_vm4, %v1215_v19, %v1219_v37  ;;  %v1713_v42 = vshll.u32 %v7215_v47, 16  ;;  %v484_v2 = vrot.slane %v482_v50, 7 }
  0x48   : > { %1878 = vrot.lane.b32.xlu0 %v1697_v33, %s6885_s9  ;;  %v499_v3 = vshrl.u32 %v7182_v62, 16  ;;  %v492_v4 = vrot.slane %v490_v61, 7  ;;  %v502_v8 = vshll.u32 %v7182_v62, 16  ;;  %v507_v6 = vshrl.u32 %v7184_v1, 16  ;;  %v965_v62 = vld [vmem:[#allocation2 + $0x24] sm:$0xe] }
  0x49   : > { %1369 = vrot.lane.b32.xlu1 %v1208_v51, %s6880_s25  ;;  %v510_v9 = vshll.u32 %v7184_v1, 16  ;;  %v1711_v32 = vshrl.u32 %v7215_v47, 16  ;;  %v487_v10 = vor.u32 %v485_v58, %v484_v2  ;;  %v488_v13 = vrot.slane %v484_v2, 4 }
  0x4a   : > { %v501_v15 = vrot.slane %v499_v3, 7  ;;  %v1718_v16 = vshll.u32 %v7222_v54, 16  ;;  %v495_v17 = vor.u32 %v493_v40, %v492_v4  ;;  %v497_v18 = vrot.slane %v492_v4, 4 }
  0x4b   : > { %v509_v20 = vrot.slane %v507_v6, 7  ;;  %v1715_v21 = vrot.slane %v1713_v42, 1  ;;  %v768_v1 = vsel %vm7068_vm8, %v487_v10, %v767_v7  ;;  %v1454_v25 = vsel %vm1445_vm6, %v1452_v52, %v1453_v57  ;;  %v238_v42 = vld [vmem:[%s7049_s23 + $0x60] sm:$0xff] }
  0x4c   : > { %2390 = vrot.lane.b32.xlu0 %v2209_v56, %s6886_s10  ;;  %v504_v63 = vor.u32 %v502_v8, %v501_v15  ;;  %v505_v22 = vrot.slane %v501_v15, 4  ;;  %v921_v46 = vld [vmem:[#allocation2 + $0x30] sm:$0xf]  ;;  %v496_v34 = vsel %vm7061_vm7, %v488_v13, %v495_v17  ;;  %769 = vst [vmem:[#allocation2 + $0x3c] sm:$0xf] %v768_v1  ;;  %v772_v35 = vsel %vm7086_vm9, %v497_v18, %v771_v14 }
  0x4d   : > { %1371 = vrot.lane.b32.xlu1 %v1220_v31, %s6880_s25  ;;  %v922_v26 = vld [vmem:[#allocation2 + $0x34] sm:$0xf]  ;;  %v966_v33 = vld [vmem:[#allocation2 + $0x30] sm:$0xe]  ;;  %v512_v36 = vor.u32 %v510_v9, %v509_v20  ;;  %770 = vst.msk [vmem:[#allocation2 + $0x40] sm:$0xf] %vm258_vm0, %v496_v34  ;;  %v6100_v45 = vcombine.low %v965_v62, %v7206_v30  ;;  %v1716_v29 = vor.u32 %v1715_v21, %v1711_v32 }
  0x4e   : > { %v6069_v38 = vcombine.low %v921_v46, %v922_v26  ;;  %v6619_v39 = vld [vmem:[#allocation2 + $0x38] ss:$0 sps:$4 sm:$0x11]   ;;  %773 = vst [vmem:[#allocation2 + $0x44] sm:$0x1] %v772_v35  ;;  %v775_v41 = vsel %vm7068_vm8, %v504_v63, %v774_v53  ;;  %v514_v27 = vrot.slane %v509_v20, 4  ;;  %v6101_v43 = vcombine.low %v966_v33, %v922_v26 }
  0x4f   : > { %v984_v19 = vld [vmem:[#allocation2 + $0x30] sm:$0xf]  ;;  %v7257_v37 = vld [vmem:[#allocation2 + $0x34] sm:$0xf]  ;;  %v513_v48 = vsel %vm7061_vm7, %v505_v22, %v512_v36  ;;  %776 = vst [vmem:[#allocation2 + $0x48] sm:$0xf] %v775_v41  ;;  %v6396_v18 = vpack.c.bf16 %v238_v42, %v238_v42 }
  0x50   : > { %1498 = vrot.lane.b32.xlu0 %v1454_v25, %s6879_s24  ;;  %v1725_v51 = vshll.u32 %v6069_v38, 16  ;;  %v1723_v52 = vshrl.u32 %v6069_v38, 16  ;;  %v1730_v11 = vshll.u32 %v6619_v39, 16  ;;  %777 = vst.msk [vmem:[#allocation2 + $0x4c] sm:$0xf] %vm258_vm0, %v513_v48  ;;  %v1720_v56 = vrot.slane %v1718_v16, 1 }
  0x51   : > { %1500 = vrot.lane.b32.xlu1 %v1457_v55, %s6879_s24  ;;  %v7265_v30 = vcombine.low %v984_v19, %v7257_v37  ;;  %v859_v57 = vld [vmem:[#allocation2 + $0x30] sm:$0xf]  ;;  %v779_v44 = vsel %vm7086_vm9, %v514_v27, %v778_v24  ;;  %v7269_v55 = vld [vmem:[#allocation2 + $0x34] sm:$0xf]  ;;  %v1967_v61 = vrot.slane %v6101_v43, 1  ;;  %v1964_v40 = vrot.slane %v6100_v45, 1 }
  0x52   : > { %v1727_v50 = vrot.slane %v1725_v51, 1  ;;  %v1732_v58 = vrot.slane %v1730_v11, 1  ;;  %780 = vst [vmem:[#allocation2 + $0x50] sm:$0x1] %v779_v44  ;;  %v1965_v31 = vrot.slane %v7222_v54, 1  ;;  %v1968_v3 = vrot.slane %v6619_v39, 1 }
  0x53   : > { %v986_v4 = vld [vmem:[#allocation2 + $0x3c] sm:$0xf]  ;;  %v7276_v7 = vld [vmem:[#allocation2 + $0x38] ss:$0 sps:$4 sm:$0x11]   ;;  %v7279_v8 = vcombine.low %v859_v57, %v7269_v55  ;;  %v1721_v6 = vsel %vm1172_vm4, %v1716_v29, %v1720_v56  ;;  %v2225_v54 = vshll.u32 %v7265_v30, 16 }
  0x54   : > { %1610 = vrot.lane.b32.xlu0 %v7215_v47, %s6881_s26  ;;  %v1728_v2 = vor.u32 %v1727_v50, %v1723_v52  ;;  %v7282_v9 = vld [vmem:[#allocation2 + $0x40] sm:$0xf]  ;;  %v1030_v13 = vld [vmem:[#allocation2 + $0x30] sm:$0xe]  ;;  %v861_v14 = vld [vmem:[#allocation2 + $0x3c] sm:$0xf]  ;;  %v1966_v15 = vsel %vm1445_vm6, %v1964_v40, %v1965_v31  ;;  %v1969_v20 = vsel %vm1445_vm6, %v1967_v61, %v1968_v3 }
  0x55   : > { %1612 = vrot.lane.b32.xlu1 %v6069_v38, %s6881_s26  ;;  %v6117_v10 = vcombine.low %v986_v4, %v7282_v9  ;;  %v7287_v47 = vld [vmem:[#allocation2 + $0x44] ss:$0 sps:$4 sm:$0x11]   ;;  %v2223_v16 = vshrl.u32 %v7265_v30, 16  ;;  %v7291_v17 = vld [vmem:[#allocation2 + $0x40] sm:$0xf]  ;;  %v6148_v26 = vcombine.low %v1030_v13, %v7257_v37 }
  0x56   : > { %v1733_v32 = vsel %vm1172_vm4, %v1728_v2, %v1732_v58  ;;  %v2230_v62 = vshll.u32 %v7276_v7, 16  ;;  %v7297_v21 = vld [vmem:[#allocation2 + $0x38] ss:$0 sps:$4 sm:$0x11]   ;;  %v1224_v1 = vshll.u32 %v7279_v8, 16  ;;  %v2242_v22 = vshll.u32 %v7287_v47, 16 }
  0x57   : > { %v2237_v53 = vshll.u32 %v6117_v10, 16  ;;  %v2235_v63 = vshrl.u32 %v6117_v10, 16  ;;  %v2227_v24 = vrot.slane %v2225_v54, 1  ;;  %v7302_v25 = vcombine.low %v861_v14, %v7291_v17  ;;  %v239_v33 = vld [vmem:[%s7049_s23 + $0x68] sm:$0xff]  ;;  %v1031_v35 = vld [vmem:[#allocation2 + $0x3c] sm:$0xe] }
  0x58   : > { %1882 = vrot.lane.b32.xlu0 %v1721_v6, %s6885_s9  ;;  %v516_v34 = vshrl.u32 %v6396_v18, 16  ;;  %v2232_v36 = vrot.slane %v2230_v62, 1  ;;  %v1222_v38 = vshrl.u32 %v7279_v8, 16  ;;  %v1226_v39 = vrot.slane %v1224_v1, 1  ;;  %v904_v29 = vld [vmem:[#allocation2 + $0x3c] sm:$0xe] }
  0x59   : > { %1884 = vrot.lane.b32.xlu1 %v1733_v32, %s6885_s9  ;;  %v2239_v46 = vrot.slane %v2237_v53, 1  ;;  %v1229_v41 = vshll.u32 %v7297_v21, 16  ;;  %v2244_v43 = vrot.slane %v2242_v22, 1  ;;  %v2228_v45 = vor.u32 %v2227_v24, %v2223_v16  ;;  %v7310_v19 = vld [vmem:[#allocation2 + $0x44] ss:$0 sps:$4 sm:$0x11]  }
  0x5a   : > { %v1236_v37 = vshll.u32 %v7302_v25, 16  ;;  %v519_v48 = vshll.u32 %v6396_v18, 16  ;;  %v6149_v51 = vcombine.low %v1031_v35, %v7282_v9  ;;  %v2476_v52 = vrot.slane %v6148_v26, 1  ;;  %v903_v56 = vld [vmem:[#allocation2 + $0x30] sm:$0xe]  ;;  %v241_v62 = vld [vmem:[%s7049_s23 + $0x78] sm:$0xff] }
  0x5b   : > { %v2240_v27 = vor.u32 %v2239_v46, %v2235_v63  ;;  %v2477_v11 = vrot.slane %v7276_v7, 1  ;;  %v6397_v57 = vpack.c.bf16 %v239_v33, %v239_v33  ;;  %v1227_v44 = vor.u32 %v1226_v39, %v1222_v38  ;;  %v925_v3 = vld [vmem:[#allocation2 + $0x48] sm:$0xf]  ;;  %v7322_v4 = vld [vmem:[#allocation2 + $0x4c] sm:$0xf]  ;;  %v240_v53 = vld [vmem:[%s7049_s23 + $0x70] sm:$0xff] }
  0x5c   : > { %2010 = vrot.lane.b32.xlu0 %v1966_v15, %s6883_s28  ;;  %v1231_v50 = vrot.slane %v1229_v41, 1  ;;  %v1234_v58 = vshrl.u32 %v7302_v25, 16  ;;  %v518_v61 = vrot.slane %v516_v34, 7  ;;  %v2233_v31 = vsel %vm1172_vm4, %v2228_v45, %v2232_v36  ;;  %v7326_v9 = vld [vmem:[#allocation2 + $0x40] sm:$0xf] }
  0x5d   : > { %2012 = vrot.lane.b32.xlu1 %v1969_v20, %s6883_s28  ;;  %v2245_v40 = vsel %vm1172_vm4, %v2240_v27, %v2244_v43  ;;  %v1238_v42 = vrot.slane %v1236_v37, 1  ;;  %v1241_v2 = vshll.u32 %v7310_v19, 16  ;;  %v6055_v7 = vcombine.low %v904_v29, %v7291_v17  ;;  %v781_v13 = vld [vmem:[#allocation2 + $0x54] sm:$0xf]  ;;  %v968_v22 = vld [vmem:[#allocation2 + $0x48] sm:$0xe] }
  0x5e   : > { %v6054_v6 = vcombine.low %v903_v56, %v7269_v55  ;;  %v2478_v54 = vsel %vm1445_vm6, %v2476_v52, %v2477_v11  ;;  %v2479_v32 = vrot.slane %v6149_v51, 1  ;;  %v1232_v14 = vsel %vm1172_vm4, %v1227_v44, %v1231_v50  ;;  %v242_v26 = vld [vmem:[%s7049_s23 + $0x80] sm:$0xff]  ;;  %v7346_v34 = vld [vmem:[#allocation2 + $0x50] ss:$0 sps:$4 sm:$0x11]  }
  0x5f   : > { %v1462_v55 = vrot.slane %v7310_v19, 1  ;;  %v7335_v15 = vcombine.low %v925_v3, %v7322_v4  ;;  %v521_v16 = vor.u32 %v519_v48, %v518_v61  ;;  %v1239_v17 = vor.u32 %v1238_v42, %v1234_v58  ;;  %v7352_v41 = vld [vmem:[#allocation2 + $0x44] ss:$0 sps:$4 sm:$0x11]   ;;  %v785_v27 = vld [vmem:[#allocation2 + $0x5c] sm:$0x1] }
  0x60   : > { %2122 = vrot.lane.b32.xlu0 %v7265_v30, %s6882_s27  ;;  %v923_v30 = vld [vmem:[#allocation2 + $0x3c] sm:$0xf]  ;;  %v1243_v18 = vrot.slane %v1241_v2, 1  ;;  %v1461_v1 = vrot.slane %v6055_v7, 1  ;;  %v1458_v63 = vrot.slane %v6054_v6, 1  ;;  %v527_v24 = vshll.u32 %v6397_v57, 16 }
  0x61   : > { %2124 = vrot.lane.b32.xlu1 %v6117_v10, %s6882_s27  ;;  %v2480_v10 = vrot.slane %v7287_v47, 1  ;;  %v7338_v20 = vcombine.low %v923_v30, %v7326_v9  ;;  %v524_v47 = vshrl.u32 %v6397_v57, 16  ;;  %v782_v46 = vsel %vm7068_vm8, %v521_v16, %v781_v13  ;;  %v967_v56 = vld [vmem:[#allocation2 + $0x3c] sm:$0xe]  ;;  %v243_v58 = vld [vmem:[%s7049_s23 + $0x88] sm:$0xff] }
  0x62   : > { %v1459_v33 = vrot.slane %v7297_v21, 1  ;;  %v522_v35 = vrot.slane %v518_v61, 4  ;;  %783 = vst [vmem:[#allocation2 + $0x54] sm:$0xf] %v782_v46  ;;  %v1749_v39 = vshll.u32 %v7335_v15, 16  ;;  %v6398_v43 = vpack.c.bf16 %v240_v53, %v240_v53 }
  0x63   : > { %v526_v36 = vrot.slane %v524_v47, 7  ;;  %v2481_v38 = vsel %vm1445_vm6, %v2479_v32, %v2480_v10  ;;  %v6399_v45 = vpack.c.bf16 %v241_v62, %v241_v62  ;;  %v1244_v21 = vsel %vm1172_vm4, %v1239_v17, %v1243_v18  ;;  %v988_v2 = vld [vmem:[#allocation2 + $0x48] sm:$0xf]  ;;  %v788_v18 = vld [vmem:[#allocation2 + $0x60] sm:$0xf] }
  0x64   : > { %2394 = vrot.lane.b32.xlu0 %v2233_v31, %s6886_s10  ;;  %v1737_v19 = vshll.u32 %v7338_v20, 16  ;;  %v1463_v51 = vsel %vm1445_vm6, %v1461_v1, %v1462_v55  ;;  %v6103_v52 = vcombine.low %v968_v22, %v7322_v4  ;;  %v7358_v11 = vpack.c.bf16 %v242_v26, %v242_v26  ;;  %v7373_v4 = vld [vmem:[#allocation2 + $0x4c] sm:$0xf]  ;;  %v792_v1 = vld [vmem:[#allocation2 + $0x68] sm:$0x1] }
  0x65   : > { %2396 = vrot.lane.b32.xlu1 %v2245_v40, %s6886_s10  ;;  %v529_v37 = vor.u32 %v527_v24, %v526_v36  ;;  %v531_v48 = vrot.slane %v526_v36, 4  ;;  %v1460_v29 = vsel %vm1445_vm6, %v1458_v63, %v1459_v33  ;;  %v1754_v57 = vshll.u32 %v7346_v34, 16  ;;  %v7385_v46 = vld [vmem:[#allocation2 + $0x4c] sm:$0xf] }
  0x66   : > { %v1747_v61 = vshrl.u32 %v7335_v15, 16  ;;  %v1751_v40 = vrot.slane %v1749_v39, 1  ;;  %v1735_v31 = vshrl.u32 %v7338_v20, 16  ;;  %v1742_v42 = vshll.u32 %v7352_v41, 16 }
  0x67   : > { %v530_v44 = vsel %vm7061_vm7, %v522_v35, %v529_v37  ;;  %v786_v50 = vsel %vm7086_vm9, %v531_v48, %v785_v27  ;;  %v1739_v3 = vrot.slane %v1737_v19, 1  ;;  %v533_v7 = vshrl.u32 %v6398_v43, 16 }
  0x68   : > { %2522 = vrot.lane.b32.xlu0 %v2478_v54, %s6884_s6  ;;  %784 = vst.msk [vmem:[#allocation2 + $0x58] sm:$0xf] %vm258_vm0, %v530_v44  ;;  %787 = vst [vmem:[#allocation2 + $0x5c] sm:$0x1] %v786_v50  ;;  %v536_v6 = vshll.u32 %v6398_v43, 16  ;;  %v541_v30 = vshrl.u32 %v6399_v45, 16  ;;  %v6102_v54 = vcombine.low %v967_v56, %v7326_v9  ;;  %v7377_v13 = vpack.c.bf16 %v243_v58, %v243_v58 }
  0x69   : > { %1373 = vrot.lane.b32.xlu1 %v1232_v14, %s6880_s25  ;;  %v1973_v32 = vrot.slane %v6103_v52, 1  ;;  %v1974_v10 = vrot.slane %v7346_v34, 1  ;;  %v1756_v14 = vrot.slane %v1754_v57, 1  ;;  %v535_v55 = vrot.slane %v533_v7, 7  ;;  %v863_v9 = vld [vmem:[#allocation2 + $0x48] sm:$0xf] }
  0x6a   : > { %v543_v16 = vrot.slane %v541_v30, 7  ;;  %v544_v17 = vshll.u32 %v6399_v45, 16  ;;  %v1752_v47 = vor.u32 %v1751_v40, %v1747_v61  ;;  %v1744_v53 = vrot.slane %v1742_v42, 1  ;;  %v990_v24 = vld [vmem:[#allocation2 + $0x54] sm:$0xf] }
  0x6b   : > { %v7382_v62 = vcombine.low %v988_v2, %v7373_v4  ;;  %v550_v63 = vshrl.u32 %v7358_v11, 16  ;;  %v1740_v22 = vor.u32 %v1739_v3, %v1735_v31  ;;  %v538_v26 = vor.u32 %v536_v6, %v535_v55  ;;  %v7421_v61 = vld [vmem:[#allocation2 + $0x50] ss:$0 sps:$4 sm:$0x11]   ;;  %v795_v31 = vld [vmem:[#allocation2 + $0x6c] sm:$0xf] }
  0x6c   : > { %2524 = vrot.lane.b32.xlu0 %v2481_v38, %s6884_s6  ;;  %v539_v33 = vrot.slane %v535_v55, 4  ;;  %v546_v34 = vor.u32 %v544_v17, %v543_v16  ;;  %v1970_v35 = vrot.slane %v6102_v54, 1  ;;  %v1971_v36 = vrot.slane %v7352_v41, 1  ;;  %v7388_v38 = vld [vmem:[#allocation2 + $0x50] ss:$0 sps:$4 sm:$0x11]  }
  0x6d   : > { %1375 = vrot.lane.b32.xlu1 %v1244_v21, %s6880_s25  ;;  %v548_v39 = vrot.slane %v543_v16, 4  ;;  %v789_v45 = vsel %vm7068_vm8, %v538_v26, %v788_v18  ;;  %v7396_v21 = vrot.slane %v550_v63, 7  ;;  %v553_v19 = vshll.u32 %v7358_v11, 16  ;;  %v1032_v42 = vld [vmem:[#allocation2 + $0x48] sm:$0xe] }
  0x6e   : > { %v547_v43 = vsel %vm7061_vm7, %v539_v33, %v546_v34  ;;  %v2249_v37 = vshll.u32 %v7382_v62, 16  ;;  %v7406_v48 = vcombine.low %v863_v9, %v7385_v46  ;;  %790 = vst [vmem:[#allocation2 + $0x60] sm:$0xf] %v789_v45  ;;  %v1757_v52 = vsel %vm1172_vm4, %v1752_v47, %v1756_v14 }
  0x6f   : > { %v7390_v27 = vld [vmem:[#allocation2 + $0x58] sm:$0xf]  ;;  %791 = vst.msk [vmem:[#allocation2 + $0x64] sm:$0xf] %vm258_vm0, %v547_v43  ;;  %v1745_v11 = vsel %vm1172_vm4, %v1740_v22, %v1744_v53  ;;  %v558_v56 = vshrl.u32 %v7377_v13, 16  ;;  %v1975_v44 = vsel %vm1445_vm6, %v1973_v32, %v1974_v10  ;;  %v1972_v50 = vsel %vm1445_vm6, %v1970_v35, %v1971_v36 }
  0x70   : > { %1502 = vrot.lane.b32.xlu0 %v1460_v29, %s6879_s24  ;;  %v6119_v41 = vcombine.low %v990_v24, %v7390_v27  ;;  %v7411_v29 = vld [vmem:[#allocation2 + $0x5c] ss:$0 sps:$4 sm:$0x11]   ;;  %v2254_v58 = vshll.u32 %v7388_v38, 16  ;;  %v555_v40 = vor.u32 %v553_v19, %v7396_v21  ;;  %v2247_v2 = vshrl.u32 %v7382_v62, 16 }
  0x71   : > { %1504 = vrot.lane.b32.xlu1 %v1463_v51, %s6879_s24  ;;  %v865_v51 = vld [vmem:[#allocation2 + $0x54] sm:$0xf]  ;;  %v2251_v3 = vrot.slane %v2249_v37, 1  ;;  %v1248_v7 = vshll.u32 %v7406_v48, 16  ;;  %v2266_v32 = vshll.u32 %v7411_v29, 16  ;;  %v560_v10 = vrot.slane %v558_v56, 7 }
  0x72   : > { %v2261_v57 = vshll.u32 %v6119_v41, 16  ;;  %v2259_v30 = vshrl.u32 %v6119_v41, 16  ;;  %v561_v14 = vshll.u32 %v7377_v13, 16  ;;  %v6150_v55 = vcombine.low %v1032_v42, %v7373_v4  ;;  %v1033_v4 = vld [vmem:[#allocation2 + $0x54] sm:$0xe] }
  0x73   : > { %v2256_v16 = vrot.slane %v2254_v58, 1  ;;  %v1253_v17 = vshll.u32 %v7421_v61, 16  ;;  %v796_v18 = vsel %vm7068_vm8, %v555_v40, %v795_v31  ;;  %v2252_v47 = vor.u32 %v2251_v3, %v2247_v2  ;;  %v905_v19 = vld [vmem:[#allocation2 + $0x48] sm:$0xe]  ;;  %v244_v37 = vld [vmem:[%s7049_s23 + $0x90] sm:$0xff]  ;;  %v245_v58 = vld [vmem:[%s7049_s23 + $0x98] sm:$0xff] }
  0x74   : > { %1614 = vrot.lane.b32.xlu0 %v7338_v20, %s6881_s26  ;;  %v793_v20 = vsel %vm7086_vm9, %v548_v39, %v792_v1  ;;  %v2263_v54 = vrot.slane %v2261_v57, 1  ;;  %v1246_v53 = vshrl.u32 %v7406_v48, 16  ;;  %v1250_v9 = vrot.slane %v1248_v7, 1  ;;  %v7440_v1 = vld [vmem:[#allocation2 + $0x5c] ss:$0 sps:$4 sm:$0x11]  }
  0x75   : > { %1616 = vrot.lane.b32.xlu1 %v7335_v15, %s6881_s26  ;;  %v7413_v15 = vld [vmem:[#allocation2 + $0x58] sm:$0xf]  ;;  %794 = vst [vmem:[#allocation2 + $0x68] sm:$0x1] %v793_v20  ;;  %v556_v13 = vrot.slane %v7396_v21, 4  ;;  %v2268_v22 = vrot.slane %v2266_v32, 1  ;;  %v563_v26 = vor.u32 %v561_v14, %v560_v10  ;;  %v6151_v36 = vcombine.low %v1033_v4, %v7390_v27 }
  0x76   : > { %v7429_v6 = vcombine.low %v865_v51, %v7413_v15  ;;  %797 = vst [vmem:[#allocation2 + $0x6c] sm:$0xf] %v796_v18  ;;  %v2264_v63 = vor.u32 %v2263_v54, %v2259_v30  ;;  %v1255_v33 = vrot.slane %v1253_v17, 1  ;;  %v2482_v34 = vrot.slane %v6150_v55, 1  ;;  %v906_v21 = vld [vmem:[#allocation2 + $0x54] sm:$0xe] }
  0x77   : > { %v2483_v35 = vrot.slane %v7388_v38, 1  ;;  %v2257_v39 = vsel %vm1172_vm4, %v2252_v47, %v2256_v16  ;;  %v1251_v43 = vor.u32 %v1250_v9, %v1246_v53  ;;  %v1265_v38 = vshll.u32 %v7440_v1, 16  ;;  %v927_v27 = vld [vmem:[#allocation2 + $0x54] sm:$0xf]  ;;  %v930_v20 = vld [vmem:[#allocation2 + $0x64] sm:$0xf] }
  0x78   : > { %1886 = vrot.lane.b32.xlu0 %v1745_v11, %s6885_s9  ;;  %v1260_v24 = vshll.u32 %v7429_v6, 16  ;;  %v1258_v45 = vshrl.u32 %v7429_v6, 16  ;;  %v2269_v51 = vsel %vm1172_vm4, %v2264_v63, %v2268_v22  ;;  %v7454_v11 = vld [vmem:[#allocation2 + $0x58] sm:$0xf]  ;;  %v6057_v57 = vcombine.low %v906_v21, %v7413_v15  ;;  %v970_v17 = vld [vmem:[#allocation2 + $0x60] sm:$0xe] }
  0x79   : > { %1888 = vrot.lane.b32.xlu1 %v1757_v52, %s6885_s9  ;;  %v2484_v56 = vsel %vm1445_vm6, %v2482_v34, %v2483_v35  ;;  %v6402_v40 = vpack.c.bf16 %v244_v37, %v244_v37  ;;  %v1256_v31 = vsel %vm1172_vm4, %v1251_v43, %v1255_v33  ;;  %v2485_v42 = vrot.slane %v6151_v36, 1  ;;  %v969_v18 = vld [vmem:[#allocation2 + $0x54] sm:$0xe]  ;;  %v7479_v47 = vld [vmem:[#allocation2 + $0x5c] ss:$0 sps:$4 sm:$0x11]  }
  0x7a   : > { %v1262_v52 = vrot.slane %v1260_v24, 1  ;;  %v7467_v2 = vcombine.low %v927_v27, %v7454_v11  ;;  %v565_v3 = vrot.slane %v560_v10, 4  ;;  %v1267_v30 = vrot.slane %v1265_v38, 1  ;;  %v7486_v34 = vld [vmem:[#allocation2 + $0x64] sm:$0xf] }
  0x7b   : > { %v2486_v15 = vrot.slane %v7411_v29, 1  ;;  %v6403_v14 = vpack.c.bf16 %v245_v58, %v245_v58  ;;  %v1467_v55 = vrot.slane %v6057_v57, 1  ;;  %v1468_v10 = vrot.slane %v7440_v1, 1  ;;  %v992_v1 = vld [vmem:[#allocation2 + $0x60] sm:$0xf] }
  0x7c   : > { %2014 = vrot.lane.b32.xlu0 %v1972_v50, %s6883_s28  ;;  %v799_v50 = vld [vmem:[#allocation2 + $0x74] sm:$0x1]  ;;  %v1263_v7 = vor.u32 %v1262_v52, %v1258_v45  ;;  %v1761_v29 = vshll.u32 %v7467_v2, 16  ;;  %v6655_v4 = vld [vmem:[#allocation2 + $0x68] ss:$0 sps:$4 sm:$0x11]   ;;  %v6105_v22 = vcombine.low %v970_v17, %v930_v20  ;;  %v6104_v33 = vcombine.low %v969_v18, %v7454_v11 }
  0x7d   : > { %2016 = vrot.lane.b32.xlu1 %v1975_v44, %s6883_s28  ;;  %v6056_v44 = vcombine.low %v905_v19, %v7385_v46  ;;  %v1465_v46 = vrot.slane %v7421_v61, 1  ;;  %v800_v32 = vsel %vm7086_vm9, %v565_v3, %v799_v50  ;;  %v567_v61 = vshrl.u32 %v6402_v40, 16  ;;  %v802_v21 = vld [vmem:[#allocation2 + $0x78] sm:$0xf]  ;;  %v994_v52 = vld [vmem:[#allocation2 + $0x6c] sm:$0xf] }
  0x7e   : > { %801 = vst [vmem:[#allocation2 + $0x74] sm:$0x1] %v800_v32  ;;  %v1268_v53 = vsel %vm1172_vm4, %v1263_v7, %v1267_v30  ;;  %v2487_v9 = vsel %vm1445_vm6, %v2485_v42, %v2486_v15  ;;  %v570_v63 = vshll.u32 %v6402_v40, 16  ;;  %v575_v24 = vshrl.u32 %v6403_v14, 16  ;;  %v247_v32 = vld [vmem:[%s7049_s23 + $0xa8] sm:$0xff] }
  0x7f   : > { %v1464_v16 = vrot.slane %v6056_v44, 1  ;;  %v569_v35 = vrot.slane %v567_v61, 7  ;;  %v1763_v43 = vrot.slane %v1761_v29, 1  ;;  %v1766_v45 = vshll.u32 %v7479_v47, 16  ;;  %v867_v44 = vld [vmem:[#allocation2 + $0x60] sm:$0xf] }
  0x80   : > { %2126 = vrot.lane.b32.xlu0 %v7382_v62, %s6882_s27  ;;  %v564_v62 = vsel %vm7061_vm7, %v556_v13, %v563_v26  ;;  %v1469_v19 = vsel %vm1445_vm6, %v1467_v55, %v1468_v10  ;;  %v1979_v11 = vrot.slane %v6105_v22, 1  ;;  %v1976_v57 = vrot.slane %v6104_v33, 1  ;;  %v806_v18 = vld [vmem:[#allocation2 + $0x80] sm:$0x1]  ;;  %v1034_v10 = vld [vmem:[#allocation2 + $0x60] sm:$0xe] }
  0x81   : > { %2128 = vrot.lane.b32.xlu1 %v6119_v41, %s6882_s27  ;;  %v929_v41 = vld [vmem:[#allocation2 + $0x60] sm:$0xf]  ;;  %798 = vst.msk [vmem:[#allocation2 + $0x70] sm:$0xf] %vm258_vm0, %v564_v62  ;;  %v1466_v26 = vsel %vm1445_vm6, %v1464_v16, %v1465_v46  ;;  %v572_v27 = vor.u32 %v570_v63, %v569_v35  ;;  %v7497_v62 = vcombine.low %v992_v1, %v7486_v34  ;;  %v573_v42 = vrot.slane %v569_v35, 4 }
  0x82   : > { %v7470_v54 = vcombine.low %v929_v41, %v930_v20  ;;  %v577_v41 = vrot.slane %v575_v24, 7  ;;  %v246_v20 = vld [vmem:[%s7049_s23 + $0xa0] sm:$0xff]  ;;  %v578_v3 = vshll.u32 %v6403_v14, 16  ;;  %v1768_v15 = vrot.slane %v1766_v45, 1 }
  0x83   : > { %v803_v50 = vsel %vm7068_vm8, %v572_v27, %v802_v21  ;;  %v1977_v46 = vrot.slane %v7479_v47, 1  ;;  %v2273_v55 = vshll.u32 %v7497_v62, 16  ;;  %v7512_v16 = vld [vmem:[#allocation2 + $0x68] ss:$0 sps:$4 sm:$0x11]   ;;  %v6405_v22 = vpack.c.bf16 %v247_v32, %v247_v32 }
  0x84   : > { %2398 = vrot.lane.b32.xlu0 %v2257_v39, %s6886_s10  ;;  %v1773_v13 = vshll.u32 %v7470_v54, 16  ;;  %v1771_v36 = vshrl.u32 %v7470_v54, 16  ;;  %v1759_v39 = vshrl.u32 %v7467_v2, 16  ;;  %804 = vst [vmem:[#allocation2 + $0x78] sm:$0xf] %v803_v50  ;;  %v580_v17 = vor.u32 %v578_v3, %v577_v41 }
  0x85   : > { %2400 = vrot.lane.b32.xlu1 %v2269_v51, %s6886_s10  ;;  %v1778_v51 = vshll.u32 %v6655_v4, 16  ;;  %v7517_v61 = vld [vmem:[#allocation2 + $0x68] ss:$0 sps:$4 sm:$0x11]   ;;  %v582_v14 = vrot.slane %v577_v41, 4  ;;  %v6152_v35 = vcombine.low %v1034_v10, %v7486_v34  ;;  %v2489_v3 = vrot.slane %v7512_v16, 1 }
  0x86   : > { %v1775_v37 = vrot.slane %v1773_v13, 1  ;;  %v1764_v58 = vor.u32 %v1763_v43, %v1759_v39  ;;  %v869_v13 = vld [vmem:[#allocation2 + $0x6c] sm:$0xf]  ;;  %v6677_v63 = vld [vmem:[%s9667_s1 + $0x10] ss:$0 sps:$4 sm:$0x33]  }
  0x87   : > { %v1780_v30 = vrot.slane %v1778_v51, 1  ;;  %v807_v1 = vsel %vm7086_vm9, %v582_v14, %v806_v18  ;;  %v2275_v39 = vrot.slane %v2273_v55, 1  ;;  %v2278_v43 = vshll.u32 %v7512_v16, 16  ;;  %6568 = vmatprep.subr.msk.bf16.mxu0 %vm2874_vm10, %v6677_v63  ;;  %v7561_v50 = vld [vmem:[#allocation2 + $0x6c] sm:$0xe] }
  0x88   : > { %2526 = vrot.lane.b32.xlu0 %v2484_v56, %s6884_s6  ;;  %v7494_v38 = vld [vmem:[#allocation2 + $0x70] sm:$0xf]  ;;  %v1980_v56 = vrot.slane %v6655_v4, 1  ;;  %v1776_v7 = vor.u32 %v1775_v37, %v1771_v36  ;;  %v581_v4 = vsel %vm7061_vm7, %v573_v42, %v580_v17  ;;  %v2271_v36 = vshrl.u32 %v7497_v62, 16  ;;  %808 = vst [vmem:[#allocation2 + $0x80] sm:$0x1] %v807_v1 }
  0x89   : > { %1377 = vrot.lane.b32.xlu1 %v1256_v31, %s6880_s25  ;;  %v7505_v40 = vcombine.low %v994_v52, %v7494_v38  ;;  %v7507_v31 = vld [vmem:[#allocation2 + $0x64] sm:$0xf]  ;;  %v7537_v33 = vld [vmem:[#allocation2 + $0x70] sm:$0xf]  ;;  %805 = vst.msk [vmem:[#allocation2 + $0x7c] sm:$0xf] %vm258_vm0, %v581_v4 }
  0x8a   : > { %v7515_v29 = vcombine.low %v867_v44, %v7507_v31  ;;  %v1981_v47 = vsel %vm1445_vm6, %v1979_v11, %v1980_v56  ;;  %v1781_v24 = vsel %vm1172_vm4, %v1776_v7, %v1780_v30  ;;  %v7552_v51 = vcombine.low %v869_v13, %v7537_v33  ;;  %v248_v56 = vld [vmem:[%s7049_s23 + $0xb0] sm:$0xff]  ;;  %v907_v7 = vld [vmem:[#allocation2 + $0x60] sm:$0xe]  ;;  %v931_v32 = vld [vmem:[#allocation2 + $0x6c] sm:$0xf] }
  0x8b   : > { %v2283_v34 = vshrl.u32 %v7505_v40, 16  ;;  %v2876_v52 = vsel %vm2874_vm10, %v6677_v63, 0  ;;  %v2488_v42 = vrot.slane %v6152_v35, 1  ;;  %v595_v30 = vshll.u32 %v6405_v22, 16  ;;  %v809_v18 = vld [vmem:[#allocation2 + $0x84] sm:$0xf] }
  0x8c   : > { %2528 = vrot.lane.b32.xlu0 %v2487_v9, %s6884_s6  ;;  %v2285_v9 = vshll.u32 %v7505_v40, 16  ;;  %v1270_v45 = vshrl.u32 %v7515_v29, 16  ;;  %v1272_v21 = vshll.u32 %v7515_v29, 16  ;;  %6493 = vmatpush3.bf16.msra.mxu0 %v2876_v52  ;;  %v7568_v14 = vld [vmem:[#allocation2 + $0x74] ss:$0 sps:$4 sm:$0x11]  }
  0x8d   : > { %1379 = vrot.lane.b32.xlu1 %v1268_v53, %s6880_s25  ;;  %v7519_v53 = vpack.c.bf16 %v246_v20, %v246_v20  ;;  %v592_v20 = vshrl.u32 %v6405_v22, 16  ;;  %v7571_v16 = vld [vmem:[#allocation2 + $0x70] sm:$0xf]  ;;  %v908_v22 = vld [vmem:[#allocation2 + $0x6c] sm:$0xe]  ;;  %vm2616_vm13 = vcmask 97280  }
  0x8e   : > { %v2287_v37 = vrot.slane %v2285_v9, 1  ;;  %v7573_v9 = vpack.c.bf16 %v248_v56, %v248_v56  ;;  %v7582_v52 = vcombine.low %v931_v32, %v7571_v16  ;;  %v1471_v56 = vrot.slane %v7517_v61, 1 }
  0x8f   : > { %v584_v11 = vshrl.u32 %v7519_v53, 16  ;;  %v587_v41 = vshll.u32 %v7519_v53, 16  ;;  %v594_v17 = vrot.slane %v592_v20, 7  ;;  %v1284_v53 = vshll.u32 %v7552_v51, 16 }
  0x90   : > { %1506 = vrot.lane.b32.xlu0 %v1466_v26, %s6879_s24  ;;  %v1978_v26 = vsel %vm1445_vm6, %v1976_v57, %v1977_v46  ;;  %v249_v57 = vld [vmem:[%s7049_s23 + $0xb8] sm:$0xff]  ;;  %v1274_v46 = vrot.slane %v1272_v21, 1  ;;  %v2288_v4 = vor.u32 %v2287_v37, %v2283_v34  ;;  %v6059_v34 = vcombine.low %v908_v22, %v7537_v33 }
  0x91   : > { %1508 = vrot.lane.b32.xlu1 %v1469_v19, %s6879_s24  ;;  %v1277_v19 = vshll.u32 %v7517_v61, 16  ;;  %v586_v55 = vrot.slane %v584_v11, 7  ;;  %v7575_v13 = vpack.c.bf16 %v249_v57, %v249_v57  ;;  %v597_v1 = vor.u32 %v595_v30, %v594_v17  ;;  %v971_v11 = vld [vmem:[#allocation2 + $0x6c] sm:$0xe]  ;;  %v933_v57 = vld [vmem:[#allocation2 + $0x78] sm:$0xf] }
  0x92   : > { %v599_v35 = vrot.slane %v594_v17, 4  ;;  %v1275_v21 = vor.u32 %v1274_v46, %v1270_v45  ;;  %v2490_v20 = vsel %vm1445_vm6, %v2488_v42, %v2489_v3  ;;  %v7611_v46 = vld [vmem:[#allocation2 + $0x74] ss:$0 sps:$4 sm:$0x11]   ;;  %v1473_v3 = vrot.slane %v6059_v34, 1 }
  0x93   : > { %v609_v32 = vshrl.u32 %v7575_v13, 16  ;;  %vm2649_vm14 = vcmask 130048   ;;  %vm2682_vm15 = vcmask 162816   ;;  %vm2715_vm1 = vcmask 195584  }
  0x94   : > { %1618 = vrot.lane.b32.xlu0 %v7467_v2, %s6881_s26  ;;  %v7535_v2 = vld [vmem:[#allocation2 + $0x74] ss:$0 sps:$4 sm:$0x11]   ;;  %vm2748_vm3 = vcmask 228352   ;;  %vm2781_vm10 = vcmask 261120   ;;  %vm2841_vm2 = vcmask 293888  }
  0x95   : > { %1620 = vrot.lane.b32.xlu1 %v7470_v54, %s6881_s26  ;;  %v1769_v54 = vsel %vm1172_vm4, %v1764_v58, %v1768_v15  ;;  %v2290_v27 = vshll.u32 %v7535_v2, 16  ;;  %v2276_v58 = vor.u32 %v2275_v39, %v2271_v36  ;;  %v2280_v15 = vrot.slane %v2278_v43, 1  ;;  %v813_v36 = vld [vmem:[#allocation2 + $0x8c] sm:$0x1] }
  0x96   : > { %v6153_v39 = vcombine.low %v7561_v50, %v7494_v38  ;;  %v7606_v50 = vld [vmem:[#allocation2 + $0x7c] sm:$0xf]  ;;  %v2492_v42 = vrot.slane %v7535_v2, 1 }
  0x97   : > { %v7559_v44 = vpop.permute.xlu1 %1494  ;;  %v2292_v63 = vrot.slane %v2290_v27, 1  ;;  %v2281_v43 = vsel %vm1172_vm4, %v2276_v58, %v2280_v15  ;;  %v1286_v27 = vrot.slane %v1284_v53, 1  ;;  %v601_v58 = vshrl.u32 %v7573_v9, 16 }
  0x98   : > { %1890 = vrot.lane.b32.xlu0 %v1769_v54, %s6885_s9  ;;  %v590_v54 = vrot.slane %v586_v55, 4  ;;  %v1785_v15 = vshll.u32 %v7582_v52, 16  ;;  %v2491_v61 = vrot.slane %v6153_v39, 1  ;;  %v1474_v53 = vrot.slane %v7568_v14, 1  ;;  %v816_v39 = vld [vmem:[#allocation2 + $0x90] sm:$0xf] }
  0x99   : > { %1892 = vrot.lane.b32.xlu1 %v1781_v24, %s6885_s9  ;;  %v7566_v10 = vpop.permute.xlu0 %1365  ;;  %v589_v24 = vor.u32 %v587_v41, %v586_v55  ;;  %v2293_v37 = vsel %vm1172_vm4, %v2288_v4, %v2292_v63  ;;  %v250_v41 = vld [vmem:[%s7049_s23 + $0xc0] sm:$0xff]  ;;  %v604_v55 = vshll.u32 %v7573_v9, 16  ;;  %v7620_v4 = vcombine.low %v933_v57, %v7606_v50 }
  0x9a   : > { %v598_v38 = vsel %vm7061_vm7, %v590_v54, %v597_v1  ;;  %v996_v54 = vld [vmem:[#allocation2 + $0x78] sm:$0xf]  ;;  %v603_v2 = vrot.slane %v601_v58, 7  ;;  %v7630_v9 = vpack.c.bf16 %v250_v41, %v250_v41  ;;  %v1783_v1 = vshrl.u32 %v7582_v52, 16 }
  0x9b   : > { %v810_v45 = vsel %vm7068_vm8, %v589_v24, %v809_v18  ;;  %812 = vst.msk [vmem:[#allocation2 + $0x88] sm:$0xf] %vm258_vm0, %v598_v38  ;;  %v6106_v24 = vcombine.low %v971_v11, %v7571_v16  ;;  %v2493_v16 = vsel %vm1445_vm6, %v2491_v61, %v2492_v42  ;;  %v1797_v34 = vshll.u32 %v7620_v4, 16 }
  0x9c   : > { %2018 = vrot.lane.b32.xlu0 %v1978_v26, %s6883_s28  ;;  %v6058_v26 = vcombine.low %v907_v7, %v7507_v31  ;;  %811 = vst [vmem:[#allocation2 + $0x84] sm:$0xf] %v810_v45  ;;  %v607_v45 = vrot.slane %v603_v2, 4  ;;  %v1983_v61 = vrot.slane %v7611_v46, 1 }
  0x9d   : > { %2020 = vrot.lane.b32.xlu1 %v1981_v47, %s6883_s28  ;;  %v1279_v47 = vrot.slane %v1277_v19, 1  ;;  %v1282_v19 = vshrl.u32 %v7552_v51, 16 }
  0x9e   : > { %v1470_v30 = vrot.slane %v6058_v26, 1  ;;  %v612_v26 = vshll.u32 %v7575_v13, 16  ;;  %v606_v13 = vor.u32 %v604_v55, %v603_v2  ;;  %v1036_v55 = vld [vmem:[#allocation2 + $0x78] sm:$0xe] }
  0x9f   : > { %v1280_v7 = vsel %vm1172_vm4, %v1275_v21, %v1279_v47  ;;  %v1287_v17 = vor.u32 %v1286_v27, %v1282_v19  ;;  %v7627_v47 = vld [vmem:[#allocation2 + $0x7c] sm:$0xf]  ;;  %v972_v19 = vld [vmem:[#allocation2 + $0x78] sm:$0xe] }
  0xa0   : > { %2130 = vrot.lane.b32.xlu0 %v7497_v62, %s6882_s27  ;;  %v7588_v31 = vpop.permute.xlu1 %1608  ;;  %v814_v62 = vsel %vm7086_vm9, %v599_v35, %v813_v36  ;;  %v1790_v35 = vshll.u32 %v7611_v46, 16  ;;  %v7634_v36 = vrot.slane %v609_v32, 7  ;;  %v7644_v38 = vcombine.low %v996_v54, %v7627_v47  ;;  %v252_v32 = vld [vmem:[%s7049_s23 + $0xd0] sm:$0xff] }
  0xa1   : > { %2132 = vrot.lane.b32.xlu1 %v7505_v40, %s6882_s27  ;;  %v1289_v40 = vshll.u32 %v7568_v14, 16  ;;  %815 = vst [vmem:[#allocation2 + $0x8c] sm:$0x1] %v814_v62  ;;  %v1787_v14 = vrot.slane %v1785_v15, 1  ;;  %v1472_v11 = vsel %vm1445_vm6, %v1470_v30, %v1471_v56  ;;  %v817_v41 = vsel %vm7068_vm8, %v606_v13, %v816_v39  ;;  %v251_v15 = vld [vmem:[%s7049_s23 + $0xc8] sm:$0xff] }
  0xa2   : > { %v7602_v33 = vpop.permute.xlu0 %1606  ;;  %v614_v62 = vor.u32 %v612_v26, %v7634_v36  ;;  %v1792_v58 = vrot.slane %v1790_v35, 1  ;;  %818 = vst [vmem:[#allocation2 + $0x90] sm:$0xf] %v817_v41  ;;  %v6107_v56 = vcombine.low %v972_v19, %v7606_v50  ;;  %v1795_v30 = vshrl.u32 %v7620_v4, 16  ;;  %v7676_v54 = vld [vmem:[#allocation2 + $0x88] sm:$0xf] }
  0xa3   : > { %v1291_v18 = vrot.slane %v1289_v40, 1  ;;  %v1475_v40 = vsel %vm1445_vm6, %v1473_v3, %v1474_v53  ;;  %v1788_v57 = vor.u32 %v1787_v14, %v1783_v1  ;;  %v618_v53 = vshrl.u32 %v7630_v9, 16  ;;  %v998_v46 = vld [vmem:[#allocation2 + $0x84] sm:$0xf]  ;;  %v871_v39 = vld [vmem:[#allocation2 + $0x78] sm:$0xf] }
  0xa4   : > { %2402 = vrot.lane.b32.xlu0 %v2281_v43, %s6886_s10  ;;  %v7639_v43 = vld [vmem:[#allocation2 + $0x80] ss:$0 sps:$4 sm:$0x11]   ;;  %v615_v42 = vsel %vm7061_vm7, %v607_v45, %v614_v62  ;;  %v7678_v2 = vpack.c.bf16 %v251_v15, %v251_v15  ;;  %v7680_v26 = vpack.c.bf16 %v252_v32, %v252_v32  ;;  %v1985_v13 = vrot.slane %v6107_v56, 1 }
  0xa5   : > { %2404 = vrot.lane.b32.xlu1 %v2293_v37, %s6886_s10  ;;  %v1292_v21 = vsel %vm1172_vm4, %v1287_v17, %v1291_v18  ;;  %v1802_v3 = vshll.u32 %v7639_v43, 16  ;;  %v2297_v17 = vshll.u32 %v7644_v38, 16  ;;  %819 = vst.msk [vmem:[#allocation2 + $0x94] sm:$0xf] %vm258_vm0, %v615_v42  ;;  %v820_v18 = vld [vmem:[#allocation2 + $0x98] sm:$0x1]  ;;  %v1793_v14 = vsel %vm1172_vm4, %v1788_v57, %v1792_v58 }
  0xa6   : > { %v7624_v22 = vpop.permute.xlu0 %2118  ;;  %v7685_v35 = vld [vmem:[#allocation2 + $0x80] ss:$0 sps:$4 sm:$0x11]   ;;  %v7699_v41 = vcombine.low %v998_v46, %v7676_v54  ;;  %v2295_v57 = vshrl.u32 %v7644_v38, 16  ;;  %v626_v42 = vshrl.u32 %v7678_v2, 16 }
  0xa7   : > { %v7622_v63 = vpop.permute.xlu1 %2120  ;;  %v1804_v62 = vrot.slane %v1802_v3, 1  ;;  %v2299_v58 = vrot.slane %v2297_v17, 1  ;;  %v2302_v15 = vshll.u32 %v7685_v35, 16 }
  0xa8   : > { %2530 = vrot.lane.b32.xlu0 %v2490_v20, %s6884_s6  ;;  %v2552_v20 = vsel %vm2550_vm11, %v7054_v12, %v7566_v10  ;;  %v253_v12 = vld [vmem:[%s7049_s23 + $0xd8] sm:$0xff]  ;;  %v1799_v10 = vrot.slane %v1797_v34, 1  ;;  %v616_v34 = vrot.slane %v7634_v36, 4  ;;  %v620_v36 = vrot.slane %v618_v53, 7  ;;  %v7730_v53 = vld [vmem:[#allocation2 + $0x88] sm:$0xf] }
  0xa9   : > { %1381 = vrot.lane.b32.xlu1 %v1280_v7, %s6880_s25  ;;  %v1982_v7 = vrot.slane %v6106_v24, 1  ;;  %v2585_v1 = vsel %vm2583_vm12, %v2552_v20, %v7559_v44  ;;  %v7695_v44 = vld [vmem:[#allocation2 + $0x7c] sm:$0xf] }
  0xaa   : > { %v7646_v37 = vpop.permute.xlu0 %2006  ;;  %v1800_v45 = vor.u32 %v1799_v10, %v1795_v30  ;;  %v7711_v32 = vcombine.low %v871_v39, %v7695_v44  ;;  %v2618_v56 = vsel %vm2616_vm13, %v2585_v1, %v7602_v33  ;;  %v624_v1 = vrot.slane %v620_v36, 4 }
  0xab   : > { %v7648_v27 = vpop.permute.xlu1 %1496  ;;  %v7693_v19 = vsel %vm1445_vm6, %v1982_v7, %v1983_v61  ;;  %v821_v7 = vsel %vm7086_vm9, %v616_v34, %v820_v18  ;;  %v7721_v61 = vld [vmem:[#allocation2 + $0x8c] ss:$0 sps:$4 sm:$0x11]   ;;  %v873_v18 = vld [vmem:[#allocation2 + $0x84] sm:$0xf] }
  0xac   : > { %2532 = vrot.lane.b32.xlu0 %v2493_v16, %s6884_s6  ;;  %v7687_v16 = vpack.c.bf16 %v253_v12, %v253_v12  ;;  %822 = vst [vmem:[#allocation2 + $0x98] sm:$0x1] %v821_v7  ;;  %v629_v12 = vshll.u32 %v7678_v2, 16  ;;  %v1805_v10 = vsel %vm1172_vm4, %v1800_v45, %v1804_v62  ;;  %v628_v2 = vrot.slane %v626_v42, 7 }
  0xad   : > { %1383 = vrot.lane.b32.xlu1 %v1292_v21, %s6880_s25  ;;  %v1986_v21 = vrot.slane %v7639_v43, 1  ;;  %v1296_v34 = vshll.u32 %v7711_v32, 16  ;;  %v2314_v62 = vshll.u32 %v7721_v61, 16 }
  0xae   : > { %v7672_v50 = vpop.permute.xlu0 %2518 }
  0xaf   : > { %v7674_v24 = vpop.permute.xlu1 %2008  ;;  %v1987_v30 = vsel %vm1445_vm6, %v1985_v13, %v1986_v21  ;;  %v2307_v13 = vshrl.u32 %v7699_v41, 16  ;;  %v2304_v21 = vrot.slane %v2302_v15, 1  ;;  %v7748_v15 = vcombine.low %v873_v18, %v7730_v53  ;;  %v7760_v18 = vld [vmem:[#allocation2 + $0x84] sm:$0xe] }
  0xb0   : > { %1510 = vrot.lane.b32.xlu0 %v1472_v11, %s6879_s24  ;;  %v7702_v11 = vld [vmem:[#allocation2 + $0x80] ss:$0 sps:$4 sm:$0x11]  }
  0xb1   : > { %1512 = vrot.lane.b32.xlu1 %v1475_v40, %s6879_s24  ;;  %v6154_v40 = vcombine.low %v1036_v55, %v7627_v47  ;;  %v621_v47 = vshll.u32 %v7630_v9, 16  ;;  %v2309_v9 = vshll.u32 %v7699_v41, 16  ;;  %v1301_v33 = vshll.u32 %v7702_v11, 16 }
  0xb2   : > { %v7704_v20 = vpop.permute.xlu0 %2520 }
  0xb3   : > { %v1881_v43 = vpop.permute.xlu1 %1880  ;;  %v7728_v3 = vrot.slane %v6154_v40, 1  ;;  %v623_v46 = vor.u32 %v621_v47, %v620_v36  ;;  %v935_v40 = vld [vmem:[#allocation2 + $0x84] sm:$0xf]  ;;  %v2311_v36 = vrot.slane %v2309_v9, 1 }
  0xb4   : > { %1622 = vrot.lane.b32.xlu0 %v7582_v52, %s6881_s26  ;;  %v2300_v52 = vor.u32 %v2299_v58, %v2295_v57  ;;  %v7741_v57 = vld [vmem:[#allocation2 + $0x88] sm:$0xf]  ;;  %v631_v58 = vor.u32 %v629_v12, %v628_v2  ;;  %v827_v47 = vld [vmem:[#allocation2 + $0xa4] sm:$0x1]  ;;  %v1294_v12 = vshrl.u32 %v7711_v32, 16 }
  0xb5   : > { %1624 = vrot.lane.b32.xlu1 %v7620_v4, %s6881_s26  ;;  %v823_v4 = vld [vmem:[#allocation2 + $0x9c] sm:$0xf] }
  0xb6   : > { %v1368_v17 = vpop.permute.xlu0 %1367 }
  0xb7   : > { %v2393_v55 = vpop.permute.xlu1 %2392  ;;  %v2554_v39 = vsel %vm2550_vm11, %v7127_v49, %v1368_v17  ;;  %v824_v49 = vsel %vm7068_vm8, %v623_v46, %v823_v4  ;;  %v909_v4 = vld [vmem:[#allocation2 + $0x78] sm:$0xe] }
  0xb8   : > { %v2587_v45 = vsel %vm2583_vm12, %v2554_v39, %v7648_v27  ;;  %1894 = vrot.lane.b32.xlu0 %v1793_v14, %s6885_s9  ;;  %825 = vst [vmem:[#allocation2 + $0x9c] sm:$0xf] %v824_v49  ;;  %v633_v27 = vrot.slane %v628_v2, 4  ;;  %v254_v14 = vld [vmem:[%s7049_s23 + $0xe0] sm:$0xff]  ;;  %v7755_v39 = vrot.slane %v1301_v33, 1  ;;  %v1298_v2 = vrot.slane %v1296_v34, 1 }
  0xb9   : > { %1896 = vrot.lane.b32.xlu1 %v1805_v10, %s6885_s9  ;;  %v2620_v7 = vsel %vm2616_vm13, %v2587_v45, %v7588_v31  ;;  %v632_v31 = vsel %vm7061_vm7, %v624_v1, %v631_v58  ;;  %v2316_v1 = vrot.slane %v2314_v62, 1  ;;  %v7775_v45 = vld [vmem:[#allocation2 + $0x8c] ss:$0 sps:$4 sm:$0x11]   ;;  %v1308_v58 = vshll.u32 %v7748_v15, 16 }
  0xba   : > { %v2653_v42 = vsel %vm2649_vm14, %v2620_v7, %v1881_v43  ;;  %v1879_v17 = vpop.permute.xlu0 %1878  ;;  %v7765_v43 = vcombine.low %v935_v40, %v7741_v57  ;;  %826 = vst.msk [vmem:[#allocation2 + $0xa0] sm:$0xf] %vm258_vm0, %v632_v31  ;;  %v2312_v40 = vor.u32 %v2311_v36, %v2307_v13  ;;  %v7782_v49 = vld [vmem:[#allocation2 + $0x94] sm:$0xf]  ;;  %v2305_v7 = vsel %vm1172_vm4, %v2300_v52, %v2304_v21  ;;  %v1000_v52 = vld [vmem:[#allocation2 + $0x90] sm:$0xf] }
  0xbb   : > { %v7752_v10 = vpop.permute.xlu1 %1369  ;;  %v2651_v9 = vsel %vm2649_vm14, %v2618_v56, %v1879_v17  ;;  %v2686_v46 = vsel %vm2682_vm15, %v2653_v42, %v7674_v24  ;;  %v7777_v24 = vpack.c.bf16 %v254_v14, %v254_v14  ;;  %v2495_v14 = vrot.slane %v7685_v35, 1  ;;  %v910_v42 = vld [vmem:[#allocation2 + $0x84] sm:$0xe]  ;;  %v7796_v31 = vld [vmem:[#allocation2 + $0x8c] ss:$0 sps:$4 sm:$0x11]  }
  0xbc   : > { %v2684_v33 = vsel %vm2682_vm15, %v2651_v9, %v7646_v37  ;;  %2022 = vrot.lane.b32.xlu0 %v7693_v19, %s6883_s28  ;;  %v2719_v56 = vsel %vm2715_vm1, %v2686_v46, %v7622_v63  ;;  %v937_v37 = vld [vmem:[#allocation2 + $0x90] sm:$0xf]  ;;  %v828_v19 = vsel %vm7086_vm9, %v633_v27, %v827_v47  ;;  %v6155_v36 = vcombine.low %v7760_v18, %v7676_v54  ;;  %v973_v27 = vld [vmem:[#allocation2 + $0x84] sm:$0xe]  ;;  %v7809_v21 = vld [vmem:[#allocation2 + $0x94] sm:$0xf] }
  0xbd   : > { %2024 = vrot.lane.b32.xlu1 %v1987_v30, %s6883_s28  ;;  %v2717_v34 = vsel %vm2715_vm1, %v2684_v33, %v7624_v22  ;;  %v2752_v62 = vsel %vm2748_vm3, %v2719_v56, %v2393_v55  ;;  %v6060_v22 = vcombine.low %v909_v4, %v7695_v44  ;;  %829 = vst [vmem:[#allocation2 + $0xa4] sm:$0x1] %v828_v19  ;;  %v1809_v47 = vshll.u32 %v7765_v43, 16  ;;  %v255_v33 = vld [vmem:[%s7049_s23 + $0xe8] sm:$0xff]  ;;  %v974_v56 = vld [vmem:[#allocation2 + $0x90] sm:$0xe] }
  0xbe   : > { %v2391_v63 = vpop.permute.xlu0 %2390  ;;  %v1299_v17 = vor.u32 %v1298_v2, %v1294_v12  ;;  %v1306_v44 = vshrl.u32 %v7748_v15, 16  ;;  %v1313_v55 = vshll.u32 %v7775_v45, 16  ;;  %v7807_v54 = vcombine.low %v937_v37, %v7782_v49  ;;  %v6694_v19 = vld [vmem:[#allocation2 + $0x98] ss:$0 sps:$4 sm:$0x11]  }
  0xbf   : > { %v7786_v30 = vpop.permute.xlu1 %1371  ;;  %v2750_v13 = vsel %vm2748_vm3, %v2717_v34, %v2391_v63  ;;  %v6061_v12 = vcombine.low %v910_v42, %v7730_v53  ;;  %v2496_v18 = vsel %vm1445_vm6, %v7728_v3, %v2495_v14  ;;  %v1476_v46 = vrot.slane %v6060_v22, 1  ;;  %v257_v22 = vld [vmem:[%s7049_s23 + $0xf8] sm:$0xff] }
  0xc0   : > { %2134 = vrot.lane.b32.xlu0 %v7644_v38, %s6882_s27  ;;  %v2783_v35 = vsel %vm2781_vm10, %v2750_v13, %v7672_v50  ;;  %v2317_v38 = vsel %vm1172_vm4, %v2312_v40, %v2316_v1  ;;  %v1310_v50 = vrot.slane %v1308_v58, 1  ;;  %v1477_v2 = vrot.slane %v7702_v11, 1  ;;  %v256_v58 = vld [vmem:[%s7049_s23 + $0xf0] sm:$0xff] }
  0xc1   : > { %2136 = vrot.lane.b32.xlu1 %v7699_v41, %s6882_s27  ;;  %6494 = vmatprep.mubr.msk.bf16.mxu0 %vm2841_vm2, %v2783_v35  ;;  %v2785_v41 = vsel %vm2781_vm10, %v2752_v62, %v7704_v20  ;;  %v6108_v20 = vcombine.low %v973_v27, %v7741_v57  ;;  %v1807_v1 = vshrl.u32 %v7765_v43, 16  ;;  %v1811_v53 = vrot.slane %v1809_v47, 1 }
  0xc2   : > { %6495 = vmatmul.mubr.msk.bf16.vlgmr.msra.gmra.mrb[0].mxu0 %vm2841_vm2, %v2785_v41  ;;  %v7819_v9 = vpop.permute.xlu0 %1498  ;;  %v1814_v34 = vshll.u32 %v7796_v31, 16  ;;  %v7829_v40 = vcombine.low %v1000_v52, %v7809_v21  ;;  %v1304_v11 = vsel %vm1172_vm4, %v1299_v17, %v7755_v39  ;;  %v2497_v3 = vrot.slane %v6155_v36, 1  ;;  %v7846_v36 = vld [vmem:[#allocation2 + $0x90] sm:$0xe] }
  0xc3   : > { %v7816_v4 = vpop.permute.xlu1 %1500  ;;  %v2498_v57 = vrot.slane %v7721_v61, 1  ;;  %v1821_v37 = vshll.u32 %v7807_v54, 16  ;;  %v1311_v63 = vor.u32 %v1310_v50, %v1306_v44  ;;  %v1315_v62 = vrot.slane %v1313_v55, 1  ;;  %v875_v55 = vld [vmem:[#allocation2 + $0x90] sm:$0xf] }
  0xc4   : > { %2406 = vrot.lane.b32.xlu0 %v2305_v7, %s6886_s10  ;;  %v1479_v14 = vrot.slane %v6061_v12, 1  ;;  %v1480_v42 = vrot.slane %v7775_v45, 1  ;;  %v6109_v7 = vcombine.low %v974_v56, %v7782_v49  ;;  %v1988_v47 = vrot.slane %v6108_v20, 1  ;;  %v1002_v56 = vld [vmem:[#allocation2 + $0x9c] sm:$0xf] }
  0xc5   : > { %2408 = vrot.lane.b32.xlu1 %v2317_v38, %s6886_s10  ;;  %v1989_v39 = vrot.slane %v7796_v31, 1  ;;  %v7848_v61 = vpack.c.bf16 %v255_v33, %v255_v33  ;;  %v1812_v17 = vor.u32 %v1811_v53, %v1807_v1  ;;  %v1816_v35 = vrot.slane %v1814_v34, 1  ;;  %v7856_v31 = vld [vmem:[#allocation2 + $0x94] sm:$0xf]  ;;  %v7864_v1 = vld [vmem:[#allocation2 + $0xa0] sm:$0xf] }
  0xc6   : > { %v7842_v27 = vpop.permute.xlu0 %1610  ;;  %v2321_v44 = vshll.u32 %v7829_v40, 16  ;;  %v7851_v45 = vpack.c.bf16 %v256_v58, %v256_v58  ;;  %v1819_v49 = vshrl.u32 %v7807_v54, 16  ;;  %v1823_v52 = vrot.slane %v1821_v37, 1 }
  0xc7   : > { %v7840_v13 = vpop.permute.xlu1 %1612  ;;  %v1826_v41 = vshll.u32 %v6694_v19, 16  ;;  %v7858_v38 = vpack.c.bf16 %v257_v22, %v257_v22  ;;  %v1316_v50 = vsel %vm1172_vm4, %v1311_v63, %v1315_v62  ;;  %v2499_v12 = vsel %vm1445_vm6, %v2497_v3, %v2498_v57  ;;  %v7875_v3 = vld [vmem:[#allocation2 + $0x98] ss:$0 sps:$4 sm:$0x11]  }
  0xc8   : > { %2534 = vrot.lane.b32.xlu0 %v2496_v18, %s6884_s6  ;;  %v1481_v20 = vsel %vm1445_vm6, %v1479_v14, %v1480_v42  ;;  %v1478_v33 = vsel %vm1445_vm6, %v1476_v46, %v1477_v2  ;;  %v1991_v34 = vrot.slane %v6109_v7, 1  ;;  %v1992_v58 = vrot.slane %v6694_v19, 1 }
  0xc9   : > { %1385 = vrot.lane.b32.xlu1 %v1304_v11, %s6880_s25  ;;  %v7871_v11 = vsel %vm1445_vm6, %v1988_v47, %v1989_v39  ;;  %v6156_v37 = vcombine.low %v7846_v36, %v7809_v21  ;;  %v7878_v57 = vsel %vm1172_vm4, %v1812_v17, %v1816_v35  ;;  %v2319_v46 = vshrl.u32 %v7829_v40, 16 }
  0xca   : > { %v7868_v53 = vpop.permute.xlu0 %1882  ;;  %v2323_v2 = vrot.slane %v2321_v44, 1  ;;  %v7882_v63 = vcombine.low %v875_v55, %v7856_v31  ;;  %v1824_v19 = vor.u32 %v1823_v52, %v1819_v49  ;;  %v1828_v62 = vrot.slane %v1826_v41, 1 }
  0xcb   : > { %v7866_v18 = vpop.permute.xlu1 %1884  ;;  %v7887_v14 = vcombine.low %v1002_v56, %v7864_v1  ;;  %v635_v42 = vshrl.u32 %v7680_v26, 16  ;;  %v2556_v22 = vsel %vm2550_vm11, %v7141_v5, %v7752_v10  ;;  %v638_v7 = vshll.u32 %v7680_v26, 16  ;;  %v830_v5 = vld [vmem:[#allocation2 + $0xa8] sm:$0xf]  ;;  %v7913_v56 = vld [vmem:[#allocation2 + $0xa0] sm:$0xf] }
  0xcc   : > { %2536 = vrot.lane.b32.xlu0 %v2499_v12, %s6884_s6  ;;  %v643_v47 = vshrl.u32 %v7687_v16, 16  ;;  %v646_v39 = vshll.u32 %v7687_v16, 16  ;;  %v2558_v17 = vsel %vm2550_vm11, %v7175_v59, %v7786_v30  ;;  %v7902_v55 = vsel %vm1445_vm6, %v1991_v34, %v1992_v58  ;;  %v877_v12 = vld [vmem:[#allocation2 + $0x9c] sm:$0xf] }
  0xcd   : > { %1387 = vrot.lane.b32.xlu1 %v1316_v50, %s6880_s25  ;;  %v2326_v49 = vshll.u32 %v7875_v3, 16  ;;  %v637_v52 = vrot.slane %v635_v42, 7  ;;  %v7905_v10 = vor.u32 %v2323_v2, %v2319_v46  ;;  %v1318_v26 = vshrl.u32 %v7882_v63, 16  ;;  %v834_v50 = vld [vmem:[#allocation2 + $0xb0] sm:$0x1] }
  0xce   : > { %v2011_v44 = vpop.permute.xlu0 %2010  ;;  %v1320_v16 = vshll.u32 %v7882_v63, 16  ;;  %v645_v41 = vrot.slane %v643_v47, 7  ;;  %v1829_v59 = vsel %vm1172_vm4, %v1824_v19, %v1828_v62  ;;  %v2333_v30 = vshll.u32 %v7887_v14, 16 }
  0xcf   : > { %v7899_v35 = vpop.permute.xlu1 %2012  ;;  %v640_v34 = vor.u32 %v638_v7, %v637_v52  ;;  %v641_v58 = vrot.slane %v637_v52, 4  ;;  %v2591_v46 = vsel %vm2583_vm12, %v2558_v17, %v7816_v4  ;;  %v652_v47 = vshrl.u32 %v7777_v24, 16  ;;  %v7926_v52 = vld [vmem:[#allocation2 + $0xa4] ss:$0 sps:$4 sm:$0x11]  }
  0xd0   : > { %1514 = vrot.lane.b32.xlu0 %v1478_v33, %s6879_s24  ;;  %v648_v2 = vor.u32 %v646_v39, %v645_v41  ;;  %v650_v42 = vrot.slane %v645_v41, 4  ;;  %v655_v0 = vshll.u32 %v7777_v24, 16  ;;  %v660_v7 = vshrl.u32 %v7848_v61, 16 }
  0xd1   : > { %1516 = vrot.lane.b32.xlu1 %v1481_v20, %s6879_s24  ;;  %v2589_v20 = vsel %vm2583_vm12, %v2556_v22, %v7819_v9  ;;  %v831_v62 = vsel %vm7068_vm8, %v640_v34, %v830_v5  ;;  %v2331_v4 = vshrl.u32 %v7887_v14, 16  ;;  %v7930_v39 = vcombine.low %v877_v12, %v7913_v56  ;;  %v837_v12 = vld [vmem:[#allocation2 + $0xb4] sm:$0xf] }
  0xd2   : > { %v2123_v19 = vpop.permute.xlu0 %2122  ;;  %v649_v9 = vsel %vm7061_vm7, %v641_v58, %v648_v2  ;;  %832 = vst [vmem:[#allocation2 + $0xa8] sm:$0xf] %v831_v62  ;;  %v835_v22 = vsel %vm7086_vm9, %v650_v42, %v834_v50  ;;  %v2622_v17 = vsel %vm2616_vm13, %v2589_v20, %v7842_v27  ;;  %v2335_v24 = vrot.slane %v2333_v30, 1  ;;  %v841_v58 = vld [vmem:[#allocation2 + $0xbc] sm:$0x1] }
  0xd3   : > { %v7920_v33 = vpop.permute.xlu1 %2124  ;;  %833 = vst.msk [vmem:[#allocation2 + $0xac] sm:$0xf] %vm258_vm0, %v649_v9  ;;  %836 = vst [vmem:[#allocation2 + $0xb0] sm:$0x1] %v835_v22  ;;  %v654_v5 = vrot.slane %v652_v47, 7  ;;  %v662_v41 = vrot.slane %v660_v7, 7  ;;  %v2655_v47 = vsel %vm2649_vm14, %v2622_v17, %v7868_v53 }
  0xd4   : > { %1626 = vrot.lane.b32.xlu0 %v7765_v43, %s6881_s26  ;;  %v663_v34 = vshll.u32 %v7848_v61, 16  ;;  %v669_v50 = vshrl.u32 %v7851_v45, 16  ;;  %v672_v27 = vshll.u32 %v7851_v45, 16  ;;  %v677_v2 = vshrl.u32 %v7858_v38, 16  ;;  %v844_v17 = vld [vmem:[#allocation2 + $0xc0] sm:$0xf] }
  0xd5   : > { %1628 = vrot.lane.b32.xlu1 %v7807_v54, %s6881_s26  ;;  %v657_v20 = vor.u32 %v655_v0, %v654_v5  ;;  %v658_v43 = vrot.slane %v654_v5, 4  ;;  %v667_v30 = vrot.slane %v662_v41, 4  ;;  %v680_v62 = vshll.u32 %v7858_v38, 16  ;;  %v7951_v61 = vld [vmem:[#allocation2 + $0x98] ss:$0 sps:$4 sm:$0x11]  }
  0xd6   : > { %v2395_v42 = vpop.permute.xlu0 %2394  ;;  %v2338_v7 = vshll.u32 %v7926_v52, 16  ;;  %v665_v9 = vor.u32 %v663_v34, %v662_v41  ;;  %v671_v22 = vrot.slane %v669_v50, 7  ;;  %v2688_v45 = vsel %vm2682_vm15, %v2655_v47, %v2011_v44 }
  0xd7   : > { %v2397_v54 = vpop.permute.xlu1 %2396  ;;  %v838_v0 = vsel %vm7068_vm8, %v657_v20, %v837_v12  ;;  %v842_v38 = vsel %vm7086_vm9, %v667_v30, %v841_v58  ;;  %v679_v53 = vrot.slane %v677_v2, 7  ;;  %v2721_v5 = vsel %vm2715_vm1, %v2688_v45, %v2123_v19  ;;  %v7990_v30 = vld [vmem:[#allocation2 + $0xa4] ss:$0 sps:$4 sm:$0x11]  }
  0xd8   : > { %1898 = vrot.lane.b32.xlu0 %v7878_v57, %s6885_s9  ;;  %v666_v41 = vsel %vm7061_vm7, %v658_v43, %v665_v9  ;;  %839 = vst [vmem:[#allocation2 + $0xb4] sm:$0xf] %v838_v0  ;;  %843 = vst [vmem:[#allocation2 + $0xbc] sm:$0x1] %v842_v38  ;;  %v674_v44 = vor.u32 %v672_v27, %v671_v22  ;;  %v2624_v57 = vsel %vm2616_vm13, %v2591_v46, %v7840_v13  ;;  %v912_v38 = vld [vmem:[#allocation2 + $0x9c] sm:$0xe] }
  0xd9   : > { %1900 = vrot.lane.b32.xlu1 %v1829_v59, %s6885_s9  ;;  %v675_v59 = vrot.slane %v671_v22, 4  ;;  %v2754_v34 = vsel %vm2748_vm3, %v2721_v5, %v2395_v42  ;;  %v2328_v58 = vrot.slane %v2326_v49, 1  ;;  %840 = vst.msk [vmem:[#allocation2 + $0xb8] sm:$0xf] %vm258_vm0, %v666_v41  ;;  %v682_v19 = vor.u32 %v680_v62, %v679_v53  ;;  %v1039_v49 = vld [vmem:[#allocation2 + $0x9c] sm:$0xe] }
  0xda   : > { %v2523_v50 = vpop.permute.xlu0 %2522  ;;  %v2657_v2 = vsel %vm2649_vm14, %v2624_v57, %v7866_v18  ;;  %v1325_v20 = vshll.u32 %v7951_v61, 16  ;;  %v845_v13 = vsel %vm7068_vm8, %v674_v44, %v844_v17  ;;  %v2336_v42 = vor.u32 %v2335_v24, %v2331_v4  ;;  %v848_v62 = vld [vmem:[#allocation2 + $0xc8] sm:$0x1]  ;;  %v911_v22 = vld [vmem:[#allocation2 + $0x90] sm:$0xe] }
  0xdb   : > { %v7967_v12 = vpop.permute.xlu1 %1373  ;;  %v2787_v27 = vsel %vm2781_vm10, %v2754_v34, %v2523_v50  ;;  %v2690_v46 = vsel %vm2682_vm15, %v2657_v2, %v7899_v35  ;;  %v1322_v18 = vrot.slane %v1320_v16, 1  ;;  %v1332_v43 = vshll.u32 %v7930_v39, 16  ;;  %846 = vst [vmem:[#allocation2 + $0xc0] sm:$0xf] %v845_v13  ;;  %v8024_v17 = vld [vmem:[#allocation2 + $0xac] sm:$0xf] }
  0xdc   : > { %2026 = vrot.lane.b32.xlu0 %v7871_v11, %s6883_s28  ;;  %v2723_v28 = vsel %vm2715_vm1, %v2690_v46, %v7920_v33  ;;  %6498 = vmatprep.mubr.msk.bf16.mxu0 %vm2841_vm2, %v2787_v27  ;;  %v2340_v35 = vrot.slane %v2338_v7, 1  ;;  %v684_v11 = vrot.slane %v679_v53, 4  ;;  %v2329_v33 = vsel %vm1172_vm4, %v7905_v10, %v2328_v58  ;;  %v941_v53 = vld [vmem:[#allocation2 + $0xa8] sm:$0xf] }
  0xdd   : > { %2028 = vrot.lane.b32.xlu1 %v7902_v55, %s6883_s28  ;;  %v683_v55 = vsel %vm7061_vm7, %v675_v59, %v682_v19  ;;  %v2756_v4 = vsel %vm2748_vm3, %v2723_v28, %v2397_v54  ;;  %v2500_v7 = vrot.slane %v6156_v37, 1  ;;  %v2501_v9 = vrot.slane %v7875_v3, 1  ;;  %v939_v37 = vld [vmem:[#allocation2 + $0x9c] sm:$0xf]  ;;  %v8016_v3 = vld [vmem:[#allocation2 + $0xa0] sm:$0xf] }
  0xde   : > { %v2525_v16 = vpop.permute.xlu0 %2524  ;;  %847 = vst.msk [vmem:[#allocation2 + $0xc4] sm:$0xf] %vm258_vm0, %v683_v55  ;;  %v6157_v54 = vcombine.low %v1039_v49, %v7864_v1  ;;  %v1323_v45 = vor.u32 %v1322_v18, %v1318_v26  ;;  %v1327_v0 = vrot.slane %v1325_v20, 1  ;;  %v1330_v10 = vshrl.u32 %v7930_v39, 16 }
  0xdf   : > { %v7995_v24 = vpop.permute.xlu1 %1375  ;;  %v2789_v47 = vsel %vm2781_vm10, %v2756_v4, %v2525_v16  ;;  %v2341_v21 = vsel %vm1172_vm4, %v2336_v42, %v2340_v35  ;;  %v1334_v36 = vrot.slane %v1332_v43, 1  ;;  %v1337_v1 = vshll.u32 %v7990_v30, 16  ;;  %v6711_v46 = vld [vmem:[#allocation2 + $0xa4] ss:$0 sps:$4 sm:$0x11]  }
  0xe0   : > { %2138 = vrot.lane.b32.xlu0 %v7829_v40, %s6882_s27  ;;  %6499 = vmatmul.mubr.msk.bf16.gmra.mrb[4].mxu0 %vm2841_vm2, %v2789_v47  ;;  %v849_v40 = vsel %vm7086_vm9, %v684_v11, %v848_v62  ;;  %v2502_v5 = vsel %vm1445_vm6, %v2500_v7, %v2501_v9  ;;  %v6062_v41 = vcombine.low %v911_v22, %v7856_v31  ;;  %v2503_v60 = vrot.slane %v6157_v54, 1  ;;  %v8045_v42 = vld [vmem:[#allocation2 + $0xb0] ss:$0 sps:$4 sm:$0x11]   ;;  %v975_v35 = vld [vmem:[#allocation2 + $0x9c] sm:$0xe] }
  0xe1   : > { %2140 = vrot.lane.b32.xlu1 %v7887_v14, %s6882_s27  ;;  %850 = vst [vmem:[#allocation2 + $0xc8] sm:$0x1] %v849_v40  ;;  %v1328_v44 = vsel %vm1172_vm4, %v1323_v45, %v1327_v0  ;;  %v6063_v59 = vcombine.low %v912_v38, %v7913_v56  ;;  %v6078_v57 = vcombine.low %v939_v37, %v8016_v3  ;;  %v1339_v50 = vrot.slane %v1337_v1, 1  ;;  %v976_v16 = vld [vmem:[#allocation2 + $0xa8] sm:$0xe] }
  0xe2   : > { %v8022_v26 = vpop.permute.xlu0 %1502  ;;  %v1335_v34 = vor.u32 %v1334_v36, %v1330_v10  ;;  %v2504_v58 = vrot.slane %v7926_v52, 1  ;;  %v6079_v19 = vcombine.low %v941_v53, %v8024_v17  ;;  %v1483_v27 = vrot.slane %v7951_v61, 1  ;;  %v1004_v62 = vld [vmem:[#allocation2 + $0xa8] sm:$0xf]  ;;  %v8054_v22 = vld [vmem:[#allocation2 + $0xac] sm:$0xf] }
  0xe3   : > { %v8020_v14 = vpop.permute.xlu1 %1504  ;;  %v1485_v20 = vrot.slane %v6063_v59, 1  ;;  %v1486_v56 = vrot.slane %v7990_v30, 1  ;;  %v1482_v13 = vrot.slane %v6062_v41, 1  ;;  %v1833_v43 = vshll.u32 %v6078_v57, 16  ;;  %v1006_v10 = vld [vmem:[#allocation2 + $0xb4] sm:$0xf] }
  0xe4   : > { %2410 = vrot.lane.b32.xlu0 %v2329_v33, %s6886_s10  ;;  %v1340_v49 = vsel %vm1172_vm4, %v1335_v34, %v1339_v50  ;;  %v2505_v52 = vsel %vm1445_vm6, %v2503_v60, %v2504_v58  ;;  %v1845_v18 = vshll.u32 %v6079_v19, 16  ;;  %v1831_v11 = vshrl.u32 %v6078_v57, 16  ;;  %v8059_v38 = vld [vmem:[#allocation2 + $0xb8] sm:$0xf]  ;;  %v8070_v41 = vld [vmem:[#allocation2 + $0xac] sm:$0xf] }
  0xe5   : > { %2412 = vrot.lane.b32.xlu1 %v2341_v21, %s6886_s10  ;;  %v1487_v30 = vsel %vm1445_vm6, %v1485_v20, %v1486_v56  ;;  %v1484_v55 = vsel %vm1445_vm6, %v1482_v13, %v1483_v27  ;;  %v1838_v4 = vshll.u32 %v6711_v46, 16  ;;  %v1843_v47 = vshrl.u32 %v6079_v19, 16  ;;  %v8073_v58 = vld [vmem:[#allocation2 + $0xb0] ss:$0 sps:$4 sm:$0x11]  }
  0xe6   : > { %v8037_v31 = vpop.permute.xlu0 %1614  ;;  %v1847_v33 = vrot.slane %v1845_v18, 1  ;;  %v1850_v7 = vshll.u32 %v8045_v42, 16  ;;  %v1835_v9 = vrot.slane %v1833_v43, 1  ;;  %v6110_v0 = vcombine.low %v975_v35, %v8016_v3  ;;  %v879_v3 = vld [vmem:[#allocation2 + $0xa8] sm:$0xf] }
  0xe7   : > { %v8035_v2 = vpop.permute.xlu1 %1616  ;;  %v6111_v21 = vcombine.low %v976_v16, %v8024_v17  ;;  %v1840_v36 = vrot.slane %v1838_v4, 1  ;;  %v8065_v1 = vcombine.low %v1004_v62, %v8054_v22  ;;  %v1995_v59 = vrot.slane %v6711_v46, 1  ;;  %v8080_v20 = vld [vmem:[#allocation2 + $0xbc] ss:$0 sps:$4 sm:$0x11]  }
  0xe8   : > { %2538 = vrot.lane.b32.xlu0 %v2502_v5, %s6884_s6  ;;  %v1848_v37 = vor.u32 %v1847_v33, %v1843_v47  ;;  %v1852_v40 = vrot.slane %v1850_v7, 1  ;;  %v1836_v53 = vor.u32 %v1835_v9, %v1831_v11  ;;  %v8068_v5 = vcombine.low %v1006_v10, %v8059_v38  ;;  %v8098_v35 = vld [vmem:[#allocation2 + $0xb8] sm:$0xf]  ;;  %v8109_v62 = vld [vmem:[#allocation2 + $0xb0] ss:$0 sps:$4 sm:$0x11]  }
  0xe9   : > { %1389 = vrot.lane.b32.xlu1 %v1328_v44, %s6880_s25  ;;  %v1994_v17 = vrot.slane %v6110_v0, 1  ;;  %v1997_v34 = vrot.slane %v6111_v21, 1  ;;  %v1998_v50 = vrot.slane %v8045_v42, 1  ;;  %v2560_v27 = vsel %vm2550_vm11, %v7279_v8, %v7967_v12 }
  0xea   : > { %v1887_v61 = vpop.permute.xlu0 %1886  ;;  %v2345_v56 = vshll.u32 %v8065_v1, 16  ;;  %v8084_v13 = vcombine.low %v879_v3, %v8070_v41  ;;  %v2593_v46 = vsel %vm2583_vm12, %v2560_v27, %v8022_v26  ;;  %v2357_v8 = vshll.u32 %v8068_v5, 16  ;;  %v881_v26 = vld [vmem:[#allocation2 + $0xb4] sm:$0xf] }
  0xeb   : > { %v8047_v28 = vpop.permute.xlu1 %1888  ;;  %v2562_v12 = vsel %vm2550_vm11, %v7302_v25, %v7995_v24  ;;  %v1996_v18 = vsel %vm1445_vm6, %v1994_v17, %v1995_v59  ;;  %v2343_v43 = vshrl.u32 %v8065_v1, 16  ;;  %v1999_v11 = vsel %vm1445_vm6, %v1997_v34, %v1998_v50  ;;  %v1040_v24 = vld [vmem:[#allocation2 + $0xa8] sm:$0xe] }
  0xec   : > { %2540 = vrot.lane.b32.xlu0 %v2505_v52, %s6884_s6  ;;  %v1841_v52 = vsel %vm1172_vm4, %v1836_v53, %v1840_v36  ;;  %v2350_v25 = vshll.u32 %v8073_v58, 16  ;;  %v2362_v4 = vshll.u32 %v8080_v20, 16  ;;  %v2347_v16 = vrot.slane %v2345_v56, 1 }
  0xed   : > { %1391 = vrot.lane.b32.xlu1 %v1340_v49, %s6880_s25  ;;  %v1853_v49 = vsel %vm1172_vm4, %v1848_v37, %v1852_v40  ;;  %v2355_v47 = vshrl.u32 %v8068_v5, 16  ;;  %v2359_v33 = vrot.slane %v2357_v8, 1  ;;  %v8115_v7 = vcombine.low %v881_v26, %v8098_v35 }
  0xee   : > { %v2015_v45 = vpop.permute.xlu0 %2014  ;;  %v6158_v21 = vcombine.low %v1040_v24, %v8054_v22  ;;  %v2352_v40 = vrot.slane %v2350_v25, 1  ;;  %v1342_v53 = vshrl.u32 %v8084_v13, 16  ;;  %v1349_v17 = vshll.u32 %v8109_v62, 16  ;;  %v8132_v22 = vld [vmem:[#allocation2 + $0xbc] ss:$0 sps:$4 sm:$0x11]  }
  0xef   : > { %v8056_v54 = vpop.permute.xlu1 %2016  ;;  %v2360_v59 = vor.u32 %v2359_v33, %v2355_v47  ;;  %v2364_v34 = vrot.slane %v2362_v4, 1  ;;  %v1356_v50 = vshll.u32 %v8115_v7, 16  ;;  %v2507_v8 = vrot.slane %v8073_v58, 1  ;;  %v943_v25 = vld [vmem:[#allocation2 + $0xb4] sm:$0xf] }
  0xf0   : > { %1518 = vrot.lane.b32.xlu0 %v1484_v55, %s6879_s24  ;;  %v8156_v24 = vld [vmem:[#allocation2 + $0xb8] sm:$0xf]  ;;  %v2510_v4 = vrot.slane %v8080_v20, 1  ;;  %v1492_v20 = vrot.slane %v8132_v22, 1  ;;  %vm3071_vm0 = vcmask 60416   ;;  %vm3074_vm8 = vcmask 57344  }
  0xf1   : > { %1520 = vrot.lane.b32.xlu1 %v1487_v30, %s6879_s24  ;;  %v2595_v30 = vsel %vm2583_vm12, %v2562_v12, %v8020_v14  ;;  %v1344_v14 = vshll.u32 %v8084_v13, 16  ;;  %v1358_v58 = vrot.slane %v1356_v50, 1  ;;  %vm8496_vm9 = vmand %vm3071_vm0, %vm735_vm5  ;;  %vm5485_vm5 = vcmask 326656  }
  0xf2   : > { %v2127_v60 = vpop.permute.xlu0 %2126  ;;  %v2628_v9 = vsel %vm2616_vm13, %v2595_v30, %v8035_v2  ;;  %v2348_v2 = vor.u32 %v2347_v16, %v2343_v43  ;;  %v1354_v43 = vshrl.u32 %v8115_v7, 16  ;;  %v945_v30 = vld [vmem:[#allocation2 + $0xc0] sm:$0xf] }
  0xf3   : > { %v2129_v44 = vpop.permute.xlu1 %2128  ;;  %v2661_v36 = vsel %vm2649_vm14, %v2628_v9, %v8047_v28 }
  0xf4   : > { %1630 = vrot.lane.b32.xlu0 %v6078_v57, %s6881_s26  ;;  %v2626_v57 = vsel %vm2616_vm13, %v2593_v46, %v8037_v31  ;;  %v2694_v3 = vsel %vm2682_vm15, %v2661_v36, %v8056_v54  ;;  %v1041_v46 = vld [vmem:[#allocation2 + $0xb4] sm:$0xe]  ;;  %v1359_v47 = vor.u32 %v1358_v58, %v1354_v43 }
  0xf5   : > { %1632 = vrot.lane.b32.xlu1 %v6079_v19, %s6881_s26  ;;  %v2659_v55 = vsel %vm2649_vm14, %v2626_v57, %v1887_v61  ;;  %v2727_v28 = vsel %vm2715_vm1, %v2694_v3, %v2129_v44  ;;  %v2353_v44 = vsel %vm1172_vm4, %v2348_v2, %v2352_v40  ;;  %v1351_v57 = vrot.slane %v1349_v17, 1  ;;  %v6727_v40 = vld [vmem:[#allocation2 + $0xc8] ss:$0 sps:$4 sm:$0x11]  }
  0xf6   : > { %v2399_v42 = vpop.permute.xlu0 %2398  ;;  %v2692_v31 = vsel %vm2682_vm15, %v2659_v55, %v2015_v45  ;;  %v6159_v26 = vcombine.low %v1041_v46, %v8059_v38  ;;  %v8174_v2 = vld [vmem:[#allocation2 + $0xbc] ss:$0 sps:$4 sm:$0x11]  }
  0xf7   : > { %v2401_v19 = vpop.permute.xlu1 %2400  ;;  %v2725_v61 = vsel %vm2715_vm1, %v2692_v31, %v2127_v60  ;;  %v1346_v60 = vrot.slane %v1344_v14, 1 }
  0xf8   : > { %1902 = vrot.lane.b32.xlu0 %v1841_v52, %s6885_s9  ;;  %v2758_v45 = vsel %vm2748_vm3, %v2725_v61, %v2399_v42  ;;  %v2760_v54 = vsel %vm2748_vm3, %v2727_v28, %v2401_v19  ;;  %v2506_v52 = vrot.slane %v6158_v21, 1  ;;  %v1361_v19 = vshll.u32 %v8132_v22, 16  ;;  %v914_v42 = vld [vmem:[#allocation2 + $0xb4] sm:$0xe]  ;;  %v1010_v28 = vld [vmem:[#allocation2 + $0xcc] sm:$0xf] }
  0xf9   : > { %1904 = vrot.lane.b32.xlu1 %v1853_v49, %s6885_s9  ;;  %v1347_v12 = vor.u32 %v1346_v60, %v1342_v53  ;;  %v6065_v14 = vcombine.low %v914_v42, %v8098_v35  ;;  %v2509_v33 = vrot.slane %v6159_v26, 1  ;;  %v1489_v35 = vrot.slane %v8109_v62, 1  ;;  %v1008_v42 = vld [vmem:[#allocation2 + $0xc0] sm:$0xf] }
  0xfa   : > { %v2527_v10 = vpop.permute.xlu0 %2526  ;;  %v2508_v31 = vsel %vm1445_vm6, %v2506_v52, %v2507_v8  ;;  %v1363_v16 = vrot.slane %v1361_v19, 1  ;;  %v1862_v8 = vshll.u32 %v8174_v2, 16 }
  0xfb   : > { %v8120_v0 = vpop.permute.xlu1 %1377  ;;  %v2791_v37 = vsel %vm2781_vm10, %v2758_v45, %v2527_v10  ;;  %v1352_v38 = vsel %vm1172_vm4, %v1347_v12, %v1351_v57  ;;  %v6080_v45 = vcombine.low %v943_v25, %v8156_v24  ;;  %v1491_v36 = vrot.slane %v6065_v14, 1 }
  0xfc   : > { %2030 = vrot.lane.b32.xlu0 %v1996_v18, %s6883_s28  ;;  %6502 = vmatprep.mubr.msk.bf16.mxu0 %vm2841_vm2, %v2791_v37  ;;  %v2365_v18 = vsel %vm1172_vm4, %v2360_v59, %v2364_v34  ;;  %v2511_v53 = vsel %vm1445_vm6, %v2509_v33, %v2510_v4  ;;  %v8178_v59 = vld [vmem:[#allocation2 + $0xd0] sm:$0xf]  ;;  %v1864_v25 = vrot.slane %v1862_v8, 1  ;;  %v2004_v14 = vrot.slane %v6727_v40, 1 }
  0xfd   : > { %2032 = vrot.lane.b32.xlu1 %v1999_v11, %s6883_s28  ;;  %v946_v11 = vld [vmem:[#allocation2 + $0xc4] sm:$0xf]  ;;  %v1857_v60 = vshll.u32 %v6080_v45, 16  ;;  %v1493_v62 = vsel %vm1445_vm6, %v1491_v36, %v1492_v20  ;;  %v8190_v19 = vcombine.low %v1010_v28, %v8178_v59  ;;  %v2001_v33 = vrot.slane %v8174_v2, 1 }
  0xfe   : > { %v2529_v56 = vpop.permute.xlu0 %2528  ;;  %v6081_v9 = vcombine.low %v945_v30, %v946_v11  ;;  %v8213_v20 = vld [vmem:[#allocation2 + $0xc8] ss:$0 sps:$4 sm:$0x11]  }
  0xff   : > { %v8138_v27 = vpop.permute.xlu1 %1379  ;;  %v2793_v49 = vsel %vm2781_vm10, %v2760_v54, %v2529_v56  ;;  %v1874_v54 = vshll.u32 %v6727_v40, 16  ;;  %v978_v56 = vld [vmem:[#allocation2 + $0xc0] sm:$0xe]  ;;  %v1859_v52 = vrot.slane %v1857_v60, 1  ;;  %v9681_v60 = vmov 0  }
 0x100   : > { %2142 = vrot.lane.b32.xlu0 %v8065_v1, %s6882_s27  ;;  %6503 = vmatmul.mubr.msk.bf16.gmra.mrb[8].mxu0 %vm2841_vm2, %v2793_v49  ;;  %v1869_v3 = vshll.u32 %v6081_v9, 16  ;;  %v1867_v50 = vshrl.u32 %v6081_v9, 16  ;;  %v1855_v49 = vshrl.u32 %v6080_v45, 16  ;;  %v6113_v43 = vcombine.low %v978_v56, %v946_v11  ;;  %3079 = vst.msk [vmem:[#allocation3 + $0x18] sm:$0xf] %vm3071_vm0, %v9681_v60 }
 0x101   : > { %2144 = vrot.lane.b32.xlu1 %v8068_v5, %s6882_s27  ;;  %v913_v5 = vld [vmem:[#allocation2 + $0xa8] sm:$0xe]  ;;  %v1876_v58 = vrot.slane %v1874_v54, 1  ;;  %3072 = vst.msk [vmem:[#allocation3] sm:$0xf] %vm3071_vm0, %v9681_v60 }
 0x102   : > { %v8154_v1 = vpop.permute.xlu0 %1506  ;;  %v6064_v61 = vcombine.low %v913_v5, %v8070_v41  ;;  %v1364_v41 = vsel %vm1172_vm4, %v1359_v47, %v1363_v16  ;;  %v1871_v46 = vrot.slane %v1869_v3, 1  ;;  %v1860_v30 = vor.u32 %v1859_v52, %v1855_v49  ;;  %3073 = vst.msk [vmem:[#allocation3 + $0x4] sm:$0xf] %vm3071_vm0, %v9681_v60  ;;  %3076 = vst.msk [vmem:[#allocation3 + $0xc] sm:$0xf] %vm3071_vm0, %v9681_v60 }
 0x103   : > { %v8152_v55 = vpop.permute.xlu1 %1508  ;;  %v2381_v16 = vshll.u32 %v8190_v19, 16  ;;  %v2003_v11 = vrot.slane %v6113_v43, 1  ;;  %3077 = vst.msk [vmem:[#allocation3 + $0x10] sm:$0xf] %vm3071_vm0, %v9681_v60  ;;  %3080 = vst.msk [vmem:[#allocation3 + $0x1c] sm:$0xf] %vm3071_vm0, %v9681_v60 }
 0x104   : > { %2414 = vrot.lane.b32.xlu0 %v2353_v44, %s6886_s10  ;;  %v1488_v37 = vrot.slane %v6064_v61, 1  ;;  %v977_v44 = vld [vmem:[#allocation2 + $0xb4] sm:$0xe]  ;;  %v1872_v5 = vor.u32 %v1871_v46, %v1867_v50  ;;  %v8205_v61 = vld [vmem:[#allocation2 + $0xd4] ss:$0 sps:$4 sm:$0x11]  }
 0x105   : > { %2416 = vrot.lane.b32.xlu1 %v2365_v18, %s6886_s10  ;;  %v8192_v18 = vld [vmem:[#allocation2 + $0xc4] sm:$0xf]  ;;  %v6112_v26 = vcombine.low %v977_v44, %v8156_v24  ;;  %v2564_v24 = vsel %vm2550_vm11, %v7406_v48, %v8120_v0  ;;  %v2386_v3 = vshll.u32 %v8205_v61, 16  ;;  %3082 = vst.msk [vmem:[#allocation3 + $0x24] sm:$0xf] %vm3071_vm0, %v9681_v60 }
 0x106   : > { %v1619_v21 = vpop.permute.xlu0 %1618  ;;  %v1490_v34 = vsel %vm1445_vm6, %v1488_v37, %v1489_v35  ;;  %v2597_v36 = vsel %vm2583_vm12, %v2564_v24, %v8154_v1  ;;  %v1877_v37 = vsel %vm1172_vm4, %v1872_v5, %v1876_v58  ;;  %v1865_v35 = vsel %vm1172_vm4, %v1860_v30, %v1864_v25  ;;  %3083 = vst.msk [vmem:[#allocation3 + $0x28] sm:$0xf] %vm3071_vm0, %v9681_v60 }
 0x107   : > { %v8166_v10 = vpop.permute.xlu1 %1620  ;;  %v2000_v47 = vrot.slane %v6112_v26, 1  ;;  %v2630_v48 = vsel %vm2616_vm13, %v2597_v36, %v1619_v21  ;;  %v8228_v1 = vsel %vm1445_vm6, %v2003_v11, %v2004_v14  ;;  %3085 = vst.msk [vmem:[#allocation3 + $0x30] sm:$0xf] %vm3071_vm0, %v9681_v60  ;;  %3086 = vst.msk [vmem:[#allocation3 + $0x34] sm:$0xf] %vm3071_vm0, %v9681_v60  ;;  %v2566_v21 = vsel %vm2550_vm11, %v7429_v6, %v8138_v27 }
 0x108   : > { %2542 = vrot.lane.b32.xlu0 %v2508_v31, %s6884_s6  ;;  %v8198_v31 = vcombine.low %v1008_v42, %v8192_v18  ;;  %3088 = vst.msk [vmem:[#allocation3 + $0x3c] sm:$0xf] %vm3071_vm0, %v9681_v60  ;;  %3089 = vst.msk [vmem:[#allocation3 + $0x40] sm:$0xf] %vm3071_vm0, %v9681_v60  ;;  %v2599_v50 = vsel %vm2583_vm12, %v2566_v21, %v8152_v55  ;;  %v1042_v6 = vld [vmem:[#allocation2 + $0xc0] sm:$0xe] }
 0x109   : > { %1393 = vrot.lane.b32.xlu1 %v1352_v38, %s6880_s25  ;;  %3091 = vst.msk [vmem:[#allocation3 + $0x48] sm:$0xf] %vm3071_vm0, %v9681_v60  ;;  %3092 = vst.msk [vmem:[#allocation3 + $0x4c] sm:$0xf] %vm3071_vm0, %v9681_v60  ;;  %v2002_v28 = vsel %vm1445_vm6, %v2000_v47, %v2001_v33  ;;  %v2632_v27 = vsel %vm2616_vm13, %v2599_v50, %v8166_v10  ;;  %v6160_v42 = vcombine.low %v1042_v6, %v8192_v18  ;;  %v3660_v30 = vld [vmem:[#allocation3] sm:$0xf] }
 0x10a   : > { %v1891_v22 = vpop.permute.xlu0 %1890  ;;  %v2369_v40 = vshll.u32 %v8198_v31, 16  ;;  %v2367_v2 = vshrl.u32 %v8198_v31, 16  ;;  %3094 = vst.msk [vmem:[#allocation3 + $0x54] sm:$0xf] %vm3071_vm0, %v9681_v60  ;;  %3095 = vst.msk [vmem:[#allocation3 + $0x58] sm:$0xf] %vm3071_vm0, %v9681_v60 }
 0x10b   : > { %v8176_v17 = vpop.permute.xlu1 %1892  ;;  %3097 = vst.msk [vmem:[#allocation3 + $0x60] sm:$0xf] %vm3071_vm0, %v9681_v60  ;;  %3098 = vst.msk [vmem:[#allocation3 + $0x64] sm:$0xf] %vm3071_vm0, %v9681_v60  ;;  %v3661_v25 = vld [vmem:[#allocation3 + $0x4] sm:$0xf] }
 0x10c   : > { %2544 = vrot.lane.b32.xlu0 %v2511_v53, %s6884_s6  ;;  %v2663_v53 = vsel %vm2649_vm14, %v2630_v48, %v1891_v22  ;;  %3100 = vst.msk [vmem:[#allocation3 + $0x6c] sm:$0xf] %vm3071_vm0, %v9681_v60  ;;  %3101 = vst.msk [vmem:[#allocation3 + $0x70] sm:$0xf] %vm3071_vm0, %v9681_v60  ;;  %v2371_v56 = vrot.slane %v2369_v40, 1  ;;  %v2665_v55 = vsel %vm2649_vm14, %v2632_v27, %v8176_v17  ;;  %v2512_v11 = vrot.slane %v6160_v42, 1 }
 0x10d   : > { %1395 = vrot.lane.b32.xlu1 %v1364_v41, %s6880_s25  ;;  %v8224_v41 = vrot.slane %v2381_v16, 1  ;;  %3103 = vst.msk [vmem:[#allocation3 + $0x78] sm:$0xf] %vm3071_vm0, %v9681_v60  ;;  %3104 = vst.msk [vmem:[#allocation3 + $0x7c] sm:$0xf] %vm3071_vm0, %v9681_v60  ;;  %v2516_v16 = vrot.slane %v8205_v61, 1 }
 0x10e   : > { %v8187_v57 = vpop.permute.xlu0 %2018  ;;  %3106 = vst.msk [vmem:[#allocation3 + $0x84] sm:$0xf] %vm3071_vm0, %v9681_v60  ;;  %3107 = vst.msk [vmem:[#allocation3 + $0x88] sm:$0xf] %vm3071_vm0, %v9681_v60  ;;  %v2513_v14 = vrot.slane %v8213_v20, 1 }
 0x10f   : > { %v8185_v12 = vpop.permute.xlu1 %2020  ;;  %3109 = vst.msk [vmem:[#allocation3 + $0x90] sm:$0xf] %vm3071_vm0, %v9681_v60  ;;  %3110 = vst.msk [vmem:[#allocation3 + $0x94] sm:$0xf] %vm3071_vm0, %v9681_v60  ;;  %v2696_v22 = vsel %vm2682_vm15, %v2663_v53, %v8187_v57 }
 0x110   : > { %1522 = vrot.lane.b32.xlu0 %v1490_v34, %s6879_s24  ;;  %3112 = vst.msk [vmem:[#allocation3 + $0x9c] sm:$0xf] %vm3071_vm0, %v9681_v60  ;;  %3113 = vst.msk [vmem:[#allocation3 + $0xa0] sm:$0xf] %vm3071_vm0, %v9681_v60  ;;  %v1043_v34 = vld [vmem:[#allocation2 + $0xcc] sm:$0xe]  ;;  %v2698_v44 = vsel %vm2682_vm15, %v2665_v55, %v8185_v12  ;;  %v2372_v12 = vor.u32 %v2371_v56, %v2367_v2  ;;  %v2514_v40 = vsel %vm1445_vm6, %v2512_v11, %v2513_v14 }
 0x111   : > { %1524 = vrot.lane.b32.xlu1 %v1493_v62, %s6879_s24  ;;  %3115 = vst.msk [vmem:[#allocation3 + $0xa8] sm:$0xf] %vm3071_vm0, %v9681_v60  ;;  %3116 = vst.msk [vmem:[#allocation3 + $0xac] sm:$0xf] %vm3071_vm0, %v9681_v60  ;;  %v2374_v62 = vshll.u32 %v8213_v20, 16  ;;  %v6161_v8 = vcombine.low %v1043_v34, %v8178_v59  ;;  %v2388_v59 = vrot.slane %v2386_v3, 1 }
 0x112   : > { %v8202_v38 = vpop.permute.xlu0 %2130  ;;  %3118 = vst.msk [vmem:[#allocation3 + $0xb4] sm:$0xf] %vm3071_vm0, %v9681_v60  ;;  %3119 = vst.msk [vmem:[#allocation3 + $0xb8] sm:$0xf] %vm3071_vm0, %v9681_v60 }
 0x113   : > { %v8200_v4 = vpop.permute.xlu1 %2132  ;;  %3121 = vst.msk [vmem:[#allocation3 + $0xc0] sm:$0xf] %vm3071_vm0, %v9681_v60  ;;  %3122 = vst.msk [vmem:[#allocation3 + $0xc4] sm:$0xf] %vm3071_vm0, %v9681_v60  ;;  %v2729_v54 = vsel %vm2715_vm1, %v2696_v22, %v8202_v38  ;;  %v2376_v43 = vrot.slane %v2374_v62, 1  ;;  %v8381_v38 = vcombine.low %v3660_v30, %v3661_v25 }
 0x114   : > { %1634 = vrot.lane.b32.xlu0 %v6080_v45, %s6881_s26  ;;  %v2379_v45 = vshrl.u32 %v8190_v19, 16  ;;  %3124 = vst.msk [vmem:[#allocation3 + $0xcc] sm:$0xf] %vm3071_vm0, %v9681_v60  ;;  %3125 = vst.msk [vmem:[#allocation3 + $0xd0] sm:$0xf] %vm3071_vm0, %v9681_v60  ;;  %v2731_v17 = vsel %vm2715_vm1, %v2698_v44, %v8200_v4  ;;  %v2515_v4 = vrot.slane %v6161_v8, 1 }
 0x115   : > { %1636 = vrot.lane.b32.xlu1 %v6081_v9, %s6881_s26  ;;  %3081 = vst.msk [vmem:[#allocation3 + $0x20] sm:$0x1] %vm3074_vm8, %v9681_v60  ;;  %3075 = vst.msk [vmem:[#allocation3 + $0x8] sm:$0x1] %vm3074_vm8, %v9681_v60  ;;  %v2377_v47 = vsel %vm1172_vm4, %v2372_v12, %v2376_v43  ;;  %v3984_v36 = vshll.u32 %v8381_v38, 16 }
 0x116   : > { %v2403_v9 = vpop.permute.xlu0 %2402  ;;  %3078 = vst.msk [vmem:[#allocation3 + $0x14] sm:$0x1] %vm3074_vm8, %v9681_v60  ;;  %3084 = vst.msk [vmem:[#allocation3 + $0x2c] sm:$0x1] %vm3074_vm8, %v9681_v60  ;;  %v2384_v57 = vor.u32 %v8224_v41, %v2379_v45  ;;  %v2517_v20 = vsel %vm1445_vm6, %v2515_v4, %v2516_v16  ;;  %v3708_v41 = vld [vmem:[#allocation3] sm:$0xe] }
 0x117   : > { %v8221_v0 = vpop.permute.xlu1 %2404  ;;  %v2762_v46 = vsel %vm2748_vm3, %v2729_v54, %v2403_v9  ;;  %3087 = vst.msk [vmem:[#allocation3 + $0x38] sm:$0x1] %vm3074_vm8, %v9681_v60  ;;  %3090 = vst.msk [vmem:[#allocation3 + $0x44] sm:$0x1] %vm3074_vm8, %v9681_v60  ;;  %v6246_v53 = vcombine.low %v3708_v41, %v3661_v25 }
 0x118   : > { %1906 = vrot.lane.b32.xlu0 %v1865_v35, %s6885_s9  ;;  %3093 = vst.msk [vmem:[#allocation3 + $0x50] sm:$0x1] %vm3074_vm8, %v9681_v60  ;;  %3096 = vst.msk [vmem:[#allocation3 + $0x5c] sm:$0x1] %vm3074_vm8, %v9681_v60  ;;  %v2764_v58 = vsel %vm2748_vm3, %v2731_v17, %v8221_v0  ;;  %v2389_v24 = vsel %vm1172_vm4, %v2384_v57, %v2388_v59  ;;  %v3982_v35 = vshrl.u32 %v8381_v38, 16 }
 0x119   : > { %1908 = vrot.lane.b32.xlu1 %v1877_v37, %s6885_s9  ;;  %3099 = vst.msk [vmem:[#allocation3 + $0x68] sm:$0x1] %vm3074_vm8, %v9681_v60  ;;  %3102 = vst.msk [vmem:[#allocation3 + $0x74] sm:$0x1] %vm3074_vm8, %v9681_v60  ;;  %v4253_v3 = vrot.slane %v6246_v53, 1 }
 0x11a   : > { %v2531_v52 = vpop.permute.xlu0 %2530  ;;  %3105 = vst.msk [vmem:[#allocation3 + $0x80] sm:$0x1] %vm3074_vm8, %v9681_v60  ;;  %3108 = vst.msk [vmem:[#allocation3 + $0x8c] sm:$0x1] %vm3074_vm8, %v9681_v60 }
 0x11b   : > { %v8320_v49 = vpop.permute.xlu1 %1381  ;;  %3111 = vst.msk [vmem:[#allocation3 + $0x98] sm:$0x1] %vm3074_vm8, %v9681_v60  ;;  %3114 = vst.msk [vmem:[#allocation3 + $0xa4] sm:$0x1] %vm3074_vm8, %v9681_v60  ;;  %v2795_v10 = vsel %vm2781_vm10, %v2762_v46, %v2531_v52 }
 0x11c   : > { %3117 = vst.msk [vmem:[#allocation3 + $0xb0] sm:$0x1] %vm3074_vm8, %v9681_v60  ;;  %3120 = vst.msk [vmem:[#allocation3 + $0xbc] sm:$0x1] %vm3074_vm8, %v9681_v60  ;;  %2034 = vrot.lane.b32.xlu0 %v2002_v28, %s6883_s28  ;;  %6506 = vmatprep.mubr.msk.bf16.mxu0 %vm2841_vm2, %v2795_v10  ;;  %v2568_v54 = vsel %vm2550_vm11, %v7515_v29, %v8320_v49 }
 0x11d   : > { %3123 = vst.msk [vmem:[#allocation3 + $0xc8] sm:$0x1] %vm3074_vm8, %v9681_v60  ;;  %3126 = vst.msk [vmem:[#allocation3 + $0xd4] sm:$0x1] %vm3074_vm8, %v9681_v60  ;;  %2036 = vrot.lane.b32.xlu1 %v8228_v1, %s6883_s28 }
 0x11e   : > { %v2533_v5 = vpop.permute.xlu0 %2532  ;;  %v6738_v33 = vld [vmem:[#allocation3 + $0x8] ss:$0 sps:$4 sm:$0x11]  }
 0x11f   : > { %v1384_v26 = vpop.permute.xlu1 %1383  ;;  %v2797_v18 = vsel %vm2781_vm10, %v2764_v58, %v2533_v5  ;;  %v3989_v61 = vshll.u32 %v6738_v33, 16  ;;  %v4254_v2 = vrot.slane %v6738_v33, 1 }
 0x120   : > { %2146 = vrot.lane.b32.xlu0 %v8198_v31, %s6882_s27  ;;  %6507 = vmatmul.mubr.msk.bf16.gmra.mrb[12].mxu0 %vm2841_vm2, %v2797_v18  ;;  %v3986_v31 = vrot.slane %v3984_v36, 1  ;;  %v2570_v55 = vsel %vm2550_vm11, %v7552_v51, %v1384_v26 }
 0x121   : > { %2148 = vrot.lane.b32.xlu1 %v8190_v19, %s6882_s27  ;;  %v3991_v45 = vrot.slane %v3989_v61, 1  ;;  %v4255_v22 = vsel %vm1445_vm6, %v4253_v3, %v4254_v2 }
 0x122   : > { %v1511_v19 = vpop.permute.xlu0 %1510  ;;  %v3987_v48 = vor.u32 %v3986_v31, %v3982_v35 }
 0x123   : > { %v1513_v37 = vpop.permute.xlu1 %1512  ;;  %v2601_v56 = vsel %vm2583_vm12, %v2568_v54, %v1511_v19 }
 0x124   : > { %2418 = vrot.lane.b32.xlu0 %v2377_v47, %s6886_s10  ;;  %v3992_v1 = vsel %vm1172_vm4, %v3987_v48, %v3991_v45  ;;  %v2603_v8 = vsel %vm2583_vm12, %v2570_v55, %v1513_v37 }
 0x125   : > { %2420 = vrot.lane.b32.xlu1 %v2389_v24, %s6886_s10 }
 0x126   : > { %v1623_v9 = vpop.permute.xlu0 %1622 }
 0x127   : > { %v1625_v0 = vpop.permute.xlu1 %1624  ;;  %v2634_v6 = vsel %vm2616_vm13, %v2601_v56, %v1623_v9 }
 0x128   : > { %2546 = vrot.lane.b32.xlu0 %v2514_v40, %s6884_s6  ;;  %v2636_v57 = vsel %vm2616_vm13, %v2603_v8, %v1625_v0 }
 0x129   : > { %2548 = vrot.lane.b32.xlu1 %v2517_v20, %s6884_s6 }
 0x12a   : > { %v1895_v21 = vpop.permute.xlu0 %1894 }
 0x12b   : > { %v1897_v60 = vpop.permute.xlu1 %1896  ;;  %v2667_v52 = vsel %vm2649_vm14, %v2634_v6, %v1895_v21 }
 0x12c   : > { %4173 = vrot.lane.b32.xlu0 %v3992_v1, %s6879_s24  ;;  %v2669_v17 = vsel %vm2649_vm14, %v2636_v57, %v1897_v60 }
 0x12e   : > { %v2023_v62 = vpop.permute.xlu0 %2022 }
 0x12f   : > { %v2025_v28 = vpop.permute.xlu1 %2024  ;;  %v2700_v10 = vsel %vm2682_vm15, %v2667_v52, %v2023_v62 }
 0x130   : > { %4301 = vrot.lane.b32.xlu0 %v4255_v22, %s6885_s9  ;;  %v2702_v12 = vsel %vm2682_vm15, %v2669_v17, %v2025_v28 }
 0x132   : > { %v2135_v50 = vpop.permute.xlu0 %2134 }
 0x133   : > { %v2137_v34 = vpop.permute.xlu1 %2136  ;;  %v2733_v44 = vsel %vm2715_vm1, %v2700_v10, %v2135_v50 }
 0x134   : > { %v2735_v51 = vsel %vm2715_vm1, %v2702_v12, %v2137_v34 }
 0x136   : > { %v2407_v46 = vpop.permute.xlu0 %2406 }
 0x137   : > { %v2409_v27 = vpop.permute.xlu1 %2408  ;;  %v2766_v29 = vsel %vm2748_vm3, %v2733_v44, %v2407_v46 }
 0x138   : > { %v2768_v43 = vsel %vm2748_vm3, %v2735_v51, %v2409_v27 }
 0x13a   : > { %v2535_v42 = vpop.permute.xlu0 %2534 }
 0x13b   : > { %v1386_v49 = vpop.permute.xlu1 %1385  ;;  %v2799_v59 = vsel %vm2781_vm10, %v2766_v29, %v2535_v42 }
 0x13c   : > { %6510 = vmatprep.mubr.msk.bf16.mxu0 %vm2841_vm2, %v2799_v59  ;;  %v2572_v36 = vsel %vm2550_vm11, %v7711_v32, %v1386_v49 }
 0x13e   : > { %v2537_v26 = vpop.permute.xlu0 %2536 }
 0x13f   : > { %v1388_v58 = vpop.permute.xlu1 %1387  ;;  %v2801_v5 = vsel %vm2781_vm10, %v2768_v43, %v2537_v26 }
 0x140   : > { %6511 = vmatmul.mubr.msk.bf16.gmra.mrb[16].mxu0 %vm2841_vm2, %v2801_v5  ;;  %v2574_v20 = vsel %vm2550_vm11, %v7748_v15, %v1388_v58 }
 0x142   : > { %v1515_v25 = vpop.permute.xlu0 %1514 }
 0x143   : > { %v1517_v30 = vpop.permute.xlu1 %1516  ;;  %v2605_v37 = vsel %vm2583_vm12, %v2572_v36, %v1515_v25 }
 0x144   : > { %v2607_v48 = vsel %vm2583_vm12, %v2574_v20, %v1517_v30 }
 0x146   : > { %v1627_v4 = vpop.permute.xlu0 %1626 }
 0x147   : > { %v1629_v18 = vpop.permute.xlu1 %1628  ;;  %v2638_v19 = vsel %vm2616_vm13, %v2605_v37, %v1627_v4 }
 0x148   : > { %v2640_v9 = vsel %vm2616_vm13, %v2607_v48, %v1629_v18 }
 0x14a   : > { %v1899_v11 = vpop.permute.xlu0 %1898 }
 0x14b   : > { %v1901_v16 = vpop.permute.xlu1 %1900  ;;  %v2671_v61 = vsel %vm2649_vm14, %v2638_v19, %v1899_v11 }
 0x14c   : > { %v2673_v53 = vsel %vm2649_vm14, %v2640_v9, %v1901_v16 }
 0x14e   : > { %v2027_v24 = vpop.permute.xlu0 %2026 }
 0x14f   : > { %v2029_v14 = vpop.permute.xlu1 %2028  ;;  %v2704_v40 = vsel %vm2682_vm15, %v2671_v61, %v2027_v24 }
 0x150   : > { %v2706_v3 = vsel %vm2682_vm15, %v2673_v53, %v2029_v14 }
 0x152   : > { %v2139_v33 = vpop.permute.xlu0 %2138 }
 0x153   : > { %v2141_v47 = vpop.permute.xlu1 %2140  ;;  %v2737_v0 = vsel %vm2715_vm1, %v2704_v40, %v2139_v33 }
 0x154   : > { %v2739_v15 = vsel %vm2715_vm1, %v2706_v3, %v2141_v47 }
 0x156   : > { %v2411_v31 = vpop.permute.xlu0 %2410 }
 0x157   : > { %v2413_v35 = vpop.permute.xlu1 %2412  ;;  %v2770_v32 = vsel %vm2748_vm3, %v2737_v0, %v2411_v31  ;;  %v8468_v31 = vld [vmem:[%s9668_s2] ss:$0 sm:$0xff] }
 0x158   : > { %v2772_v2 = vsel %vm2748_vm3, %v2739_v15, %v2413_v35 }
 0x15a   : > { %v2539_v41 = vpop.permute.xlu0 %2538 }
 0x15b   : > { %v1390_v45 = vpop.permute.xlu1 %1389  ;;  %v2803_v1 = vsel %vm2781_vm10, %v2770_v32, %v2539_v41 }
 0x15c   : > { %6514 = vmatprep.mubr.msk.bf16.mxu0 %vm2841_vm2, %v2803_v1  ;;  %v2576_v55 = vsel %vm2550_vm11, %v7882_v63, %v1390_v45 }
 0x15e   : > { %v2541_v21 = vpop.permute.xlu0 %2540 }
 0x15f   : > { %v1392_v60 = vpop.permute.xlu1 %1391  ;;  %v2805_v22 = vsel %vm2781_vm10, %v2772_v2, %v2541_v21 }
 0x160   : > { %6515 = vmatmul.mubr.msk.bf16.gmra.mrb[20].mxu0 %vm2841_vm2, %v2805_v22  ;;  %v2578_v49 = vsel %vm2550_vm11, %v7930_v39, %v1392_v60 }
 0x162   : > { %v1519_v62 = vpop.permute.xlu0 %1518 }
 0x163   : > { %v1521_v28 = vpop.permute.xlu1 %1520  ;;  %v2609_v10 = vsel %vm2583_vm12, %v2576_v55, %v1519_v62 }
 0x164   : > { %v2611_v17 = vsel %vm2583_vm12, %v2578_v49, %v1521_v28 }
 0x166   : > { %v1631_v50 = vpop.permute.xlu0 %1630 }
 0x167   : > { %v1633_v34 = vpop.permute.xlu1 %1632  ;;  %v2642_v8 = vsel %vm2616_vm13, %v2609_v10, %v1631_v50 }
 0x168   : > { %v2644_v12 = vsel %vm2616_vm13, %v2611_v17, %v1633_v34 }
 0x16a   : > { %v1903_v56 = vpop.permute.xlu0 %1902 }
 0x16b   : > { %v1905_v54 = vpop.permute.xlu1 %1904  ;;  %v2675_v29 = vsel %vm2649_vm14, %v2642_v8, %v1903_v56 }
 0x16c   : > { %v2677_v58 = vsel %vm2649_vm14, %v2644_v12, %v1905_v54 }
 0x16e   : > { %v2031_v27 = vpop.permute.xlu0 %2030 }
 0x16f   : > { %v2033_v6 = vpop.permute.xlu1 %2032  ;;  %v2708_v42 = vsel %vm2682_vm15, %v2675_v29, %v2031_v27 }
 0x170   : > { %v2710_v5 = vsel %vm2682_vm15, %v2677_v58, %v2033_v6 }
 0x172   : > { %v2143_v52 = vpop.permute.xlu0 %2142 }
 0x173   : > { %v2145_v46 = vpop.permute.xlu1 %2144  ;;  %v2741_v59 = vsel %vm2715_vm1, %v2708_v42, %v2143_v52 }
 0x174   : > { %v2743_v39 = vsel %vm2715_vm1, %v2710_v5, %v2145_v46 }
 0x176   : > { %v2415_v57 = vpop.permute.xlu0 %2414 }
 0x177   : > { %v2417_v44 = vpop.permute.xlu1 %2416  ;;  %v2774_v63 = vsel %vm2748_vm3, %v2741_v59, %v2415_v57 }
 0x178   : > { %v2776_v30 = vsel %vm2748_vm3, %v2743_v39, %v2417_v44 }
 0x17a   : > { %v2543_v43 = vpop.permute.xlu0 %2542 }
 0x17b   : > { %v1394_v51 = vpop.permute.xlu1 %1393  ;;  %v2807_v26 = vsel %vm2781_vm10, %v2774_v63, %v2543_v43  ;;  %v3555_v43 = vld [vmem:[#allocation3 + $0x18] sm:$0xf] }
 0x17c   : > { %6518 = vmatprep.mubr.msk.bf16.mxu0 %vm2841_vm2, %v2807_v26  ;;  %v2580_v20 = vsel %vm2550_vm11, %v8084_v13, %v1394_v51 }
 0x17e   : > { %v2545_v18 = vpop.permute.xlu0 %2544 }
 0x17f   : > { %v1396_v25 = vpop.permute.xlu1 %1395  ;;  %v2809_v4 = vsel %vm2781_vm10, %v2776_v30, %v2545_v18  ;;  %v3546_v30 = vld [vmem:[#allocation3 + $0xc] sm:$0xf] }
 0x180   : > { %6519 = vmatmul.mubr.msk.bf16.gmra.mrb[24].mxu0 %vm2841_vm2, %v2809_v4  ;;  %v2582_v61 = vsel %vm2550_vm11, %v8115_v7, %v1396_v25  ;;  %vm9684_vm11 = vsmask.f32 256 }
 0x182   : > { %v1523_v11 = vpop.permute.xlu0 %1522 }
 0x183   : > { %v1525_v16 = vpop.permute.xlu1 %1524  ;;  %v2613_v0 = vsel %vm2583_vm12, %v2580_v20, %v1523_v11  ;;  %v3559_v11 = vld [vmem:[#allocation3 + $0x20] sm:$0x1] }
 0x184   : > { %v2615_v40 = vsel %vm2583_vm12, %v2582_v61, %v1525_v16 }
 0x186   : > { %v1635_v24 = vpop.permute.xlu0 %1634 }
 0x187   : > { %v1637_v14 = vpop.permute.xlu1 %1636  ;;  %v2646_v53 = vsel %vm2616_vm13, %v2613_v0, %v1635_v24 }
 0x188   : > { %v2648_v9 = vsel %vm2616_vm13, %v2615_v40, %v1637_v14  ;;  %vm8502_vm13 = vmand %vm3074_vm8, %vm9684_vm11  ;;  %vm5584_vm8 = vcmask 523264   ;;  %vm5660_vm11 = vcmask 588800  }
 0x18a   : > { %v1907_v33 = vpop.permute.xlu0 %1906 }
 0x18b   : > { %v1909_v47 = vpop.permute.xlu1 %1908  ;;  %v2679_v13 = vsel %vm2649_vm14, %v2646_v53, %v1907_v33 }
 0x18c   : > { %v2681_v1 = vsel %vm2649_vm14, %v2648_v9, %v1909_v47 }
 0x18e   : > { %v2035_v37 = vpop.permute.xlu0 %2034 }
 0x18f   : > { %v2037_v36 = vpop.permute.xlu1 %2036  ;;  %v2712_v28 = vsel %vm2682_vm15, %v2679_v13, %v2035_v37 }
 0x190   : > { %v2714_v2 = vsel %vm2682_vm15, %v2681_v1, %v2037_v36  ;;  %vm5518_vm15 = vcmask 392192  }
 0x192   : > { %v2147_v35 = vpop.permute.xlu0 %2146 }
 0x193   : > { %v2149_v19 = vpop.permute.xlu1 %2148  ;;  %v2745_v54 = vsel %vm2715_vm1, %v2712_v28, %v2147_v35 }
 0x194   : > { %v2747_v62 = vsel %vm2715_vm1, %v2714_v2, %v2149_v19  ;;  %v3552_v19 = vld [vmem:[#allocation3 + $0x14] sm:$0x1] }
 0x195   : > { %v6496_v48 = vpop.f32.mrb[0].mxu0 }
 0x196   : > { %v2921_v32 = vadd.f32 %v6496_v48, %v8468_v31  ;;  %v2912_v41 = vpop.f32.mrb[1].mxu0  ;;  %v2419_v3 = vpop.permute.xlu0 %2418 }
 0x197   : > { %v2421_v45 = vpop.permute.xlu1 %2420  ;;  %v2913_v7 = vadd.f32 %v8468_v31, %v2912_v41  ;;  %v6497_v15 = vpop.f32.mrb[2].mxu0  ;;  %v2778_v55 = vsel %vm2748_vm3, %v2745_v54, %v2419_v3 }
 0x198   : > { %v3041_v60 = vmax.f32 %v2921_v32, 0.0  ;;  %v2924_v21 = vadd.f32 %v6497_v15, %v8468_v31  ;;  %v2915_v22 = vpop.f32.mrb[3].mxu0  ;;  %v2780_v6 = vsel %vm2748_vm3, %v2747_v62, %v2421_v45  ;;  %vm5551_vm3 = vcmask 457728  }
 0x199   : > { %v3039_v34 = vmax.f32 %v2913_v7, 0.0  ;;  %v2916_v50 = vadd.f32 %v8468_v31, %v2915_v22 }
 0x19a   : > { %v6418_v56 = vpack.c.bf16 %v3041_v60, %v3041_v60  ;;  %v3042_v27 = vmax.f32 %v2924_v21, 0.0  ;;  %v2547_v44 = vpop.permute.xlu0 %2546 }
 0x19b   : > { %v2549_v46 = vpop.permute.xlu1 %2548  ;;  %v6416_v52 = vpack.c.bf16 %v3039_v34, %v3039_v34  ;;  %v3040_v10 = vmax.f32 %v2916_v50, 0.0  ;;  %v2811_v49 = vsel %vm2781_vm10, %v2778_v55, %v2547_v44 }
 0x19c   : > { %v2813_v8 = vsel %vm2781_vm10, %v2780_v6, %v2549_v46  ;;  %v3241_v57 = vshrl.u32 %v6418_v56, 16  ;;  %v6419_v29 = vpack.c.bf16 %v3042_v27, %v3042_v27  ;;  %6522 = vmatprep.mubr.msk.bf16.mxu0 %vm2841_vm2, %v2811_v49  ;;  %v3244_v12 = vshll.u32 %v6418_v56, 16 }
 0x19d   : > { %v3224_v42 = vshrl.u32 %v6416_v52, 16  ;;  %v6417_v17 = vpack.c.bf16 %v3040_v10, %v3040_v10  ;;  %6523 = vmatmul.mubr.msk.bf16.gmra.mrb[28].mxu0 %vm2841_vm2, %v2813_v8  ;;  %v3227_v26 = vshll.u32 %v6416_v52, 16  ;;  %vm5693_vm2 = vcmask 1043456  }
 0x19e   : > { %v3243_v59 = vrot.slane %v3241_v57, 7  ;;  %v3249_v63 = vshrl.u32 %v6419_v29, 16  ;;  %v3252_v18 = vshll.u32 %v6419_v29, 16 }
 0x19f   : > { %v3226_v58 = vrot.slane %v3224_v42, 7  ;;  %v3232_v5 = vshrl.u32 %v6417_v17, 16  ;;  %v3235_v24 = vshll.u32 %v6417_v17, 16 }
 0x1a0   : > { %v3246_v39 = vor.u32 %v3244_v12, %v3243_v59  ;;  %v3251_v25 = vrot.slane %v3249_v63, 7  ;;  %v3247_v47 = vrot.slane %v3243_v59, 4 }
 0x1a1   : > { %v3229_v4 = vor.u32 %v3227_v26, %v3226_v58  ;;  %v3234_v14 = vrot.slane %v3232_v5, 7  ;;  %v3230_v35 = vrot.slane %v3226_v58, 4 }
 0x1a2   : > { %v3556_v33 = vsel %vm8496_vm9, %v3246_v39, %v3555_v43  ;;  %v3254_v36 = vor.u32 %v3252_v18, %v3251_v25  ;;  %v3256_v37 = vrot.slane %v3251_v25, 4 }
 0x1a3   : > { %3557 = vst [vmem:[#allocation3 + $0x18] sm:$0xf] %v3556_v33  ;;  %v3547_v61 = vsel %vm8496_vm9, %v3229_v4, %v3546_v30  ;;  %v3237_v20 = vor.u32 %v3235_v24, %v3234_v14  ;;  %v3239_v40 = vrot.slane %v3234_v14, 4 }
 0x1a4   : > { %3548 = vst [vmem:[#allocation3 + $0xc] sm:$0xf] %v3547_v61  ;;  %v3255_v48 = vsel %vm7061_vm7, %v3247_v47, %v3254_v36  ;;  %v3560_v0 = vsel %vm8502_vm13, %v3256_v37, %v3559_v11 }
 0x1a5   : > { %3558 = vst.msk [vmem:[#allocation3 + $0x1c] sm:$0xf] %vm3071_vm0, %v3255_v48  ;;  %3561 = vst [vmem:[#allocation3 + $0x20] sm:$0x1] %v3560_v0  ;;  %v3238_v9 = vsel %vm7061_vm7, %v3230_v35, %v3237_v20  ;;  %v3553_v32 = vsel %vm8502_vm13, %v3239_v40, %v3552_v19 }
 0x1a6   : > { %3549 = vst.msk [vmem:[#allocation3 + $0x10] sm:$0xf] %vm3071_vm0, %v3238_v9  ;;  %3554 = vst [vmem:[#allocation3 + $0x14] sm:$0x1] %v3553_v32 }
 0x1aa   : > { %v3726_v45 = vld [vmem:[#allocation3 + $0x18] sm:$0xf] }
 0x1ab   : > { %v3789_v41 = vld [vmem:[#allocation3 + $0x18] sm:$0xf]  ;;  %v3709_v3 = vld [vmem:[#allocation3 + $0xc] sm:$0xe] }
 0x1ac   : > { %v3773_v53 = vld [vmem:[#allocation3 + $0x18] sm:$0xe]  ;;  %v3727_v1 = vld [vmem:[#allocation3 + $0x1c] sm:$0xf]  ;;  %v3724_v21 = vld [vmem:[#allocation3 + $0xc] sm:$0xf] }
 0x1ad   : > { %v3790_v7 = vld [vmem:[#allocation3 + $0x1c] sm:$0xf]  ;;  %v6263_v15 = vcombine.low %v3726_v45, %v3727_v1  ;;  %v6742_v2 = vld [vmem:[#allocation3 + $0x20] ss:$0 sps:$4 sm:$0x11]   ;;  %v6295_v60 = vcombine.low %v3773_v53, %v3727_v1 }
 0x1ae   : > { %v8520_v13 = vcombine.low %v3789_v41, %v3790_v7  ;;  %v8522_v22 = vld [vmem:[#allocation3 + $0x10] sm:$0xf]  ;;  %v4769_v34 = vrot.slane %v6742_v2, 1  ;;  %v8527_v50 = vld [vmem:[#allocation3 + $0x14] ss:$0 sps:$4 sm:$0x11]  }
 0x1af   : > { %v3663_v28 = vld [vmem:[#allocation3 + $0x10] sm:$0xf]  ;;  %4415 = vrot.lane.b32.xlu1 %v6263_v15, %s6882_s27  ;;  %v4768_v62 = vrot.slane %v6295_v60, 1  ;;  %v8530_v56 = vcombine.low %v3724_v21, %v8522_v22  ;;  %v3662_v6 = vld [vmem:[#allocation3 + $0xc] sm:$0xf]  ;;  %v4506_v52 = vshrl.u32 %v6263_v15, 16 }
 0x1b0   : > { %4925 = vrot.lane.b32.xlu0 %v8520_v13, %s6887_s15  ;;  %v6247_v54 = vcombine.low %v3709_v3, %v3663_v28  ;;  %v3837_v27 = vld [vmem:[#allocation3 + $0x18] sm:$0xe]  ;;  %v8532_v46 = vld [vmem:[#allocation3 + $0x20] ss:$0 sps:$4 sm:$0x11]   ;;  %v4257_v8 = vrot.slane %v8527_v50, 1  ;;  %v8543_v63 = vcombine.low %v3662_v6, %v3663_v28 }
 0x1b1   : > { %v4770_v55 = vsel %vm1445_vm6, %v4768_v62, %v4769_v34  ;;  %v6342_v44 = vcombine.low %v3837_v27, %v3790_v7  ;;  %v3664_v57 = vld [vmem:[#allocation3 + $0x18] sm:$0xf]  ;;  %v3665_v29 = vld [vmem:[#allocation3 + $0x1c] sm:$0xf]  ;;  %v5278_v49 = vrot.slane %v8532_v46, 1  ;;  %v4508_v42 = vshll.u32 %v6263_v15, 16 }
 0x1b2   : > { %v4256_v10 = vrot.slane %v6247_v54, 1  ;;  %v4513_v17 = vshll.u32 %v6742_v2, 16  ;;  %v8537_v59 = vcombine.low %v3664_v57, %v3665_v29  ;;  %v3710_v58 = vld [vmem:[#allocation3 + $0x18] sm:$0xe]  ;;  %v3772_v33 = vld [vmem:[#allocation3 + $0xc] sm:$0xe] }
 0x1b3   : > { %4815 = vrot.lane.b32.xlu1 %v4770_v55, %s6888_s16  ;;  %v5277_v43 = vrot.slane %v6342_v44, 1  ;;  %v6750_v26 = vld [vmem:[#allocation3 + $0x20] ss:$0 sps:$4 sm:$0x11]   ;;  %v6500_v5 = vpop.f32.mrb[4].mxu0  ;;  %v4510_v39 = vrot.slane %v4508_v42, 1  ;;  %v6248_v25 = vcombine.low %v3710_v58, %v3665_v29  ;;  %v6294_v32 = vcombine.low %v3772_v33, %v8522_v22 }
 0x1b4   : > { %4413 = vrot.lane.b32.xlu0 %v8530_v56, %s6882_s27  ;;  %v4258_v12 = vsel %vm1445_vm6, %v4256_v10, %v4257_v8  ;;  %v4515_v30 = vrot.slane %v4513_v17, 1  ;;  %v4006_v18 = vshrl.u32 %v8537_v59, 16  ;;  %v2937_v4 = vadd.f32 %v6500_v5, %v8468_v31  ;;  %v2928_v11 = vpop.f32.mrb[5].mxu0  ;;  %v8550_v20 = vld [vmem:[#allocation3 + $0x14] ss:$0 sps:$4 sm:$0x11]  }
 0x1b5   : > { %v5279_v14 = vsel %vm1445_vm6, %v5277_v43, %v5278_v49  ;;  %v4260_v24 = vrot.slane %v6750_v26, 1  ;;  %v4008_v47 = vshll.u32 %v8537_v59, 16  ;;  %v2929_v36 = vadd.f32 %v8468_v31, %v2928_v11  ;;  %v6501_v37 = vpop.f32.mrb[6].mxu0  ;;  %v3569_v49 = vld [vmem:[#allocation3 + $0x30] sm:$0xf] }
 0x1b6   : > { %v4511_v19 = vor.u32 %v4510_v39, %v4506_v52  ;;  %v4259_v35 = vrot.slane %v6248_v25, 1  ;;  %v4013_v61 = vshll.u32 %v6750_v26, 16  ;;  %v3045_v40 = vmax.f32 %v2937_v4, 0.0  ;;  %v2931_v0 = vpop.f32.mrb[7].mxu0  ;;  %v3562_v5 = vld [vmem:[#allocation3 + $0x24] sm:$0xf] }
 0x1b7   : > { %v2940_v48 = vadd.f32 %v6501_v37, %v8468_v31  ;;  %4303 = vrot.lane.b32.xlu1 %v4258_v12, %s6885_s9  ;;  %v4010_v9 = vrot.slane %v4008_v47, 1  ;;  %v3043_v45 = vmax.f32 %v2929_v36, 0.0  ;;  %v2932_v41 = vadd.f32 %v8468_v31, %v2931_v0  ;;  %v3573_v4 = vld [vmem:[#allocation3 + $0x38] sm:$0x1]  ;;  %v3566_v36 = vld [vmem:[#allocation3 + $0x2c] sm:$0x1] }
 0x1b8   : > { %5325 = vrot.lane.b32.xlu0 %v5279_v14, %s6889_s17  ;;  %v4516_v53 = vsel %vm1172_vm4, %v4511_v19, %v4515_v30  ;;  %v4261_v1 = vsel %vm1445_vm6, %v4259_v35, %v4260_v24  ;;  %v6422_v7 = vpack.c.bf16 %v3045_v40, %v3045_v40  ;;  %v4015_v2 = vrot.slane %v4013_v61, 1 }
 0x1b9   : > { %v3046_v3 = vmax.f32 %v2940_v48, 0.0  ;;  %v4011_v15 = vor.u32 %v4010_v9, %v4006_v18  ;;  %v6420_v60 = vpack.c.bf16 %v3043_v45, %v3043_v45  ;;  %v3044_v21 = vmax.f32 %v2932_v41, 0.0 }
 0x1ba   : > { %v4765_v28 = vrot.slane %v6294_v32, 1  ;;  %v4766_v62 = vrot.slane %v8550_v20, 1  ;;  %v3275_v34 = vshrl.u32 %v6422_v7, 16  ;;  %v3278_v54 = vshll.u32 %v6422_v7, 16 }
 0x1bb   : > { %v6423_v6 = vpack.c.bf16 %v3046_v3, %v3046_v3  ;;  %4687 = vrot.lane.b32.xlu1 %v4516_v53, %s6884_s6  ;;  %v4016_v22 = vsel %vm1172_vm4, %v4011_v15, %v4015_v2  ;;  %v3258_v27 = vshrl.u32 %v6420_v60, 16  ;;  %v3261_v52 = vshll.u32 %v6420_v60, 16 }
 0x1bc   : > { %4305 = vrot.lane.b32.xlu0 %v4261_v1, %s6885_s9  ;;  %v6421_v55 = vpack.c.bf16 %v3044_v21, %v3044_v21  ;;  %v4767_v10 = vsel %vm1445_vm6, %v4765_v28, %v4766_v62  ;;  %v3277_v8 = vrot.slane %v3275_v34, 7  ;;  %v3994_v29 = vshrl.u32 %v8543_v63, 16 }
 0x1bd   : > { %v3283_v44 = vshrl.u32 %v6423_v6, 16  ;;  %v3286_v57 = vshll.u32 %v6423_v6, 16  ;;  %v3260_v42 = vrot.slane %v3258_v27, 7  ;;  %v3996_v43 = vshll.u32 %v8543_v63, 16 }
 0x1be   : > { %v3266_v17 = vshrl.u32 %v6421_v55, 16  ;;  %v3269_v12 = vshll.u32 %v6421_v55, 16  ;;  %v3280_v58 = vor.u32 %v3278_v54, %v3277_v8  ;;  %v3281_v26 = vrot.slane %v3277_v8, 4 }
 0x1bf   : > { %v3285_v39 = vrot.slane %v3283_v44, 7  ;;  %4177 = vrot.lane.b32.xlu1 %v4016_v22, %s6879_s24  ;;  %v4001_v30 = vshll.u32 %v8527_v50, 16  ;;  %v3263_v25 = vor.u32 %v3261_v52, %v3260_v42  ;;  %v3264_v18 = vrot.slane %v3260_v42, 4 }
 0x1c0   : > { %4813 = vrot.lane.b32.xlu0 %v4767_v10, %s6888_s16  ;;  %v3268_v11 = vrot.slane %v3266_v17, 7  ;;  %v3998_v14 = vrot.slane %v3996_v43, 1  ;;  %v3570_v24 = vsel %vm8496_vm9, %v3280_v58, %v3569_v49  ;;  %v5008_v0 = vshll.u32 %v8520_v13, 16 }
 0x1c1   : > { %v3288_v47 = vor.u32 %v3286_v57, %v3285_v39  ;;  %v3290_v33 = vrot.slane %v3285_v39, 4  ;;  %v4003_v37 = vrot.slane %v4001_v30, 1  ;;  %3571 = vst [vmem:[#allocation3 + $0x30] sm:$0xf] %v3570_v24  ;;  %v3563_v19 = vsel %vm8496_vm9, %v3263_v25, %v3562_v5 }
 0x1c2   : > { %v3271_v35 = vor.u32 %v3269_v12, %v3268_v11  ;;  %v3273_v61 = vrot.slane %v3268_v11, 4  ;;  %v3999_v40 = vor.u32 %v3998_v14, %v3994_v29  ;;  %3564 = vst [vmem:[#allocation3 + $0x24] sm:$0xf] %v3563_v19  ;;  %v5013_v41 = vshll.u32 %v8532_v46, 16 }
 0x1c3   : > { %v3289_v50 = vsel %vm7061_vm7, %v3281_v26, %v3288_v47  ;;  %v3574_v48 = vsel %vm8502_vm13, %v3290_v33, %v3573_v4  ;;  %v5006_v53 = vshrl.u32 %v8520_v13, 16  ;;  %v5010_v1 = vrot.slane %v5008_v0, 1 }
 0x1c4   : > { %3572 = vst.msk [vmem:[#allocation3 + $0x34] sm:$0xf] %vm3071_vm0, %v3289_v50  ;;  %3575 = vst [vmem:[#allocation3 + $0x38] sm:$0x1] %v3574_v48  ;;  %v3272_v9 = vsel %vm7061_vm7, %v3264_v18, %v3271_v35  ;;  %v3567_v32 = vsel %vm8502_vm13, %v3273_v61, %v3566_v36  ;;  %v4004_v45 = vsel %vm1172_vm4, %v3999_v40, %v4003_v37  ;;  %v4496_v7 = vshll.u32 %v8530_v56, 16  ;;  %v6813_v61 = vld [vmem:[%s9669_s3] sm:$0xff]  }
 0x1c5   : > { %3565 = vst.msk [vmem:[#allocation3 + $0x28] sm:$0xf] %vm3071_vm0, %v3272_v9  ;;  %3568 = vst [vmem:[#allocation3 + $0x2c] sm:$0x1] %v3567_v32  ;;  %4175 = vrot.lane.b32.xlu1 %v4004_v45, %s6879_s24  ;;  %v4501_v3 = vshll.u32 %v8550_v20, 16  ;;  %v5011_v15 = vor.u32 %v5010_v1, %v5006_v53  ;;  %v5015_v2 = vrot.slane %v5013_v41, 1  ;;  %6526 = vmatprep.subr.bf16.mxu1 %v6813_v61 }
 0x1c6   : > { %v4494_v60 = vshrl.u32 %v8530_v56, 16  ;;  %v4498_v21 = vrot.slane %v4496_v7, 1  ;;  %6527 = vmatpush3.bf16.msra.mxu1 %v6813_v61 }
 0x1c7   : > { %v5016_v28 = vsel %vm1172_vm4, %v5011_v15, %v5015_v2  ;;  %v4503_v62 = vrot.slane %v4501_v3, 1 }
 0x1c8   : > { %v4499_v46 = vor.u32 %v4498_v21, %v4494_v60  ;;  %5197 = vrot.lane.b32.xlu0 %v5016_v28, %s6890_s21  ;;  %v3730_v34 = vld [vmem:[#allocation3 + $0x30] sm:$0xf] }
 0x1c9   : > { %v3775_v54 = vld [vmem:[#allocation3 + $0x30] sm:$0xe]  ;;  %v3791_v8 = vld [vmem:[#allocation3 + $0x24] sm:$0xf] }
 0x1ca   : > { %v3839_v13 = vld [vmem:[#allocation3 + $0x30] sm:$0xe]  ;;  %v4504_v56 = vsel %vm1172_vm4, %v4499_v46, %v4503_v62  ;;  %v3728_v49 = vld [vmem:[#allocation3 + $0x24] sm:$0xf] }
 0x1cb   : > { %v3731_v6 = vld [vmem:[#allocation3 + $0x34] sm:$0xf]  ;;  %v3793_v20 = vld [vmem:[#allocation3 + $0x30] sm:$0xf]  ;;  %v3711_v5 = vld [vmem:[#allocation3 + $0x24] sm:$0xe] }
 0x1cc   : > { %v3794_v22 = vld [vmem:[#allocation3 + $0x34] sm:$0xf]  ;;  %v8593_v27 = vcombine.low %v3730_v34, %v3731_v6  ;;  %v3792_v52 = vld [vmem:[#allocation3 + $0x28] sm:$0xf]  ;;  %v6297_v55 = vcombine.low %v3775_v54, %v3731_v6  ;;  %4685 = vrot.lane.b32.xlu0 %v4504_v56, %s6884_s6  ;;  %v3666_v18 = vld [vmem:[#allocation3 + $0x24] sm:$0xf] }
 0x1cd   : > { %v6344_v10 = vcombine.low %v3839_v13, %v3794_v22  ;;  %v6757_v44 = vld [vmem:[#allocation3 + $0x38] ss:$0 sps:$4 sm:$0x11]   ;;  %v8601_v29 = vcombine.low %v3793_v20, %v3794_v22  ;;  %v8603_v42 = vld [vmem:[#allocation3 + $0x28] sm:$0xf]  ;;  %v8606_v39 = vcombine.low %v3791_v8, %v3792_v52  ;;  %v6814_v13 = vld [vmem:[%s9669_s3 + $0x8] sm:$0xff]  }
 0x1ce   : > { %v8596_v57 = vld [vmem:[#allocation3 + $0x38] ss:$0 sps:$4 sm:$0x11]   ;;  %4419 = vrot.lane.b32.xlu1 %v8593_v27, %s6882_s27  ;;  %v3667_v17 = vld [vmem:[#allocation3 + $0x28] sm:$0xf]  ;;  %v4774_v12 = vrot.slane %v6297_v55, 1  ;;  %v8612_v14 = vcombine.low %v3728_v49, %v8603_v42  ;;  %6528 = vmatprep.subr.bf16.mxu1 %v6814_v13 }
 0x1cf   : > { %v4775_v43 = vrot.slane %v6757_v44, 1  ;;  %v5283_v58 = vrot.slane %v6344_v10, 1  ;;  %v5284_v26 = vrot.slane %v8596_v57, 1  ;;  %v8608_v30 = vld [vmem:[#allocation3 + $0x2c] ss:$0 sps:$4 sm:$0x11]   ;;  %v6249_v25 = vcombine.low %v3711_v5, %v3667_v17  ;;  %6529 = vmatpush3.bf16.msra.mxu1 %v6814_v13 }
 0x1d0   : > { %v3668_v4 = vld [vmem:[#allocation3 + $0x30] sm:$0xf]  ;;  %v4530_v11 = vshrl.u32 %v8593_v27, 16  ;;  %v3669_v24 = vld [vmem:[#allocation3 + $0x34] sm:$0xf]  ;;  %4929 = vrot.lane.b32.xlu0 %v8601_v29, %s6887_s15  ;;  %v4263_v36 = vrot.slane %v8608_v30, 1  ;;  %v8625_v50 = vcombine.low %v3666_v18, %v3667_v17 }
 0x1d1   : > { %v3712_v47 = vld [vmem:[#allocation3 + $0x30] sm:$0xe]  ;;  %v4262_v33 = vrot.slane %v6249_v25, 1  ;;  %v8619_v37 = vcombine.low %v3668_v4, %v3669_v24  ;;  %v6764_v19 = vld [vmem:[#allocation3 + $0x38] ss:$0 sps:$4 sm:$0x11]   ;;  %v4776_v40 = vsel %vm1445_vm6, %v4774_v12, %v4775_v43  ;;  %v5285_v45 = vsel %vm1445_vm6, %v5283_v58, %v5284_v26 }
 0x1d2   : > { %4927 = vrot.lane.b32.xlu1 %v8606_v39, %s6887_s15  ;;  %v6250_v35 = vcombine.low %v3712_v47, %v3669_v24  ;;  %v4532_v48 = vshll.u32 %v8593_v27, 16  ;;  %v4537_v0 = vshll.u32 %v6757_v44, 16  ;;  %v3838_v9 = vld [vmem:[#allocation3 + $0x24] sm:$0xe]  ;;  %v4266_v53 = vrot.slane %v6764_v19, 1  ;;  %v6817_v44 = vld [vmem:[%s9669_s3 + $0x10] sm:$0xff]  }
 0x1d3   : > { %v6504_v32 = vpop.f32.mrb[8].mxu0  ;;  %v8629_v1 = vld [vmem:[#allocation3 + $0x2c] ss:$0 sps:$4 sm:$0x11]   ;;  %v6343_v7 = vcombine.low %v3838_v9, %v3792_v52  ;;  %v4264_v2 = vsel %vm1445_vm6, %v4262_v33, %v4263_v36  ;;  %v4030_v54 = vshrl.u32 %v8619_v37, 16  ;;  %v4032_v52 = vshll.u32 %v8619_v37, 16  ;;  %6530 = vmatprep.subr.bf16.mxu1 %v6817_v44 }
 0x1d4   : > { %v4265_v41 = vrot.slane %v6250_v35, 1  ;;  %v2953_v3 = vadd.f32 %v6504_v32, %v8468_v31  ;;  %v2944_v15 = vpop.f32.mrb[9].mxu0  ;;  %v4534_v60 = vrot.slane %v4532_v48, 1  ;;  %v4539_v21 = vrot.slane %v4537_v0, 1  ;;  %4417 = vrot.lane.b32.xlu0 %v8612_v14, %s6882_s27  ;;  %v3774_v58 = vld [vmem:[#allocation3 + $0x24] sm:$0xe]  ;;  %6531 = vmatpush3.bf16.msra.mxu1 %v6817_v44 }
 0x1d5   : > { %v2945_v28 = vadd.f32 %v8468_v31, %v2944_v15  ;;  %v6505_v46 = vpop.f32.mrb[10].mxu0  ;;  %v5280_v62 = vrot.slane %v6343_v7, 1  ;;  %v5281_v34 = vrot.slane %v8629_v1, 1  ;;  %v4037_v8 = vshll.u32 %v6764_v19, 16  ;;  %v6820_v36 = vld [vmem:[%s9669_s3 + $0x18] sm:$0xff]  }
 0x1d6   : > { %4819 = vrot.lane.b32.xlu1 %v4776_v40, %s6888_s16  ;;  %v3049_v6 = vmax.f32 %v2953_v3, 0.0  ;;  %v2956_v22 = vadd.f32 %v6505_v46, %v8468_v31  ;;  %v2947_v27 = vpop.f32.mrb[11].mxu0  ;;  %v4535_v20 = vor.u32 %v4534_v60, %v4530_v11  ;;  %v4267_v56 = vsel %vm1445_vm6, %v4265_v41, %v4266_v53  ;;  %v8654_v33 = vld [vmem:[#allocation3 + $0x2c] ss:$0 sps:$4 sm:$0x11]   ;;  %6532 = vmatprep.subr.bf16.mxu1 %v6820_v36 }
 0x1d7   : > { %v3047_v55 = vmax.f32 %v2945_v28, 0.0  ;;  %v2948_v10 = vadd.f32 %v8468_v31, %v2947_v27  ;;  %v5282_v12 = vsel %vm1445_vm6, %v5280_v62, %v5281_v34  ;;  %v4034_v43 = vrot.slane %v4032_v52, 1  ;;  %v3587_v62 = vld [vmem:[#allocation3 + $0x50] sm:$0x1]  ;;  %v3580_v27 = vld [vmem:[#allocation3 + $0x44] sm:$0x1] }
 0x1d8   : > { %v6426_v49 = vpack.c.bf16 %v3049_v6, %v3049_v6  ;;  %v3050_v17 = vmax.f32 %v2956_v22, 0.0  ;;  %5329 = vrot.lane.b32.xlu0 %v5285_v45, %s6889_s17  ;;  %v4540_v25 = vsel %vm1172_vm4, %v4535_v20, %v4539_v21  ;;  %v6296_v18 = vcombine.low %v3774_v58, %v8603_v42  ;;  %v3583_v42 = vld [vmem:[#allocation3 + $0x48] sm:$0xf]  ;;  %6533 = vmatpush3.bf16.msra.mxu1 %v6820_v36 }
 0x1d9   : > { %v6424_v26 = vpack.c.bf16 %v3047_v55, %v3047_v55  ;;  %v3048_v5 = vmax.f32 %v2948_v10, 0.0  ;;  %v4035_v24 = vor.u32 %v4034_v43, %v4030_v54  ;;  %v4039_v47 = vrot.slane %v4037_v8, 1 }
 0x1da   : > { %4307 = vrot.lane.b32.xlu1 %v4264_v2, %s6885_s9  ;;  %v3309_v4 = vshrl.u32 %v6426_v49, 16  ;;  %v6427_v11 = vpack.c.bf16 %v3050_v17, %v3050_v17  ;;  %v3312_v19 = vshll.u32 %v6426_v49, 16  ;;  %v4771_v32 = vrot.slane %v6296_v18, 1  ;;  %v3576_v2 = vld [vmem:[#allocation3 + $0x3c] sm:$0xf] }
 0x1db   : > { %v3292_v35 = vshrl.u32 %v6424_v26, 16  ;;  %v3295_v61 = vshll.u32 %v6424_v26, 16  ;;  %v6425_v40 = vpack.c.bf16 %v3048_v5, %v3048_v5  ;;  %v4040_v7 = vsel %vm1172_vm4, %v4035_v24, %v4039_v47 }
 0x1dc   : > { %v3311_v48 = vrot.slane %v3309_v4, 7  ;;  %v3317_v0 = vshrl.u32 %v6427_v11, 16  ;;  %v3320_v9 = vshll.u32 %v6427_v11, 16  ;;  %4309 = vrot.lane.b32.xlu0 %v4267_v56, %s6885_s9  ;;  %v4772_v21 = vrot.slane %v8654_v33, 1 }
 0x1dd   : > { %v3294_v45 = vrot.slane %v3292_v35, 7  ;;  %v3300_v41 = vshrl.u32 %v6425_v40, 16  ;;  %v3303_v53 = vshll.u32 %v6425_v40, 16  ;;  %v5018_v54 = vshrl.u32 %v8606_v39, 16 }
 0x1de   : > { %4691 = vrot.lane.b32.xlu1 %v4540_v25, %s6884_s6  ;;  %v3314_v3 = vor.u32 %v3312_v19, %v3311_v48  ;;  %v3315_v15 = vrot.slane %v3311_v48, 4  ;;  %v3319_v60 = vrot.slane %v3317_v0, 7  ;;  %v5020_v20 = vshll.u32 %v8606_v39, 16 }
 0x1df   : > { %v3297_v28 = vor.u32 %v3295_v61, %v3294_v45  ;;  %v3298_v46 = vrot.slane %v3294_v45, 4  ;;  %v3302_v34 = vrot.slane %v3300_v41, 7  ;;  %v5025_v56 = vshll.u32 %v8629_v1, 16 }
 0x1e0   : > { %v3584_v13 = vsel %vm8496_vm9, %v3314_v3, %v3583_v42  ;;  %v3322_v6 = vor.u32 %v3320_v9, %v3319_v60  ;;  %v3324_v22 = vrot.slane %v3319_v60, 4  ;;  %5327 = vrot.lane.b32.xlu0 %v5282_v12, %s6889_s17  ;;  %v4773_v44 = vsel %vm1445_vm6, %v4771_v32, %v4772_v21 }
 0x1e1   : > { %3585 = vst [vmem:[#allocation3 + $0x48] sm:$0xf] %v3584_v13  ;;  %v3577_v52 = vsel %vm8496_vm9, %v3297_v28, %v3576_v2  ;;  %v3305_v55 = vor.u32 %v3303_v53, %v3302_v34  ;;  %v3307_v10 = vrot.slane %v3302_v34, 4  ;;  %v5022_v49 = vrot.slane %v5020_v20, 1 }
 0x1e2   : > { %4181 = vrot.lane.b32.xlu1 %v4040_v7, %s6879_s24  ;;  %3578 = vst [vmem:[#allocation3 + $0x3c] sm:$0xf] %v3577_v52  ;;  %v3323_v8 = vsel %vm7061_vm7, %v3315_v15, %v3322_v6  ;;  %v3588_v39 = vsel %vm8502_vm13, %v3324_v22, %v3587_v62  ;;  %v5030_v1 = vshrl.u32 %v8601_v29, 16  ;;  %v5032_v43 = vshll.u32 %v8601_v29, 16  ;;  %v6824_v29 = vld [vmem:[%s9669_s3 + $0x20] ss:$0 sps:$4 sm:$0xff]  }
 0x1e3   : > { %3586 = vst.msk [vmem:[#allocation3 + $0x4c] sm:$0xf] %vm3071_vm0, %v3323_v8  ;;  %3589 = vst [vmem:[#allocation3 + $0x50] sm:$0x1] %v3588_v39  ;;  %v3306_v17 = vsel %vm7061_vm7, %v3298_v46, %v3305_v55  ;;  %v3581_v12 = vsel %vm8502_vm13, %v3307_v10, %v3580_v27  ;;  %v5023_v58 = vor.u32 %v5022_v49, %v5018_v54  ;;  %v5027_v26 = vrot.slane %v5025_v56, 1 }
 0x1e4   : > { %3579 = vst.msk [vmem:[#allocation3 + $0x40] sm:$0xf] %vm3071_vm0, %v3306_v17  ;;  %3582 = vst [vmem:[#allocation3 + $0x44] sm:$0x1] %v3581_v12  ;;  %v5037_v5 = vshll.u32 %v8596_v57, 16  ;;  %v4020_v25 = vshll.u32 %v8625_v50, 16  ;;  %4817 = vrot.lane.b32.xlu0 %v4773_v44, %s6888_s16  ;;  %6569 = vmatprep.subr.msk.bf16.mxu1 %vm5693_vm2, %v6824_v29 }
 0x1e5   : > { %v5034_v18 = vrot.slane %v5032_v43, 1  ;;  %v4018_v4 = vshrl.u32 %v8625_v50, 16  ;;  %v4025_v11 = vshll.u32 %v8608_v30, 16  ;;  %v4520_v24 = vshll.u32 %v8612_v14, 16 }
 0x1e6   : > { %v5028_v47 = vsel %vm1172_vm4, %v5023_v58, %v5027_v26  ;;  %v4022_v36 = vrot.slane %v4020_v25, 1  ;;  %v4518_v57 = vshrl.u32 %v8612_v14, 16  ;;  %v4525_v19 = vshll.u32 %v8654_v33, 16 }
 0x1e7   : > { %5199 = vrot.lane.b32.xlu1 %v5028_v47, %s6890_s21  ;;  %v5035_v35 = vor.u32 %v5034_v18, %v5030_v1  ;;  %v5039_v61 = vrot.slane %v5037_v5, 1  ;;  %v4522_v40 = vrot.slane %v4520_v24, 1  ;;  %v4027_v48 = vrot.slane %v4025_v11, 1 }
 0x1e8   : > { %v4023_v30 = vor.u32 %v4022_v36, %v4018_v4  ;;  %v5695_v0 = vsel %vm5693_vm2, %v6824_v29, 0  ;;  %v4527_v42 = vrot.slane %v4525_v19, 1  ;;  %v3734_v45 = vld [vmem:[#allocation3 + $0x48] sm:$0xf] }
 0x1e9   : > { %v5040_v9 = vsel %vm1172_vm4, %v5035_v35, %v5039_v61  ;;  %v4523_v32 = vor.u32 %v4522_v40, %v4518_v57  ;;  %v3777_v41 = vld [vmem:[#allocation3 + $0x48] sm:$0xe]  ;;  %6535 = vmatpush3.bf16.msra.mxu1 %v5695_v0  ;;  %v3795_v15 = vld [vmem:[#allocation3 + $0x3c] sm:$0xf] }
 0x1ea   : > { %5201 = vrot.lane.b32.xlu0 %v5040_v9, %s6890_s21  ;;  %v4028_v14 = vsel %vm1172_vm4, %v4023_v30, %v4027_v48  ;;  %v3735_v33 = vld [vmem:[#allocation3 + $0x4c] sm:$0xf]  ;;  %v3797_v3 = vld [vmem:[#allocation3 + $0x48] sm:$0xf]  ;;  %v3732_v20 = vld [vmem:[#allocation3 + $0x3c] sm:$0xf] }
 0x1eb   : > { %v3798_v53 = vld [vmem:[#allocation3 + $0x4c] sm:$0xf]  ;;  %4179 = vrot.lane.b32.xlu1 %v4028_v14, %s6879_s24  ;;  %v6267_v7 = vcombine.low %v3734_v45, %v3735_v33  ;;  %v8702_v2 = vld [vmem:[#allocation3 + $0x40] sm:$0xf]  ;;  %v6299_v60 = vcombine.low %v3777_v41, %v3735_v33  ;;  %v3841_v46 = vld [vmem:[#allocation3 + $0x48] sm:$0xe]  ;;  %v4528_v62 = vsel %vm1172_vm4, %v4523_v32, %v4527_v42 }
 0x1ec   : > { %v8704_v21 = vld [vmem:[#allocation3 + $0x40] sm:$0xf]  ;;  %v6772_v28 = vld [vmem:[#allocation3 + $0x50] ss:$0 sps:$4 sm:$0x11]   ;;  %v6346_v13 = vcombine.low %v3841_v46, %v3798_v53  ;;  %v8710_v22 = vcombine.low %v3797_v3, %v3798_v53  ;;  %v8713_v27 = vcombine.low %v3795_v15, %v8702_v2 }
 0x1ed   : > { %v4780_v34 = vrot.slane %v6299_v60, 1  ;;  %v8707_v54 = vld [vmem:[#allocation3 + $0x50] ss:$0 sps:$4 sm:$0x11]   ;;  %v3671_v6 = vld [vmem:[#allocation3 + $0x40] sm:$0xf]  ;;  %v8720_v43 = vcombine.low %v3732_v20, %v8704_v21 }
 0x1ee   : > { %4689 = vrot.lane.b32.xlu0 %v4528_v62, %s6884_s6  ;;  %v4781_v52 = vrot.slane %v6772_v28, 1  ;;  %v3713_v55 = vld [vmem:[#allocation3 + $0x3c] sm:$0xe]  ;;  %v4554_v10 = vshrl.u32 %v6267_v7, 16  ;;  %v5289_v56 = vrot.slane %v6346_v13, 1  ;;  %v5290_v8 = vrot.slane %v8707_v54, 1 }
 0x1ef   : > { %4423 = vrot.lane.b32.xlu1 %v6267_v7, %s6882_s27  ;;  %v8717_v39 = vld [vmem:[#allocation3 + $0x44] ss:$0 sps:$4 sm:$0x11]   ;;  %v6251_v44 = vcombine.low %v3713_v55, %v3671_v6  ;;  %v4556_v49 = vshll.u32 %v6267_v7, 16  ;;  %v3670_v17 = vld [vmem:[#allocation3 + $0x3c] sm:$0xf] }
 0x1f0   : > { %v3672_v12 = vld [vmem:[#allocation3 + $0x48] sm:$0xf]  ;;  %v3673_v1 = vld [vmem:[#allocation3 + $0x4c] sm:$0xf]  ;;  %v4269_v26 = vrot.slane %v8717_v39, 1  ;;  %v4561_v24 = vshll.u32 %v6772_v28, 16  ;;  %v4782_v47 = vsel %vm1445_vm6, %v4780_v34, %v4781_v52  ;;  %v5291_v36 = vsel %vm1445_vm6, %v5289_v56, %v5290_v8 }
 0x1f1   : > { %v4268_v58 = vrot.slane %v6251_v44, 1  ;;  %v3714_v5 = vld [vmem:[#allocation3 + $0x48] sm:$0xe]  ;;  %v8725_v25 = vcombine.low %v3672_v12, %v3673_v1  ;;  %v6779_v18 = vld [vmem:[#allocation3 + $0x50] ss:$0 sps:$4 sm:$0x11]   ;;  %v8731_v57 = vcombine.low %v3670_v17, %v3671_v6 }
 0x1f2   : > { %4933 = vrot.lane.b32.xlu0 %v8710_v22, %s6887_s15  ;;  %v6252_v4 = vcombine.low %v3714_v5, %v3673_v1  ;;  %v4558_v11 = vrot.slane %v4556_v49, 1  ;;  %v3840_v19 = vld [vmem:[#allocation3 + $0x3c] sm:$0xe]  ;;  %v5042_v35 = vshrl.u32 %v8713_v27, 16  ;;  %v4272_v0 = vrot.slane %v6779_v18, 1 }
 0x1f3   : > { %4931 = vrot.lane.b32.xlu1 %v8713_v27, %s6887_s15  ;;  %v6508_v29 = vpop.f32.mrb[12].mxu0  ;;  %v4270_v30 = vsel %vm1445_vm6, %v4268_v58, %v4269_v26  ;;  %v8736_v9 = vld [vmem:[#allocation3 + $0x44] ss:$0 sps:$4 sm:$0x11]   ;;  %v4563_v41 = vrot.slane %v4561_v24, 1  ;;  %v6345_v14 = vcombine.low %v3840_v19, %v8702_v2  ;;  %v4054_v15 = vshrl.u32 %v8725_v25, 16 }
 0x1f4   : > { %v2969_v61 = vadd.f32 %v6508_v29, %v8468_v31  ;;  %v2960_v40 = vpop.f32.mrb[13].mxu0  ;;  %v4271_v48 = vrot.slane %v6252_v4, 1  ;;  %v4559_v45 = vor.u32 %v4558_v11, %v4554_v10  ;;  %v5287_v3 = vrot.slane %v8736_v9, 1  ;;  %v3776_v56 = vld [vmem:[#allocation3 + $0x3c] sm:$0xe] }
 0x1f5   : > { %v2961_v32 = vadd.f32 %v8468_v31, %v2960_v40  ;;  %v6509_v42 = vpop.f32.mrb[14].mxu0  ;;  %v5286_v62 = vrot.slane %v6345_v14, 1  ;;  %v4056_v13 = vshll.u32 %v8725_v25, 16  ;;  %v4061_v6 = vshll.u32 %v6779_v18, 16  ;;  %v3597_v24 = vld [vmem:[#allocation3 + $0x60] sm:$0xf] }
 0x1f6   : > { %4421 = vrot.lane.b32.xlu0 %v8720_v43, %s6882_s27  ;;  %v3053_v33 = vmax.f32 %v2969_v61, 0.0  ;;  %v2972_v53 = vadd.f32 %v6509_v42, %v8468_v31  ;;  %v2963_v7 = vpop.f32.mrb[15].mxu0  ;;  %v4273_v46 = vsel %vm1445_vm6, %v4271_v48, %v4272_v0  ;;  %v4564_v55 = vsel %vm1172_vm4, %v4559_v45, %v4563_v41  ;;  %v8754_v26 = vld [vmem:[#allocation3 + $0x44] ss:$0 sps:$4 sm:$0x11]  }
 0x1f7   : > { %v3051_v60 = vmax.f32 %v2961_v32, 0.0  ;;  %4823 = vrot.lane.b32.xlu1 %v4782_v47, %s6888_s16  ;;  %v2964_v28 = vadd.f32 %v8468_v31, %v2963_v7  ;;  %v5288_v10 = vsel %vm1445_vm6, %v5286_v62, %v5287_v3  ;;  %v4058_v31 = vrot.slane %v4056_v13, 1  ;;  %v3594_v7 = vld [vmem:[#allocation3 + $0x5c] sm:$0x1] }
 0x1f8   : > { %v6430_v2 = vpack.c.bf16 %v3053_v33, %v3053_v33  ;;  %v3054_v34 = vmax.f32 %v2972_v53, 0.0  ;;  %v6298_v49 = vcombine.low %v3776_v56, %v8704_v21  ;;  %v4063_v11 = vrot.slane %v4061_v6, 1  ;;  %v3590_v21 = vld [vmem:[#allocation3 + $0x54] sm:$0xf] }
 0x1f9   : > { %v6428_v20 = vpack.c.bf16 %v3051_v60, %v3051_v60  ;;  %v3052_v52 = vmax.f32 %v2964_v28, 0.0  ;;  %v4059_v4 = vor.u32 %v4058_v31, %v4054_v15  ;;  %v4778_v41 = vrot.slane %v8754_v26, 1 }
 0x1fa   : > { %v3343_v8 = vshrl.u32 %v6430_v2, 16  ;;  %v6431_v44 = vpack.c.bf16 %v3054_v34, %v3054_v34  ;;  %5333 = vrot.lane.b32.xlu0 %v5291_v36, %s6889_s17  ;;  %v3346_v17 = vshll.u32 %v6430_v2, 16  ;;  %v4777_v0 = vrot.slane %v6298_v49, 1 }
 0x1fb   : > { %v3326_v12 = vshrl.u32 %v6428_v20, 16  ;;  %v3329_v1 = vshll.u32 %v6428_v20, 16  ;;  %v6429_v58 = vpack.c.bf16 %v3052_v52, %v3052_v52  ;;  %4311 = vrot.lane.b32.xlu1 %v4270_v30, %s6885_s9  ;;  %v3601_v30 = vld [vmem:[#allocation3 + $0x68] sm:$0x1]  ;;  %v4064_v45 = vsel %vm1172_vm4, %v4059_v4, %v4063_v11 }
 0x1fc   : > { %v3345_v5 = vrot.slane %v3343_v8, 7  ;;  %v3351_v18 = vshrl.u32 %v6431_v44, 16  ;;  %v3354_v47 = vshll.u32 %v6431_v44, 16  ;;  %v5044_v3 = vshll.u32 %v8713_v27, 16 }
 0x1fd   : > { %v3328_v29 = vrot.slane %v3326_v12, 7  ;;  %v3334_v19 = vshrl.u32 %v6429_v58, 16  ;;  %v3337_v36 = vshll.u32 %v6429_v58, 16  ;;  %v5049_v13 = vshll.u32 %v8736_v9, 16 }
 0x1fe   : > { %v3348_v61 = vor.u32 %v3346_v17, %v3345_v5  ;;  %v3349_v40 = vrot.slane %v3345_v5, 4  ;;  %v3353_v48 = vrot.slane %v3351_v18, 7  ;;  %4313 = vrot.lane.b32.xlu0 %v4273_v46, %s6885_s9  ;;  %v5046_v34 = vrot.slane %v5044_v3, 1 }
 0x1ff   : > { %v3331_v32 = vor.u32 %v3329_v1, %v3328_v29  ;;  %v3336_v42 = vrot.slane %v3334_v19, 7  ;;  %4695 = vrot.lane.b32.xlu1 %v4564_v55, %s6884_s6  ;;  %v3332_v15 = vrot.slane %v3328_v29, 4  ;;  %v5056_v52 = vshll.u32 %v8710_v22, 16 }
 0x200   : > { %v3598_v14 = vsel %vm8496_vm9, %v3348_v61, %v3597_v24  ;;  %v3356_v33 = vor.u32 %v3354_v47, %v3353_v48  ;;  %v3358_v53 = vrot.slane %v3353_v48, 4  ;;  %v4779_v55 = vsel %vm1445_vm6, %v4777_v0, %v4778_v41 }
 0x201   : > { %3599 = vst [vmem:[#allocation3 + $0x60] sm:$0xf] %v3598_v14  ;;  %v3591_v60 = vsel %vm8496_vm9, %v3331_v32, %v3590_v21  ;;  %v3339_v28 = vor.u32 %v3337_v36, %v3336_v42  ;;  %v3341_v46 = vrot.slane %v3336_v42, 4  ;;  %v5047_v9 = vor.u32 %v5046_v34, %v5042_v35 }
 0x202   : > { %3592 = vst [vmem:[#allocation3 + $0x54] sm:$0xf] %v3591_v60  ;;  %v3357_v62 = vsel %vm7061_vm7, %v3349_v40, %v3356_v33  ;;  %v3602_v2 = vsel %vm8502_vm13, %v3358_v53, %v3601_v30  ;;  %5331 = vrot.lane.b32.xlu0 %v5288_v10, %s6889_s17  ;;  %v5051_v10 = vrot.slane %v5049_v13, 1  ;;  %v5061_v56 = vshll.u32 %v8707_v54, 16 }
 0x203   : > { %3600 = vst.msk [vmem:[#allocation3 + $0x64] sm:$0xf] %vm3071_vm0, %v3357_v62  ;;  %3603 = vst [vmem:[#allocation3 + $0x68] sm:$0x1] %v3602_v2  ;;  %v3340_v6 = vsel %vm7061_vm7, %v3332_v15, %v3339_v28  ;;  %v3595_v20 = vsel %vm8502_vm13, %v3341_v46, %v3594_v7  ;;  %4185 = vrot.lane.b32.xlu1 %v4064_v45, %s6879_s24  ;;  %v5054_v8 = vshrl.u32 %v8710_v22, 16  ;;  %v5058_v44 = vrot.slane %v5056_v52, 1 }
 0x204   : > { %3593 = vst.msk [vmem:[#allocation3 + $0x58] sm:$0xf] %vm3071_vm0, %v3340_v6  ;;  %3596 = vst [vmem:[#allocation3 + $0x5c] sm:$0x1] %v3595_v20  ;;  %v4044_v31 = vshll.u32 %v8731_v57, 16  ;;  %v4049_v49 = vshll.u32 %v8717_v39, 16  ;;  %v5052_v17 = vsel %vm1172_vm4, %v5047_v9, %v5051_v10 }
 0x205   : > { %v4042_v12 = vshrl.u32 %v8731_v57, 16  ;;  %v4544_v1 = vshll.u32 %v8720_v43, 16  ;;  %v5059_v27 = vor.u32 %v5058_v44, %v5054_v8  ;;  %v5063_v35 = vrot.slane %v5061_v56, 1 }
 0x206   : > { %4821 = vrot.lane.b32.xlu0 %v4779_v55, %s6888_s16  ;;  %v4046_v54 = vrot.slane %v4044_v31, 1  ;;  %v4549_v22 = vshll.u32 %v8754_v26, 16  ;;  %v4542_v58 = vshrl.u32 %v8720_v43, 16  ;;  %v4051_v4 = vrot.slane %v4049_v49, 1 }
 0x207   : > { %5203 = vrot.lane.b32.xlu1 %v5052_v17, %s6890_s21  ;;  %v4546_v5 = vrot.slane %v4544_v1, 1  ;;  %v5064_v39 = vsel %vm1172_vm4, %v5059_v27, %v5063_v35  ;;  %v8826_v1 = vld [vmem:[%s9668_s2] ss:$0 sm:$0xff] }
 0x208   : > { %v4047_v18 = vor.u32 %v4046_v54, %v4042_v12  ;;  %v3738_v11 = vld [vmem:[#allocation3 + $0x60] sm:$0xf]  ;;  %v4551_v61 = vrot.slane %v4549_v22, 1 }
 0x209   : > { %v3779_v24 = vld [vmem:[#allocation3 + $0x60] sm:$0xe]  ;;  %v4547_v29 = vor.u32 %v4546_v5, %v4542_v58  ;;  %v3799_v53 = vld [vmem:[#allocation3 + $0x54] sm:$0xf] }
 0x20a   : > { %5205 = vrot.lane.b32.xlu0 %v5064_v39, %s6890_s21  ;;  %v3739_v47 = vld [vmem:[#allocation3 + $0x64] sm:$0xf]  ;;  %v4052_v36 = vsel %vm1172_vm4, %v4047_v18, %v4051_v4  ;;  %v3801_v21 = vld [vmem:[#allocation3 + $0x60] sm:$0xf]  ;;  %v3736_v7 = vld [vmem:[#allocation3 + $0x54] sm:$0xf] }
 0x20b   : > { %v3802_v19 = vld [vmem:[#allocation3 + $0x64] sm:$0xf]  ;;  %v6269_v40 = vcombine.low %v3738_v11, %v3739_v47  ;;  %v6301_v26 = vcombine.low %v3779_v24, %v3739_v47  ;;  %4183 = vrot.lane.b32.xlu1 %v4052_v36, %s6879_s24  ;;  %v8797_v43 = vld [vmem:[#allocation3 + $0x58] sm:$0xf]  ;;  %v3843_v32 = vld [vmem:[#allocation3 + $0x60] sm:$0xe]  ;;  %v4552_v30 = vsel %vm1172_vm4, %v4547_v29, %v4551_v61  ;;  %v8838_v24 = vpop.permute.xlu0 %4173 }
 0x20c   : > { %v8799_v48 = vld [vmem:[#allocation3 + $0x58] sm:$0xf]  ;;  %v6787_v0 = vld [vmem:[#allocation3 + $0x68] ss:$0 sps:$4 sm:$0x11]   ;;  %v6348_v41 = vcombine.low %v3843_v32, %v3802_v19  ;;  %v8805_v33 = vcombine.low %v3801_v21, %v3802_v19  ;;  %v8812_v52 = vcombine.low %v3799_v53, %v8797_v43 }
 0x20d   : > { %v4786_v42 = vrot.slane %v6301_v26, 1  ;;  %v8802_v45 = vld [vmem:[#allocation3 + $0x68] ss:$0 sps:$4 sm:$0x11]   ;;  %v3675_v14 = vld [vmem:[#allocation3 + $0x58] sm:$0xf]  ;;  %v8815_v55 = vcombine.low %v3736_v7, %v8799_v48 }
 0x20e   : > { %4693 = vrot.lane.b32.xlu0 %v4552_v30, %s6884_s6  ;;  %v4787_v3 = vrot.slane %v6787_v0, 1  ;;  %v3715_v15 = vld [vmem:[#allocation3 + $0x54] sm:$0xe]  ;;  %v4578_v60 = vshrl.u32 %v6269_v40, 16  ;;  %v5295_v28 = vrot.slane %v6348_v41, 1  ;;  %v5296_v46 = vrot.slane %v8802_v45, 1 }
 0x20f   : > { %v8808_v62 = vld [vmem:[#allocation3 + $0x5c] ss:$0 sps:$4 sm:$0x11]   ;;  %v6253_v2 = vcombine.low %v3715_v15, %v3675_v14  ;;  %v4580_v34 = vshll.u32 %v6269_v40, 16  ;;  %4427 = vrot.lane.b32.xlu1 %v6269_v40, %s6882_s27  ;;  %v3674_v13 = vld [vmem:[#allocation3 + $0x54] sm:$0xf] }
 0x210   : > { %v3676_v6 = vld [vmem:[#allocation3 + $0x60] sm:$0xf]  ;;  %v3677_v20 = vld [vmem:[#allocation3 + $0x64] sm:$0xf]  ;;  %v4275_v10 = vrot.slane %v8808_v62, 1  ;;  %v4788_v44 = vsel %vm1445_vm6, %v4786_v42, %v4787_v3  ;;  %v4585_v12 = vshll.u32 %v6787_v0, 16  ;;  %v5297_v54 = vsel %vm1445_vm6, %v5295_v28, %v5296_v46 }
 0x211   : > { %v4274_v9 = vrot.slane %v6253_v2, 1  ;;  %v3716_v56 = vld [vmem:[#allocation3 + $0x60] sm:$0xe]  ;;  %v8821_v31 = vld [vmem:[#allocation3 + $0x68] ss:$0 sps:$4 sm:$0x11]   ;;  %v8830_v22 = vcombine.low %v3674_v13, %v3675_v14  ;;  %v8832_v58 = vcombine.low %v3676_v6, %v3677_v20 }
 0x212   : > { %4937 = vrot.lane.b32.xlu0 %v8805_v33, %s6887_s15  ;;  %v6254_v49 = vcombine.low %v3716_v56, %v3677_v20  ;;  %v4582_v17 = vrot.slane %v4580_v34, 1  ;;  %v3842_v5 = vld [vmem:[#allocation3 + $0x54] sm:$0xe]  ;;  %v4278_v11 = vrot.slane %v8821_v31, 1  ;;  %v4587_v32 = vrot.slane %v4585_v12, 1 }
 0x213   : > { %v6512_v8 = vpop.f32.mrb[16].mxu0  ;;  %4935 = vrot.lane.b32.xlu1 %v8812_v52, %s6887_s15  ;;  %v8840_v47 = vld [vmem:[#allocation3 + $0x5c] ss:$0 sps:$4 sm:$0x11]   ;;  %v4276_v40 = vsel %vm1445_vm6, %v4274_v9, %v4275_v10  ;;  %v6347_v21 = vcombine.low %v3842_v5, %v8797_v43  ;;  %v4080_v15 = vshll.u32 %v8832_v58, 16  ;;  %v4078_v2 = vshrl.u32 %v8832_v58, 16  ;;  %v8856_v9 = vpop.permute.xlu0 %4301 }
 0x214   : > { %v2985_v27 = vadd.f32 %v8826_v1, %v6512_v8  ;;  %v2976_v35 = vpop.f32.mrb[17].mxu0  ;;  %v4277_v4 = vrot.slane %v6254_v49, 1  ;;  %v4583_v29 = vor.u32 %v4582_v17, %v4578_v60  ;;  %v5293_v30 = vrot.slane %v8840_v47, 1  ;;  %v3611_v34 = vld [vmem:[#allocation3 + $0x78] sm:$0xf] }
 0x215   : > { %v2977_v39 = vadd.f32 %v8826_v1, %v2976_v35  ;;  %v6513_v18 = vpop.f32.mrb[18].mxu0  ;;  %v5292_v53 = vrot.slane %v6347_v21, 1  ;;  %v4082_v10 = vrot.slane %v4080_v15, 1  ;;  %v4085_v17 = vshll.u32 %v8821_v31, 16 }
 0x216   : > { %v3057_v19 = vmax.f32 %v2985_v27, 0.0  ;;  %v2988_v36 = vadd.f32 %v8826_v1, %v6513_v18  ;;  %v2979_v61 = vpop.f32.mrb[19].mxu0  ;;  %4425 = vrot.lane.b32.xlu0 %v8815_v55, %s6882_s27  ;;  %v4279_v14 = vsel %vm1445_vm6, %v4277_v4, %v4278_v11  ;;  %v4588_v43 = vsel %vm1172_vm4, %v4583_v29, %v4587_v32  ;;  %v8860_v29 = vld [vmem:[#allocation3 + $0x5c] ss:$0 sps:$4 sm:$0x11]  }
 0x217   : > { %v3055_v26 = vmax.f32 %v2977_v39, 0.0  ;;  %v2980_v0 = vadd.f32 %v8826_v1, %v2979_v61  ;;  %4827 = vrot.lane.b32.xlu1 %v4788_v44, %s6888_s16  ;;  %v5294_v20 = vsel %vm1445_vm6, %v5292_v53, %v5293_v30  ;;  %v3604_v44 = vld [vmem:[#allocation3 + $0x6c] sm:$0xf]  ;;  %v3778_v39 = vld [vmem:[#allocation3 + $0x54] sm:$0xe]  ;;  %v4083_v11 = vor.u32 %v4082_v10, %v4078_v2 }
 0x218   : > { %v6434_v42 = vpack.c.bf16 %v3057_v19, %v3057_v19  ;;  %v3058_v41 = vmax.f32 %v2988_v36, 0.0  ;;  %v3615_v36 = vld [vmem:[#allocation3 + $0x80] sm:$0x1]  ;;  %v4087_v21 = vrot.slane %v4085_v17, 1  ;;  %v6300_v31 = vcombine.low %v3778_v39, %v8799_v48  ;;  %v3608_v30 = vld [vmem:[#allocation3 + $0x74] sm:$0x1] }
 0x219   : > { %v6432_v7 = vpack.c.bf16 %v3055_v26, %v3055_v26  ;;  %v3056_v3 = vmax.f32 %v2980_v0, 0.0  ;;  %v5066_v2 = vshrl.u32 %v8812_v52, 16  ;;  %v5080_v10 = vshll.u32 %v8805_v33, 16 }
 0x21a   : > { %v3377_v60 = vshrl.u32 %v6434_v42, 16  ;;  %v3380_v28 = vshll.u32 %v6434_v42, 16  ;;  %v6435_v46 = vpack.c.bf16 %v3058_v41, %v3058_v41  ;;  %5337 = vrot.lane.b32.xlu0 %v5297_v54, %s6889_s17 }
 0x21b   : > { %v3360_v13 = vshrl.u32 %v6432_v7, 16  ;;  %v6433_v6 = vpack.c.bf16 %v3056_v3, %v3056_v3  ;;  %v3363_v8 = vshll.u32 %v6432_v7, 16  ;;  %4315 = vrot.lane.b32.xlu1 %v4276_v40, %s6885_s9 }
 0x21c   : > { %v3379_v56 = vrot.slane %v3377_v60, 7  ;;  %v3385_v49 = vshrl.u32 %v6435_v46, 16  ;;  %v3388_v27 = vshll.u32 %v6435_v46, 16  ;;  %v4784_v60 = vrot.slane %v8860_v29, 1 }
 0x21d   : > { %v3362_v12 = vrot.slane %v3360_v13, 7  ;;  %v3368_v35 = vshrl.u32 %v6433_v6, 16  ;;  %v3371_v5 = vshll.u32 %v6433_v6, 16  ;;  %v4088_v13 = vsel %vm1172_vm4, %v4083_v11, %v4087_v21 }
 0x21e   : > { %v3382_v54 = vor.u32 %v3380_v28, %v3379_v56  ;;  %v3383_v18 = vrot.slane %v3379_v56, 4  ;;  %v3387_v4 = vrot.slane %v3385_v49, 7  ;;  %4317 = vrot.lane.b32.xlu0 %v4279_v14, %s6885_s9  ;;  %v4783_v14 = vrot.slane %v6300_v31, 1 }
 0x21f   : > { %v3365_v19 = vor.u32 %v3363_v8, %v3362_v12  ;;  %v3370_v61 = vrot.slane %v3368_v35, 7  ;;  %v3366_v0 = vrot.slane %v3362_v12, 4  ;;  %4699 = vrot.lane.b32.xlu1 %v4588_v43, %s6884_s6  ;;  %v5068_v28 = vshll.u32 %v8812_v52, 16 }
 0x220   : > { %v3612_v26 = vsel %vm8496_vm9, %v3382_v54, %v3611_v34  ;;  %v3390_v40 = vor.u32 %v3388_v27, %v3387_v4  ;;  %v3392_v32 = vrot.slane %v3387_v4, 4  ;;  %v5073_v34 = vshll.u32 %v8840_v47, 16 }
 0x221   : > { %3613 = vst [vmem:[#allocation3 + $0x78] sm:$0xf] %v3612_v26  ;;  %v3605_v42 = vsel %vm8496_vm9, %v3365_v19, %v3604_v44  ;;  %v3373_v41 = vor.u32 %v3371_v5, %v3370_v61  ;;  %v3375_v53 = vrot.slane %v3370_v61, 4  ;;  %v8869_v7 = vpop.permute.xlu1 %4415  ;;  %v5070_v6 = vrot.slane %v5068_v28, 1 }
 0x222   : > { %v8871_v3 = vpop.permute.xlu0 %4925  ;;  %3606 = vst [vmem:[#allocation3 + $0x6c] sm:$0xf] %v3605_v42  ;;  %v3391_v48 = vsel %vm7061_vm7, %v3383_v18, %v3390_v40  ;;  %v3616_v15 = vsel %vm8502_vm13, %v3392_v32, %v3615_v36  ;;  %5335 = vrot.lane.b32.xlu0 %v5294_v20, %s6889_s17  ;;  %v5085_v56 = vshll.u32 %v8802_v45, 16  ;;  %v4785_v8 = vsel %vm1445_vm6, %v4783_v14, %v4784_v60 }
 0x223   : > { %3614 = vst.msk [vmem:[#allocation3 + $0x7c] sm:$0xf] %vm3071_vm0, %v3391_v48  ;;  %3617 = vst [vmem:[#allocation3 + $0x80] sm:$0x1] %v3616_v15  ;;  %v3374_v43 = vsel %vm7061_vm7, %v3366_v0, %v3373_v41  ;;  %v3609_v46 = vsel %vm8502_vm13, %v3375_v53, %v3608_v30  ;;  %4189 = vrot.lane.b32.xlu1 %v4088_v13, %s6879_s24  ;;  %v5078_v52 = vshrl.u32 %v8805_v33, 16  ;;  %v4068_v47 = vshll.u32 %v8830_v22, 16 }
 0x224   : > { %3607 = vst.msk [vmem:[#allocation3 + $0x70] sm:$0xf] %vm3071_vm0, %v3374_v43  ;;  %3610 = vst [vmem:[#allocation3 + $0x74] sm:$0x1] %v3609_v46  ;;  %v5071_v49 = vor.u32 %v5070_v6, %v5066_v2  ;;  %v5075_v17 = vrot.slane %v5073_v34, 1  ;;  %v5082_v12 = vrot.slane %v5080_v10, 1  ;;  %v5358_v26 = vsel %vm2583_vm12, %v8381_v38, %v8838_v24 }
 0x225   : > { %v8893_v44 = vpop.permute.xlu1 %4815  ;;  %v4073_v27 = vshll.u32 %v8808_v62, 16  ;;  %v4066_v45 = vshrl.u32 %v8830_v22, 16  ;;  %v4070_v35 = vrot.slane %v4068_v47, 1  ;;  %v4568_v5 = vshll.u32 %v8815_v55, 16 }
 0x226   : > { %v4414_v20 = vpop.permute.xlu0 %4413  ;;  %4825 = vrot.lane.b32.xlu0 %v4785_v8, %s6888_s16  ;;  %v5076_v39 = vsel %vm1172_vm4, %v5071_v49, %v5075_v17  ;;  %v5083_v54 = vor.u32 %v5082_v12, %v5078_v52  ;;  %v5087_v18 = vrot.slane %v5085_v56, 1  ;;  %v4573_v33 = vshll.u32 %v8860_v29, 16 }
 0x227   : > { %5207 = vrot.lane.b32.xlu1 %v5076_v39, %s6890_s21  ;;  %v4071_v11 = vor.u32 %v4070_v35, %v4066_v45  ;;  %v4566_v62 = vshrl.u32 %v8815_v55, 16  ;;  %v4570_v19 = vrot.slane %v4568_v5, 1  ;;  %v4075_v61 = vrot.slane %v4073_v27, 1 }
 0x228   : > { %v5088_v36 = vsel %vm1172_vm4, %v5083_v54, %v5087_v18  ;;  %v3742_v0 = vld [vmem:[#allocation3 + $0x78] sm:$0xf]  ;;  %v4575_v30 = vrot.slane %v4573_v33, 1  ;;  %v5390_v28 = vsel %vm2649_vm14, %v5358_v26, %v8856_v9 }
 0x229   : > { %v8904_v4 = vpop.permute.xlu1 %4303  ;;  %v4571_v29 = vor.u32 %v4570_v19, %v4566_v62  ;;  %v4076_v32 = vsel %vm1172_vm4, %v4071_v11, %v4075_v61  ;;  %v3805_v55 = vld [vmem:[#allocation3 + $0x78] sm:$0xf]  ;;  %v3803_v6 = vld [vmem:[#allocation3 + $0x6c] sm:$0xf]  ;;  %v8944_v27 = vsel %vm2715_vm1, %v5390_v28, %v4414_v20 }
 0x22a   : > { %v8908_v21 = vpop.permute.xlu0 %5325  ;;  %v3743_v31 = vld [vmem:[#allocation3 + $0x7c] sm:$0xf]  ;;  %5209 = vrot.lane.b32.xlu0 %v5088_v36, %s6890_s21  ;;  %v3781_v42 = vld [vmem:[#allocation3 + $0x78] sm:$0xe]  ;;  %v3717_v56 = vld [vmem:[#allocation3 + $0x6c] sm:$0xe] }
 0x22b   : > { %v3806_v40 = vld [vmem:[#allocation3 + $0x7c] sm:$0xf]  ;;  %v8915_v41 = vld [vmem:[#allocation3 + $0x80] ss:$0 sps:$4 sm:$0x11]   ;;  %4187 = vrot.lane.b32.xlu1 %v4076_v32, %s6879_s24  ;;  %v8920_v14 = vcombine.low %v3742_v0, %v3743_v31  ;;  %v6303_v24 = vcombine.low %v3781_v42, %v3743_v31  ;;  %v4576_v43 = vsel %vm1172_vm4, %v4571_v29, %v4575_v30 }
 0x22c   : > { %v8922_v48 = vld [vmem:[#allocation3 + $0x70] sm:$0xf]  ;;  %v3845_v15 = vld [vmem:[#allocation3 + $0x78] sm:$0xe]  ;;  %v4793_v46 = vrot.slane %v8915_v41, 1  ;;  %v8935_v13 = vcombine.low %v3805_v55, %v3806_v40  ;;  %v4609_v31 = vshll.u32 %v8915_v41, 16 }
 0x22d   : > { %v8918_v53 = vpop.permute.xlu1 %4687  ;;  %v8924_v38 = vld [vmem:[#allocation3 + $0x70] sm:$0xf]  ;;  %v8932_v2 = vld [vmem:[#allocation3 + $0x80] ss:$0 sps:$4 sm:$0x11]   ;;  %v6350_v34 = vcombine.low %v3845_v15, %v3806_v40  ;;  %v4792_v10 = vrot.slane %v6303_v24, 1  ;;  %v8952_v39 = vcombine.low %v3803_v6, %v8922_v48 }
 0x22e   : > { %v8926_v60 = vld [vmem:[#allocation3 + $0x70] sm:$0xf]  ;;  %4697 = vrot.lane.b32.xlu0 %v4576_v43, %s6884_s6  ;;  %v8937_v8 = vld [vmem:[#allocation3 + $0x74] ss:$0 sps:$4 sm:$0x11]   ;;  %v8939_v52 = vpop.permute.xlu0 %4305  ;;  %v5302_v49 = vrot.slane %v8932_v2, 1 }
 0x22f   : > { %v3740_v47 = vld [vmem:[#allocation3 + $0x6c] sm:$0xf]  ;;  %v5301_v9 = vrot.slane %v6350_v34, 1  ;;  %v6255_v17 = vcombine.low %v3717_v56, %v8926_v60  ;;  %v3680_v12 = vld [vmem:[#allocation3 + $0x78] sm:$0xf]  ;;  %4431 = vrot.lane.b32.xlu1 %v8920_v14, %s6882_s27  ;;  %v4281_v35 = vrot.slane %v8937_v8, 1  ;;  %v4794_v19 = vsel %vm1445_vm6, %v4792_v10, %v4793_v46 }
 0x230   : > { %v3681_v5 = vld [vmem:[#allocation3 + $0x7c] sm:$0xf]  ;;  %v8955_v54 = vcombine.low %v3740_v47, %v8924_v38  ;;  %v3718_v33 = vld [vmem:[#allocation3 + $0x78] sm:$0xe]  ;;  %v4604_v61 = vshll.u32 %v8920_v14, 16  ;;  %v4602_v32 = vshrl.u32 %v8920_v14, 16 }
 0x231   : > { %v8948_v45 = vpop.permute.xlu1 %4177  ;;  %v4280_v18 = vrot.slane %v6255_v17, 1  ;;  %v8957_v11 = vcombine.low %v3680_v12, %v3681_v5  ;;  %v8959_v20 = vld [vmem:[#allocation3 + $0x80] ss:$0 sps:$4 sm:$0x11]   ;;  %v6256_v36 = vcombine.low %v3718_v33, %v3681_v5  ;;  %v5303_v0 = vsel %vm1445_vm6, %v5301_v9, %v5302_v49  ;;  %v3844_v30 = vld [vmem:[#allocation3 + $0x6c] sm:$0xe] }
 0x232   : > { %4941 = vrot.lane.b32.xlu0 %v8935_v13, %s6887_s15  ;;  %v4284_v40 = vrot.slane %v8959_v20, 1  ;;  %v4606_v41 = vrot.slane %v4604_v61, 1  ;;  %v8974_v28 = vpop.permute.xlu0 %4813  ;;  %v6349_v6 = vcombine.low %v3844_v30, %v8922_v48  ;;  %v4611_v49 = vrot.slane %v4609_v31, 1  ;;  %v8982_v17 = vld [vmem:[#allocation3 + $0x74] ss:$0 sps:$4 sm:$0x11]  }
 0x233   : > { %v6516_v62 = vpop.f32.mrb[20].mxu0  ;;  %4939 = vrot.lane.b32.xlu1 %v8952_v39, %s6887_s15  ;;  %v4282_v24 = vsel %vm1445_vm6, %v4280_v18, %v4281_v35  ;;  %v4283_v15 = vrot.slane %v6256_v36, 1  ;;  %v4102_v14 = vshrl.u32 %v8957_v11, 16  ;;  %v4104_v48 = vshll.u32 %v8957_v11, 16 }
 0x234   : > { %v3001_v26 = vadd.f32 %v8826_v1, %v6516_v62  ;;  %v2992_v29 = vpop.f32.mrb[21].mxu0  ;;  %v4607_v9 = vor.u32 %v4606_v41, %v4602_v32  ;;  %v5298_v36 = vrot.slane %v6349_v6, 1 }
 0x235   : > { %v2993_v55 = vadd.f32 %v8826_v1, %v2992_v29  ;;  %v6517_v42 = vpop.f32.mrb[22].mxu0  ;;  %v4285_v5 = vsel %vm1445_vm6, %v4283_v15, %v4284_v40  ;;  %v4106_v41 = vrot.slane %v4104_v48, 1  ;;  %v4109_v48 = vshll.u32 %v8959_v20, 16 }
 0x236   : > { %v3061_v43 = vmax.f32 %v3001_v26, 0.0  ;;  %v3004_v46 = vadd.f32 %v8826_v1, %v6517_v42  ;;  %v2995_v34 = vpop.f32.mrb[23].mxu0  ;;  %4429 = vrot.lane.b32.xlu0 %v8955_v54, %s6882_s27  ;;  %v4612_v29 = vsel %vm1172_vm4, %v4607_v9, %v4611_v49  ;;  %v3629_v49 = vld [vmem:[#allocation3 + $0x98] sm:$0x1] }
 0x237   : > { %v3059_v10 = vmax.f32 %v2993_v55, 0.0  ;;  %v4176_v56 = vpop.permute.xlu1 %4175  ;;  %v2996_v47 = vadd.f32 %v8826_v1, %v2995_v34  ;;  %4831 = vrot.lane.b32.xlu1 %v4794_v19, %s6888_s16  ;;  %v5299_v55 = vrot.slane %v8982_v17, 1 }
 0x238   : > { %v6438_v12 = vpack.c.bf16 %v3061_v43, %v3061_v43  ;;  %v3062_v35 = vmax.f32 %v3004_v46, 0.0  ;;  %v8988_v33 = vsel %vm2583_vm12, %v8543_v63, %v4176_v56  ;;  %v3625_v43 = vld [vmem:[#allocation3 + $0x90] sm:$0xf] }
 0x239   : > { %v6436_v18 = vpack.c.bf16 %v3059_v10, %v3059_v10  ;;  %v3060_v62 = vmax.f32 %v2996_v47, 0.0  ;;  %v5300_v10 = vsel %vm1445_vm6, %v5298_v36, %v5299_v55  ;;  %v3622_v36 = vld [vmem:[#allocation3 + $0x8c] sm:$0x1]  ;;  %v9002_v55 = vld [vmem:[#allocation3 + $0x74] ss:$0 sps:$4 sm:$0x11]  }
 0x23a   : > { %v3411_v61 = vshrl.u32 %v6438_v12, 16  ;;  %v3414_v31 = vshll.u32 %v6438_v12, 16  ;;  %v6439_v26 = vpack.c.bf16 %v3062_v35, %v3062_v35  ;;  %5341 = vrot.lane.b32.xlu0 %v5303_v0, %s6889_s17  ;;  %v5198_v15 = vpop.permute.xlu0 %5197  ;;  %v3618_v0 = vld [vmem:[#allocation3 + $0x84] sm:$0xf]  ;;  %v4107_v12 = vor.u32 %v4106_v41, %v4102_v14 }
 0x23b   : > { %v3394_v40 = vshrl.u32 %v6436_v18, 16  ;;  %v3397_v32 = vshll.u32 %v6436_v18, 16  ;;  %v6437_v30 = vpack.c.bf16 %v3060_v62, %v3060_v62  ;;  %4319 = vrot.lane.b32.xlu1 %v4282_v24, %s6885_s9  ;;  %v4111_v41 = vrot.slane %v4109_v48, 1 }
 0x23c   : > { %v3413_v63 = vrot.slane %v3411_v61, 7  ;;  %v3419_v42 = vshrl.u32 %v6439_v26, 16  ;;  %v3422_v19 = vshll.u32 %v6439_v26, 16  ;;  %v3780_v61 = vld [vmem:[#allocation3 + $0x6c] sm:$0xe] }
 0x23d   : > { %v3396_v46 = vrot.slane %v3394_v40, 7  ;;  %v3402_v34 = vshrl.u32 %v6437_v30, 16  ;;  %v3405_v6 = vshll.u32 %v6437_v30, 16  ;;  %v6302_v14 = vcombine.low %v3780_v61, %v8924_v38 }
 0x23e   : > { %v3416_v56 = vor.u32 %v3414_v31, %v3413_v63  ;;  %v3417_v47 = vrot.slane %v3413_v63, 4  ;;  %v3421_v9 = vrot.slane %v3419_v42, 7  ;;  %4321 = vrot.lane.b32.xlu0 %v4285_v5, %s6885_s9  ;;  %v4686_v31 = vpop.permute.xlu0 %4685  ;;  %v4097_v61 = vshll.u32 %v8937_v8, 16 }
 0x23f   : > { %v3399_v35 = vor.u32 %v3397_v32, %v3396_v46  ;;  %v3400_v18 = vrot.slane %v3396_v46, 4  ;;  %v3404_v62 = vrot.slane %v3402_v34, 7  ;;  %v5454_v63 = vsel %vm2781_vm10, %v8944_v27, %v4686_v31  ;;  %4703 = vrot.lane.b32.xlu1 %v4612_v29, %s6884_s6  ;;  %v3678_v29 = vld [vmem:[#allocation3 + $0x6c] sm:$0xf] }
 0x240   : > { %v3626_v26 = vsel %vm8496_vm9, %v3416_v56, %v3625_v43  ;;  %v3424_v24 = vor.u32 %v3422_v19, %v3421_v9  ;;  %v3426_v40 = vrot.slane %v3421_v9, 4  ;;  %v9000_v30 = vpop.permute.xlu1 %4419  ;;  %v5487_v38 = vsel %vm5485_vm5, %v5454_v63, %v8974_v28 }
 0x241   : > { %3627 = vst [vmem:[#allocation3 + $0x90] sm:$0xf] %v3626_v26  ;;  %v3619_v5 = vsel %vm8496_vm9, %v3399_v35, %v3618_v0  ;;  %v3407_v32 = vor.u32 %v3405_v6, %v3404_v62  ;;  %v3409_v20 = vrot.slane %v3404_v62, 4  ;;  %v5520_v46 = vsel %vm5518_vm15, %v5487_v38, %v8871_v3 }
 0x242   : > { %3620 = vst [vmem:[#allocation3 + $0x84] sm:$0xf] %v3619_v5  ;;  %v3425_v42 = vsel %vm7061_vm7, %v3417_v47, %v3424_v24  ;;  %v3630_v19 = vsel %vm8502_vm13, %v3426_v40, %v3629_v49  ;;  %5339 = vrot.lane.b32.xlu0 %v5300_v10, %s6889_s17  ;;  %v4789_v34 = vrot.slane %v6302_v14, 1  ;;  %v9026_v28 = vcombine.low %v3678_v29, %v8926_v60  ;;  %v9029_v56 = vpop.permute.xlu0 %4929 }
 0x243   : > { %3628 = vst.msk [vmem:[#allocation3 + $0x94] sm:$0xf] %vm3071_vm0, %v3425_v42  ;;  %3631 = vst [vmem:[#allocation3 + $0x98] sm:$0x1] %v3630_v19  ;;  %v3408_v43 = vsel %vm7061_vm7, %v3400_v18, %v3407_v32  ;;  %v3623_v27 = vsel %vm8502_vm13, %v3409_v20, %v3622_v36  ;;  %v5553_v6 = vsel %vm5551_vm3, %v5520_v46, %v5198_v15  ;;  %v4790_v0 = vrot.slane %v9002_v55, 1 }
 0x244   : > { %3621 = vst.msk [vmem:[#allocation3 + $0x88] sm:$0xf] %vm3071_vm0, %v3408_v43  ;;  %3624 = vst [vmem:[#allocation3 + $0x8c] sm:$0x1] %v3623_v27  ;;  %v4112_v47 = vsel %vm1172_vm4, %v4107_v12, %v4111_v41  ;;  %v4928_v9 = vpop.permute.xlu1 %4927  ;;  %v5392_v3 = vsel %vm2649_vm14, %v8988_v33, %v8904_v4  ;;  %v5586_v10 = vsel %vm5584_vm8, %v5553_v6, %v8908_v21  ;;  %v5092_v60 = vshll.u32 %v8952_v39, 16 }
 0x245   : > { %4193 = vrot.lane.b32.xlu1 %v4112_v47, %s6879_s24  ;;  %6536 = vmatprep.mubr.msk.bf16.mxu1 %vm5660_vm11, %v5586_v10  ;;  %v4791_v15 = vsel %vm1445_vm6, %v4789_v34, %v4790_v0  ;;  %v5097_v49 = vshll.u32 %v8982_v17, 16  ;;  %v5090_v12 = vshrl.u32 %v8952_v39, 16  ;;  %v5104_v4 = vshll.u32 %v8935_v13, 16 }
 0x246   : > { %4829 = vrot.lane.b32.xlu0 %v4791_v15, %s6888_s16  ;;  %v5094_v35 = vrot.slane %v5092_v60, 1  ;;  %v5109_v33 = vshll.u32 %v8932_v2, 16  ;;  %v5424_v21 = vsel %vm2715_vm1, %v5392_v3, %v8869_v7  ;;  %v4418_v18 = vpop.permute.xlu0 %4417  ;;  %v4092_v48 = vshll.u32 %v9026_v28, 16 }
 0x247   : > { %v5099_v26 = vrot.slane %v5097_v49, 1  ;;  %v5102_v24 = vshrl.u32 %v8935_v13, 16  ;;  %v5106_v39 = vrot.slane %v5104_v4, 1  ;;  %v4090_v40 = vshrl.u32 %v9026_v28, 16 }
 0x248   : > { %v9049_v62 = vpop.permute.xlu1 %4819  ;;  %v5095_v17 = vor.u32 %v5094_v35, %v5090_v12  ;;  %v4094_v36 = vrot.slane %v4092_v48, 1  ;;  %v4592_v2 = vshll.u32 %v8955_v54, 16  ;;  %v4597_v31 = vshll.u32 %v9002_v55, 16  ;;  %v3746_v8 = vld [vmem:[#allocation3 + $0x90] sm:$0xf] }
 0x249   : > { %v5107_v5 = vor.u32 %v5106_v39, %v5102_v24  ;;  %v5111_v32 = vrot.slane %v5109_v33, 1  ;;  %v4590_v20 = vshrl.u32 %v8955_v54, 16  ;;  %v5456_v63 = vsel %vm2781_vm10, %v5424_v21, %v8918_v53  ;;  %v3783_v46 = vld [vmem:[#allocation3 + $0x90] sm:$0xe]  ;;  %v3846_v3 = vld [vmem:[#allocation3 + $0x84] sm:$0xe] }
 0x24a   : > { %v3747_v7 = vld [vmem:[#allocation3 + $0x94] sm:$0xf]  ;;  %v5100_v14 = vsel %vm1172_vm4, %v5095_v17, %v5099_v26  ;;  %v9062_v13 = vpop.permute.xlu0 %5329  ;;  %v4095_v42 = vor.u32 %v4094_v36, %v4090_v40  ;;  %v4099_v19 = vrot.slane %v4097_v61, 1  ;;  %v4594_v38 = vrot.slane %v4592_v2, 1  ;;  %v3809_v60 = vld [vmem:[#allocation3 + $0x90] sm:$0xf] }
 0x24b   : > { %5211 = vrot.lane.b32.xlu1 %v5100_v14, %s6890_s21  ;;  %v3808_v55 = vld [vmem:[#allocation3 + $0x88] sm:$0xf]  ;;  %v5362_v43 = vsel %vm2583_vm12, %v8537_v59, %v8948_v45  ;;  %v5112_v54 = vsel %vm1172_vm4, %v5107_v5, %v5111_v32  ;;  %v4599_v27 = vrot.slane %v4597_v31, 1  ;;  %v9070_v29 = vcombine.low %v3746_v8, %v3747_v7  ;;  %v9072_v53 = vld [vmem:[#allocation3 + $0x94] sm:$0xf] }
 0x24c   : > { %v9064_v41 = vpop.permute.xlu1 %4307  ;;  %v9074_v34 = vld [vmem:[#allocation3 + $0x98] ss:$0 sps:$4 sm:$0x11]   ;;  %5213 = vrot.lane.b32.xlu0 %v5112_v54, %s6890_s21  ;;  %v4595_v6 = vor.u32 %v4594_v38, %v4590_v20  ;;  %v3745_v47 = vld [vmem:[#allocation3 + $0x88] sm:$0xf]  ;;  %v6305_v0 = vcombine.low %v3783_v46, %v3747_v7  ;;  %v5489_v59 = vsel %vm5485_vm5, %v5456_v63, %v8893_v44  ;;  %v4100_v45 = vsel %vm1172_vm4, %v4095_v42, %v4099_v19 }
 0x24d   : > { %v3683_v10 = vld [vmem:[#allocation3 + $0x88] sm:$0xf]  ;;  %v3807_v15 = vld [vmem:[#allocation3 + $0x84] sm:$0xf]  ;;  %v4799_v49 = vrot.slane %v9074_v34, 1  ;;  %v6351_v35 = vcombine.low %v3846_v3, %v3808_v55  ;;  %v9084_v4 = vsel %vm5518_vm15, %v5489_v59, %v4928_v9  ;;  %v5394_v33 = vsel %vm2649_vm14, %v5362_v43, %v8939_v52 }
 0x24e   : > { %v9081_v12 = vld [vmem:[#allocation3 + $0x8c] ss:$0 sps:$4 sm:$0x11]   ;;  %v9089_v21 = vpop.permute.xlu0 %4309  ;;  %v4798_v48 = vrot.slane %v6305_v0, 1  ;;  %v3719_v61 = vld [vmem:[#allocation3 + $0x84] sm:$0xe]  ;;  %v4600_v26 = vsel %vm1172_vm4, %v4595_v6, %v4599_v27  ;;  %v9098_v36 = vsel %vm2715_vm1, %v5394_v33, %v4418_v18  ;;  %v9102_v52 = vcombine.low %v3809_v60, %v9072_v53 }
 0x24f   : > { %4191 = vrot.lane.b32.xlu1 %v4100_v45, %s6879_s24  ;;  %v9093_v17 = vld [vmem:[#allocation3 + $0x8c] ss:$0 sps:$4 sm:$0x11]   ;;  %v3744_v24 = vld [vmem:[#allocation3 + $0x84] sm:$0xf]  ;;  %v5304_v39 = vrot.slane %v6351_v35, 1  ;;  %v6257_v40 = vcombine.low %v3719_v61, %v3683_v10  ;;  %v9104_v2 = vcombine.low %v3807_v15, %v3808_v55 }
 0x250   : > { %v9091_v44 = vpop.permute.xlu1 %4691  ;;  %v4626_v9 = vshrl.u32 %v9070_v29, 16  ;;  %4701 = vrot.lane.b32.xlu0 %v4600_v26, %s6884_s6  ;;  %v5305_v31 = vrot.slane %v9081_v12, 1  ;;  %v3782_v7 = vld [vmem:[#allocation3 + $0x84] sm:$0xe]  ;;  %v9109_v5 = vcombine.low %v3744_v24, %v3745_v47  ;;  %v4800_v20 = vsel %vm1445_vm6, %v4798_v48, %v4799_v49 }
 0x251   : > { %v9107_v14 = vld [vmem:[#allocation3 + $0x8c] ss:$0 sps:$4 sm:$0x11]   ;;  %v3682_v8 = vld [vmem:[#allocation3 + $0x84] sm:$0xf]  ;;  %v6304_v18 = vcombine.low %v3782_v7, %v3745_v47  ;;  %v4628_v63 = vshll.u32 %v9070_v29, 16 }
 0x252   : > { %v5328_v42 = vpop.permute.xlu0 %5327  ;;  %v4287_v55 = vrot.slane %v9093_v17, 1  ;;  %v9119_v43 = vcombine.low %v3682_v8, %v3683_v10  ;;  %v4633_v54 = vshll.u32 %v9074_v34, 16  ;;  %v9122_v27 = vld [vmem:[#allocation3 + $0x98] ss:$0 sps:$4 sm:$0x11]   ;;  %v4286_v6 = vrot.slane %v6257_v40, 1 }
 0x253   : > { %v6520_v32 = vpop.f32.mrb[24].mxu0  ;;  %4435 = vrot.lane.b32.xlu1 %v9070_v29, %s6882_s27  ;;  %v4795_v47 = vrot.slane %v6304_v18, 1  ;;  %v4796_v0 = vrot.slane %v9107_v14, 1  ;;  %v4630_v3 = vrot.slane %v4628_v63, 1  ;;  %v5306_v10 = vsel %vm1445_vm6, %v5304_v39, %v5305_v31 }
 0x254   : > { %v9115_v19 = vpop.permute.xlu1 %4181  ;;  %v3017_v38 = vadd.f32 %v8826_v1, %v6520_v32  ;;  %v3008_v46 = vpop.f32.mrb[25].mxu0  ;;  %4945 = vrot.lane.b32.xlu0 %v9102_v52, %s6887_s15  ;;  %v5128_v60 = vshll.u32 %v9102_v52, 16  ;;  %v5126_v35 = vshrl.u32 %v9102_v52, 16  ;;  %v5133_v33 = vshll.u32 %v9122_v27, 16 }
 0x255   : > { %v3009_v59 = vadd.f32 %v8826_v1, %v3008_v46  ;;  %v6521_v45 = vpop.f32.mrb[26].mxu0  ;;  %v4631_v49 = vor.u32 %v4630_v3, %v4626_v9  ;;  %v4635_v39 = vrot.slane %v4633_v54, 1  ;;  %v4288_v31 = vsel %vm1445_vm6, %v4286_v6, %v4287_v55  ;;  %v3639_v3 = vld [vmem:[#allocation3 + $0xa8] sm:$0xf] }
 0x256   : > { %v3065_v29 = vmax.f32 %v3017_v38, 0.0  ;;  %v3020_v34 = vadd.f32 %v8826_v1, %v6521_v45  ;;  %v3011_v15 = vpop.f32.mrb[27].mxu0  ;;  %v9135_v61 = vpop.permute.xlu0 %4817  ;;  %v4797_v7 = vsel %vm1445_vm6, %v4795_v47, %v4796_v0  ;;  %v5130_v9 = vrot.slane %v5128_v60, 1 }
 0x257   : > { %4943 = vrot.lane.b32.xlu1 %v9104_v2, %s6887_s15  ;;  %v3063_v26 = vmax.f32 %v3009_v59, 0.0  ;;  %v3012_v24 = vadd.f32 %v8826_v1, %v3011_v15  ;;  %v4636_v63 = vsel %vm1172_vm4, %v4631_v49, %v4635_v39  ;;  %v5135_v54 = vrot.slane %v5133_v33, 1 }
 0x258   : > { %v6442_v48 = vpack.c.bf16 %v3065_v29, %v3065_v29  ;;  %v3066_v40 = vmax.f32 %v3020_v34, 0.0  ;;  %4433 = vrot.lane.b32.xlu0 %v9109_v5, %s6882_s27  ;;  %v5116_v46 = vshll.u32 %v9104_v2, 16  ;;  %v5131_v60 = vor.u32 %v5130_v9, %v5126_v35  ;;  %v3643_v9 = vld [vmem:[#allocation3 + $0xb0] sm:$0x1] }
 0x259   : > { %v6440_v32 = vpack.c.bf16 %v3063_v26, %v3063_v26  ;;  %v3064_v8 = vmax.f32 %v3012_v24, 0.0  ;;  %v5200_v18 = vpop.permute.xlu1 %5199  ;;  %v5114_v34 = vshrl.u32 %v9104_v2, 16 }
 0x25a   : > { %v3445_v52 = vshrl.u32 %v6442_v48, 16  ;;  %v6443_v38 = vpack.c.bf16 %v3066_v40, %v3066_v40  ;;  %v5555_v1 = vsel %vm5551_vm3, %v9084_v4, %v5200_v18  ;;  %v3448_v6 = vshll.u32 %v6442_v48, 16  ;;  %v3636_v18 = vld [vmem:[#allocation3 + $0xa4] sm:$0x1] }
 0x25b   : > { %v3428_v47 = vshrl.u32 %v6440_v32, 16  ;;  %4835 = vrot.lane.b32.xlu1 %v4800_v20, %s6888_s16  ;;  %v6441_v0 = vpack.c.bf16 %v3064_v8, %v3064_v8  ;;  %v5588_v45 = vsel %vm5584_vm8, %v5555_v1, %v5328_v42  ;;  %v3431_v4 = vshll.u32 %v6440_v32, 16  ;;  %v3632_v20 = vld [vmem:[#allocation3 + $0x9c] sm:$0xf] }
 0x25c   : > { %v3447_v55 = vrot.slane %v3445_v52, 7  ;;  %v3453_v29 = vshrl.u32 %v6443_v38, 16  ;;  %v5202_v59 = vpop.permute.xlu0 %5201  ;;  %5343 = vrot.lane.b32.xlu0 %v5306_v10, %s6889_s17  ;;  %6537 = vmatmul.mubr.msk.bf16.vlgmr.msra.gmra.mrb[0].mxu1 %vm5660_vm11, %v5588_v45  ;;  %v3456_v39 = vshll.u32 %v6443_v38, 16  ;;  %v5118_v40 = vrot.slane %v5116_v46, 1 }
 0x25d   : > { %v3430_v49 = vrot.slane %v3428_v47, 7  ;;  %v3436_v33 = vshrl.u32 %v6441_v0, 16  ;;  %v4180_v48 = vpop.permute.xlu1 %4179  ;;  %v3439_v52 = vshll.u32 %v6441_v0, 16 }
 0x25e   : > { %v3450_v15 = vor.u32 %v3448_v6, %v3447_v55  ;;  %v3451_v26 = vrot.slane %v3447_v55, 4  ;;  %v3455_v24 = vrot.slane %v3453_v29, 7  ;;  %v5364_v1 = vsel %vm2583_vm12, %v8625_v50, %v4180_v48  ;;  %v3685_v48 = vld [vmem:[#allocation3 + $0x94] sm:$0xf] }
 0x25f   : > { %v3433_v35 = vor.u32 %v3431_v4, %v3430_v49  ;;  %v3438_v2 = vrot.slane %v3436_v33, 7  ;;  %4323 = vrot.lane.b32.xlu1 %v4288_v31, %s6885_s9  ;;  %v3434_v10 = vrot.slane %v3430_v49, 4  ;;  %v5119_v0 = vor.u32 %v5118_v40, %v5114_v34  ;;  %v3684_v40 = vld [vmem:[#allocation3 + $0x90] sm:$0xf] }
 0x260   : > { %v3640_v42 = vsel %vm8496_vm9, %v3450_v15, %v3639_v3  ;;  %v3458_v32 = vor.u32 %v3456_v39, %v3455_v24  ;;  %v3460_v8 = vrot.slane %v3455_v24, 4  ;;  %v4690_v55 = vpop.permute.xlu0 %4689  ;;  %4833 = vrot.lane.b32.xlu0 %v4797_v7, %s6888_s16  ;;  %v5121_v29 = vshll.u32 %v9081_v12, 16 }
 0x261   : > { %3641 = vst [vmem:[#allocation3 + $0xa8] sm:$0xf] %v3640_v42  ;;  %v3633_v38 = vsel %vm8496_vm9, %v3433_v35, %v3632_v20  ;;  %v3441_v46 = vor.u32 %v3439_v52, %v3438_v2  ;;  %v3443_v6 = vrot.slane %v3438_v2, 4  ;;  %v9159_v47 = vpop.permute.xlu1 %4423  ;;  %v5458_v50 = vsel %vm2781_vm10, %v9098_v36, %v4690_v55 }
 0x262   : > { %3634 = vst [vmem:[#allocation3 + $0x9c] sm:$0xf] %v3633_v38  ;;  %v3459_v31 = vsel %vm7061_vm7, %v3451_v26, %v3458_v32  ;;  %v3644_v3 = vsel %vm8502_vm13, %v3460_v8, %v3643_v9  ;;  %v5491_v34 = vsel %vm5485_vm5, %v5458_v50, %v9135_v61  ;;  %v5136_v15 = vsel %vm1172_vm4, %v5131_v60, %v5135_v54  ;;  %v3847_v60 = vld [vmem:[#allocation3 + $0x90] sm:$0xe] }
 0x263   : > { %3642 = vst.msk [vmem:[#allocation3 + $0xac] sm:$0xf] %vm3071_vm0, %v3459_v31  ;;  %3645 = vst [vmem:[#allocation3 + $0xb0] sm:$0x1] %v3644_v3  ;;  %v3442_v7 = vsel %vm7061_vm7, %v3434_v10, %v3441_v46  ;;  %v3637_v45 = vsel %vm8502_vm13, %v3443_v6, %v3636_v18  ;;  %4707 = vrot.lane.b32.xlu1 %v4636_v63, %s6884_s6  ;;  %v5524_v12 = vsel %vm5518_vm15, %v5491_v34, %v9029_v56 }
 0x264   : > { %3635 = vst.msk [vmem:[#allocation3 + $0xa0] sm:$0xf] %vm3071_vm0, %v3442_v7  ;;  %3638 = vst [vmem:[#allocation3 + $0xa4] sm:$0x1] %v3637_v45  ;;  %v9180_v36 = vpop.permute.xlu0 %4933  ;;  %v5123_v49 = vrot.slane %v5121_v29, 1  ;;  %v4616_v4 = vshll.u32 %v9109_v5, 16  ;;  %v5396_v61 = vsel %vm2649_vm14, %v5364_v1, %v9064_v41  ;;  %5217 = vrot.lane.b32.xlu0 %v5136_v15, %s6890_s21  ;;  %v5557_v63 = vsel %vm5551_vm3, %v5524_v12, %v5202_v59 }
 0x265   : > { %v4621_v33 = vshll.u32 %v9107_v14, 16  ;;  %v9188_v54 = vpop.permute.xlu1 %4931  ;;  %v4614_v26 = vshrl.u32 %v9109_v5, 16  ;;  %v5590_v24 = vsel %vm5584_vm8, %v5557_v63, %v9062_v13  ;;  %v9194_v14 = vld [vmem:[#allocation3 + $0x98] ss:$0 sps:$4 sm:$0x11]   ;;  %v4116_v41 = vshll.u32 %v9119_v43, 16 }
 0x266   : > { %v5124_v56 = vsel %vm1172_vm4, %v5119_v0, %v5123_v49  ;;  %v4618_v20 = vrot.slane %v4616_v4, 1  ;;  %6540 = vmatprep.mubr.msk.bf16.mxu1 %vm5660_vm11, %v5590_v24  ;;  %v4121_v59 = vshll.u32 %v9093_v17, 16  ;;  %v6352_v39 = vcombine.low %v3847_v60, %v9072_v53  ;;  %v3720_v17 = vld [vmem:[#allocation3 + $0x90] sm:$0xe] }
 0x267   : > { %5215 = vrot.lane.b32.xlu1 %v5124_v56, %s6890_s21  ;;  %v5428_v5 = vsel %vm2715_vm1, %v5396_v61, %v9000_v30  ;;  %v4623_v35 = vrot.slane %v4621_v33, 1  ;;  %v9205_v13 = vcombine.low %v3684_v40, %v3685_v48  ;;  %v4114_v2 = vshrl.u32 %v9119_v43, 16 }
 0x268   : > { %v4619_v42 = vor.u32 %v4618_v20, %v4614_v26  ;;  %v9203_v9 = vpop.permute.xlu0 %4421  ;;  %v4118_v52 = vrot.slane %v4116_v41, 1  ;;  %v4123_v10 = vrot.slane %v4121_v59, 1  ;;  %v5308_v32 = vrot.slane %v9122_v27, 1 }
 0x269   : > { %v9209_v8 = vpop.permute.xlu1 %4823  ;;  %v5307_v18 = vrot.slane %v6352_v39, 1  ;;  %v4128_v30 = vshll.u32 %v9205_v13, 16  ;;  %v4133_v1 = vshll.u32 %v9194_v14, 16  ;;  %v3811_v55 = vld [vmem:[#allocation3 + $0x9c] sm:$0xf]  ;;  %v5366_v38 = vsel %vm2583_vm12, %v8619_v37, %v9115_v19 }
 0x26a   : > { %v4624_v53 = vsel %vm1172_vm4, %v4619_v42, %v4623_v35  ;;  %v4119_v46 = vor.u32 %v4118_v52, %v4114_v2  ;;  %v3848_v27 = vld [vmem:[#allocation3 + $0x9c] sm:$0xe]  ;;  %v6258_v0 = vcombine.low %v3720_v17, %v3685_v48  ;;  %v4126_v3 = vshrl.u32 %v9205_v13, 16  ;;  %v6869_v35 = vld [vmem:[%s9668_s2] ss:$0 sm:$0xff] }
 0x26b   : > { %4705 = vrot.lane.b32.xlu0 %v4624_v53, %s6884_s6  ;;  %v3812_v6 = vld [vmem:[#allocation3 + $0xa0] sm:$0xf]  ;;  %v4130_v50 = vrot.slane %v4128_v30, 1  ;;  %v6833_v7 = vld [vmem:[#allocation3 + $0xa4] ss:$0 sps:$4 sm:$0x11]   ;;  %v5460_v34 = vsel %vm2781_vm10, %v5428_v5, %v9091_v44  ;;  %v5309_v4 = vsel %vm1445_vm6, %v5307_v18, %v5308_v32  ;;  %v9231_v48 = vsel %vm2649_vm14, %v5366_v38, %v9089_v21 }
 0x26c   : > { %v9218_v31 = vpop.permute.xlu0 %5333  ;;  %v6321_v29 = vcombine.low %v3811_v55, %v3812_v6  ;;  %v6353_v45 = vcombine.low %v3848_v27, %v3812_v6  ;;  %v4124_v15 = vsel %vm1172_vm4, %v4119_v46, %v4123_v10  ;;  %v4289_v19 = vrot.slane %v6258_v0, 1  ;;  %v3687_v49 = vld [vmem:[#allocation3 + $0xa0] sm:$0xf]  ;;  %v3686_v60 = vld [vmem:[#allocation3 + $0x9c] sm:$0xf] }
 0x26d   : > { %v9224_v37 = vpop.permute.xlu1 %4311  ;;  %v4290_v12 = vrot.slane %v9194_v14, 1  ;;  %4195 = vrot.lane.b32.xlu1 %v4124_v15, %s6879_s24  ;;  %v4131_v33 = vor.u32 %v4130_v50, %v4126_v3  ;;  %v5311_v63 = vrot.slane %v6833_v7, 1  ;;  %v4135_v44 = vrot.slane %v4133_v1, 1  ;;  %v9236_v20 = vld [vmem:[#allocation3 + $0xa4] ss:$0 sps:$4 sm:$0x11]  }
 0x26e   : > { %v5310_v61 = vrot.slane %v6353_v45, 1  ;;  %v5140_v56 = vshll.u32 %v6321_v29, 16  ;;  %v9234_v26 = vcombine.low %v3686_v60, %v3687_v49  ;;  %v5493_v24 = vsel %vm5485_vm5, %v5460_v34, %v9049_v62  ;;  %v9251_v10 = vld [vmem:[#allocation3 + $0xa0] sm:$0xf]  ;;  %v3721_v32 = vld [vmem:[#allocation3 + $0x9c] sm:$0xe] }
 0x26f   : > { %5345 = vrot.lane.b32.xlu0 %v5309_v4, %s6889_s17  ;;  %v5138_v39 = vshrl.u32 %v6321_v29, 16  ;;  %v5145_v40 = vshll.u32 %v6833_v7, 16  ;;  %v5526_v21 = vsel %vm5518_vm15, %v5493_v24, %v9188_v54  ;;  %v4136_v5 = vsel %vm1172_vm4, %v4131_v33, %v4135_v44  ;;  %v3748_v45 = vld [vmem:[#allocation3 + $0x9c] sm:$0xf] }
 0x270   : > { %v9240_v14 = vpop.permute.xlu0 %4313  ;;  %v6524_v41 = vpop.f32.mrb[28].mxu0  ;;  %v5312_v59 = vsel %vm1445_vm6, %v5310_v61, %v5311_v63  ;;  %v5142_v52 = vrot.slane %v5140_v56, 1  ;;  %v4291_v54 = vsel %vm1445_vm6, %v4289_v19, %v4290_v12  ;;  %v4140_v18 = vshll.u32 %v9234_v26, 16 }
 0x271   : > { %v9246_v42 = vpop.permute.xlu1 %4695  ;;  %v3033_v2 = vadd.f32 %v6869_v35, %v6524_v41  ;;  %v3024_v62 = vpop.f32.mrb[29].mxu0  ;;  %4197 = vrot.lane.b32.xlu1 %v4136_v5, %s6879_s24  ;;  %v4145_v30 = vshll.u32 %v9236_v20, 16  ;;  %v6259_v6 = vcombine.low %v3721_v32, %v3687_v49  ;;  %v4138_v50 = vshrl.u32 %v9234_v26, 16 }
 0x272   : > { %v3025_v17 = vadd.f32 %v6869_v35, %v3024_v62  ;;  %v6525_v53 = vpop.f32.mrb[30].mxu0  ;;  %v5143_v46 = vor.u32 %v5142_v52, %v5138_v39  ;;  %v4142_v7 = vrot.slane %v4140_v18, 1  ;;  %v5147_v12 = vrot.slane %v5145_v40, 1 }
 0x273   : > { %v3069_v1 = vmax.f32 %v3033_v2, 0.0  ;;  %5347 = vrot.lane.b32.xlu0 %v5312_v59, %s6889_s17  ;;  %v3036_v55 = vadd.f32 %v6869_v35, %v6525_v53  ;;  %v3027_v38 = vpop.f32.mrb[31].mxu0  ;;  %v9262_v4 = vcombine.low %v3748_v45, %v9251_v10  ;;  %v4147_v63 = vrot.slane %v4145_v30, 1  ;;  %v3653_v2 = vld [vmem:[#allocation3 + $0xc0] sm:$0xf] }
 0x274   : > { %v5332_v27 = vpop.permute.xlu0 %5331  ;;  %v3067_v0 = vmax.f32 %v3025_v17, 0.0  ;;  %v3028_v3 = vadd.f32 %v6869_v35, %v3027_v38  ;;  %v4143_v49 = vor.u32 %v4142_v7, %v4138_v50  ;;  %v5148_v56 = vsel %vm1172_vm4, %v5143_v46, %v5147_v12  ;;  %v9271_v30 = vld [vmem:[#allocation3 + $0xa4] ss:$0 sps:$4 sm:$0x11]   ;;  %v3657_v50 = vld [vmem:[#allocation3 + $0xc8] sm:$0x1] }
 0x275   : > { %v6446_v34 = vpack.c.bf16 %v3069_v1, %v3069_v1  ;;  %v3070_v15 = vmax.f32 %v3036_v55, 0.0  ;;  %v9259_v19 = vpop.permute.xlu1 %4185  ;;  %4947 = vrot.lane.b32.xlu1 %v6321_v29, %s6887_s15  ;;  %v4292_v24 = vrot.slane %v6259_v6, 1  ;;  %v4293_v5 = vrot.slane %v9236_v20, 1  ;;  %v3646_v55 = vld [vmem:[#allocation3 + $0xb4] sm:$0xf] }
 0x276   : > { %v6444_v33 = vpack.c.bf16 %v3067_v0, %v3067_v0  ;;  %v3068_v61 = vmax.f32 %v3028_v3, 0.0  ;;  %v4148_v32 = vsel %vm1172_vm4, %v4143_v49, %v4147_v63  ;;  %v3650_v12 = vld [vmem:[#allocation3 + $0xbc] sm:$0x1] }
 0x277   : > { %v3479_v60 = vshrl.u32 %v6446_v34, 16  ;;  %v6447_v44 = vpack.c.bf16 %v3070_v15, %v3070_v15  ;;  %4325 = vrot.lane.b32.xlu0 %v4291_v54, %s6885_s9  ;;  %v3482_v41 = vshll.u32 %v6446_v34, 16 }
 0x278   : > { %v3462_v59 = vshrl.u32 %v6444_v33, 16  ;;  %v6445_v39 = vpack.c.bf16 %v3068_v61, %v3068_v61  ;;  %v4822_v40 = vpop.permute.xlu0 %4821  ;;  %v3465_v29 = vshll.u32 %v6444_v33, 16  ;;  %v4640_v33 = vshll.u32 %v9262_v4, 16 }
 0x279   : > { %v3481_v35 = vrot.slane %v3479_v60, 7  ;;  %v3487_v62 = vshrl.u32 %v6447_v44, 16  ;;  %v5204_v52 = vpop.permute.xlu1 %5203  ;;  %v3490_v53 = vshll.u32 %v6447_v44, 16  ;;  %5219 = vrot.lane.b32.xlu1 %v5148_v56, %s6890_s21  ;;  %v4645_v60 = vshll.u32 %v9271_v30, 16  ;;  %v9284_v44 = vld [vmem:[#allocation3 + $0xac] sm:$0xf] }
 0x27a   : > { %v3464_v17 = vrot.slane %v3462_v59, 7  ;;  %v3470_v18 = vshrl.u32 %v6445_v39, 16  ;;  %v5559_v54 = vsel %vm5551_vm3, %v5526_v21, %v5204_v52  ;;  %v3473_v20 = vshll.u32 %v6445_v39, 16  ;;  %v3750_v52 = vld [vmem:[#allocation3 + $0xa8] sm:$0xf] }
 0x27b   : > { %v3484_v1 = vor.u32 %v3482_v41, %v3481_v35  ;;  %v3489_v38 = vrot.slane %v3487_v62, 7  ;;  %4437 = vrot.lane.b32.xlu0 %v9262_v4, %s6882_s27  ;;  %v5592_v46 = vsel %vm5584_vm8, %v5559_v54, %v5332_v27  ;;  %v3485_v6 = vrot.slane %v3481_v35, 4 }
 0x27c   : > { %v3467_v0 = vor.u32 %v3465_v29, %v3464_v17  ;;  %v3468_v3 = vrot.slane %v3464_v17, 4  ;;  %v3472_v7 = vrot.slane %v3470_v18, 7  ;;  %v5206_v45 = vpop.permute.xlu0 %5205  ;;  %6541 = vmatmul.mubr.msk.bf16.gmra.mrb[4].mxu1 %vm5660_vm11, %v5592_v46  ;;  %v4638_v59 = vshrl.u32 %v9262_v4, 16  ;;  %v3784_v17 = vld [vmem:[#allocation3 + $0x9c] sm:$0xe] }
 0x27d   : > { %v3654_v21 = vsel %vm8496_vm9, %v3484_v1, %v3653_v2  ;;  %v3492_v34 = vor.u32 %v3490_v53, %v3489_v38  ;;  %v3494_v15 = vrot.slane %v3489_v38, 4  ;;  %4199 = vrot.lane.b32.xlu1 %v4148_v32, %s6879_s24  ;;  %v4184_v63 = vpop.permute.xlu1 %4183  ;;  %v4642_v51 = vrot.slane %v4640_v33, 1  ;;  %v6842_v53 = vld [vmem:[#allocation3 + $0xb0] ss:$0 sps:$4 sm:$0x11]  }
 0x27e   : > { %3655 = vst [vmem:[#allocation3 + $0xc0] sm:$0xf] %v3654_v21  ;;  %v3647_v27 = vsel %vm8496_vm9, %v3467_v0, %v3646_v55  ;;  %v3475_v61 = vor.u32 %v3473_v20, %v3472_v7  ;;  %v3477_v49 = vrot.slane %v3472_v7, 4  ;;  %v5430_v39 = vsel %vm2715_vm1, %v9231_v48, %v9203_v9  ;;  %v3813_v46 = vld [vmem:[#allocation3 + $0xa8] sm:$0xf] }
 0x27f   : > { %3648 = vst [vmem:[#allocation3 + $0xb4] sm:$0xf] %v3647_v27  ;;  %v3493_v56 = vsel %vm7061_vm7, %v3485_v6, %v3492_v34  ;;  %v3658_v41 = vsel %vm8502_vm13, %v3494_v15, %v3657_v50  ;;  %v4294_v62 = vsel %vm1445_vm6, %v4292_v24, %v4293_v5  ;;  %v4643_v32 = vor.u32 %v4642_v51, %v4638_v59  ;;  %v3814_v5 = vld [vmem:[#allocation3 + $0xac] sm:$0xf] }
 0x280   : > { %3656 = vst.msk [vmem:[#allocation3 + $0xc4] sm:$0xf] %vm3071_vm0, %v3493_v56  ;;  %3659 = vst [vmem:[#allocation3 + $0xc8] sm:$0x1] %v3658_v41  ;;  %v3476_v35 = vsel %vm7061_vm7, %v3468_v3, %v3475_v61  ;;  %v3651_v2 = vsel %vm8502_vm13, %v3477_v49, %v3650_v12  ;;  %v4694_v29 = vpop.permute.xlu0 %4693  ;;  %v4647_v9 = vrot.slane %v4645_v60, 1  ;;  %v6275_v48 = vcombine.low %v3750_v52, %v9284_v44 }
 0x281   : > { %3649 = vst.msk [vmem:[#allocation3 + $0xb8] sm:$0xf] %vm3071_vm0, %v3476_v35  ;;  %3652 = vst [vmem:[#allocation3 + $0xbc] sm:$0x1] %v3651_v2  ;;  %v5462_v4 = vsel %vm2781_vm10, %v5430_v39, %v4694_v29  ;;  %4327 = vrot.lane.b32.xlu1 %v4294_v62, %s6885_s9  ;;  %v9305_v16 = vpop.permute.xlu1 %4427  ;;  %v6306_v24 = vcombine.low %v3784_v17, %v9251_v10  ;;  %v4802_v1 = vrot.slane %v9271_v30, 1  ;;  %v4657_v6 = vshll.u32 %v6842_v53, 16 }
 0x282   : > { %v5495_v23 = vsel %vm5485_vm5, %v5462_v4, %v4822_v40  ;;  %v4648_v54 = vsel %vm1172_vm4, %v4643_v32, %v4647_v9  ;;  %v4652_v20 = vshll.u32 %v6275_v48, 16  ;;  %v6322_v0 = vcombine.low %v3813_v46, %v3814_v5  ;;  %v3785_v3 = vld [vmem:[#allocation3 + $0xa8] sm:$0xe] }
 0x283   : > { %v5528_v18 = vsel %vm5518_vm15, %v5495_v23, %v9180_v36  ;;  %4709 = vrot.lane.b32.xlu0 %v4648_v54, %s6884_s6  ;;  %v4801_v38 = vrot.slane %v6306_v24, 1  ;;  %v9318_v36 = vld [vmem:[#allocation3 + $0xb0] ss:$0 sps:$4 sm:$0x11]   ;;  %v4650_v50 = vshrl.u32 %v6275_v48, 16  ;;  %v4659_v12 = vrot.slane %v4657_v6, 1 }
 0x284   : > { %v9313_v55 = vpop.permute.xlu0 %4937  ;;  %v5561_v40 = vsel %vm5551_vm3, %v5528_v18, %v5206_v45  ;;  %v4654_v7 = vrot.slane %v4652_v20, 1  ;;  %v6307_v45 = vcombine.low %v3785_v3, %v9284_v44  ;;  %v5152_v33 = vshll.u32 %v6322_v0, 16  ;;  %v3849_v41 = vld [vmem:[#allocation3 + $0xa8] sm:$0xe]  ;;  %v3689_v44 = vld [vmem:[#allocation3 + $0xac] sm:$0xf] }
 0x285   : > { %v5594_v10 = vsel %vm5584_vm8, %v5561_v40, %v9218_v31  ;;  %4439 = vrot.lane.b32.xlu1 %v6275_v48, %s6882_s27  ;;  %v9322_v30 = vpop.permute.xlu1 %4935  ;;  %v4803_v21 = vsel %vm1445_vm6, %v4801_v38, %v4802_v1  ;;  %v5368_v61 = vsel %vm2583_vm12, %v8731_v57, %v4184_v63  ;;  %v4805_v49 = vrot.slane %v6842_v53, 1  ;;  %v3688_v4 = vld [vmem:[#allocation3 + $0xa8] sm:$0xf] }
 0x286   : > { %6544 = vmatprep.mubr.msk.bf16.mxu1 %vm5660_vm11, %v5594_v10  ;;  %v3815_v34 = vld [vmem:[#allocation3 + $0xb4] sm:$0xf]  ;;  %v4655_v15 = vor.u32 %v4654_v7, %v4650_v50  ;;  %v5157_v60 = vshll.u32 %v9318_v36, 16  ;;  %v4804_v39 = vrot.slane %v6307_v45, 1  ;;  %v5150_v35 = vshrl.u32 %v6322_v0, 16 }
 0x287   : > { %4837 = vrot.lane.b32.xlu0 %v4803_v21, %s6888_s16  ;;  %v5154_v2 = vrot.slane %v5152_v33, 1  ;;  %v6354_v62 = vcombine.low %v3849_v41, %v3814_v5  ;;  %v9339_v32 = vcombine.low %v3688_v4, %v3689_v44  ;;  %v5400_v9 = vsel %vm2649_vm14, %v5368_v61, %v9224_v37  ;;  %v3850_v5 = vld [vmem:[#allocation3 + $0xb4] sm:$0xe]  ;;  %v3722_v45 = vld [vmem:[#allocation3 + $0xa8] sm:$0xe] }
 0x288   : > { %v9327_v31 = vpop.permute.xlu0 %4425  ;;  %v3816_v27 = vld [vmem:[#allocation3 + $0xb8] sm:$0xf]  ;;  %v4660_v59 = vsel %vm1172_vm4, %v4655_v15, %v4659_v12  ;;  %v6848_v29 = vld [vmem:[#allocation3 + $0xbc] ss:$0 sps:$4 sm:$0x11]   ;;  %v5159_v48 = vrot.slane %v5157_v60, 1  ;;  %v4806_v23 = vsel %vm1445_vm6, %v4804_v39, %v4805_v49  ;;  %v5432_v7 = vsel %vm2715_vm1, %v5400_v9, %v9159_v47 }
 0x289   : > { %v6323_v56 = vcombine.low %v3815_v34, %v3816_v27  ;;  %v9333_v51 = vpop.permute.xlu1 %4827  ;;  %4711 = vrot.lane.b32.xlu1 %v4660_v59, %s6884_s6  ;;  %v5155_v63 = vor.u32 %v5154_v2, %v5150_v35  ;;  %v9343_v53 = vld [vmem:[#allocation3 + $0xb8] sm:$0xf]  ;;  %v5169_v54 = vshll.u32 %v6848_v29, 16  ;;  %v4152_v1 = vshll.u32 %v9339_v32, 16  ;;  %v3690_v46 = vld [vmem:[#allocation3 + $0xb4] sm:$0xf] }
 0x28a   : > { %v5313_v40 = vrot.slane %v6354_v62, 1  ;;  %v5314_v37 = vrot.slane %v9318_v36, 1  ;;  %v6355_v20 = vcombine.low %v3850_v5, %v3816_v27  ;;  %v9355_v3 = vld [vmem:[#allocation3 + $0xb8] sm:$0xf]  ;;  %v9358_v50 = vcombine.low %v3690_v46, %v9343_v53  ;;  %v3752_v12 = vld [vmem:[#allocation3 + $0xb4] sm:$0xf] }
 0x28b   : > { %v5164_v52 = vshll.u32 %v6323_v56, 16  ;;  %4949 = vrot.lane.b32.xlu0 %v6322_v0, %s6887_s15  ;;  %v5162_v18 = vshrl.u32 %v6323_v56, 16  ;;  %v5160_v38 = vsel %vm1172_vm4, %v5155_v63, %v5159_v48  ;;  %v6851_v0 = vld [vmem:[#allocation3 + $0xb0] ss:$0 sps:$4 sm:$0x11]   ;;  %v5317_v36 = vrot.slane %v6848_v29, 1 }
 0x28c   : > { %v9337_v57 = vpop.permute.xlu0 %5337  ;;  %v5171_v34 = vrot.slane %v5169_v54, 1  ;;  %v4154_v15 = vrot.slane %v4152_v1, 1  ;;  %v4164_v33 = vshll.u32 %v9358_v50, 16  ;;  %v5315_v27 = vsel %vm1445_vm6, %v5313_v40, %v5314_v37  ;;  %v6855_v35 = vld [vmem:[#allocation3 + $0xbc] ss:$0 sps:$4 sm:$0x11]  }
 0x28d   : > { %v5166_v17 = vrot.slane %v5164_v52, 1  ;;  %v9346_v24 = vpop.permute.xlu1 %4315  ;;  %4839 = vrot.lane.b32.xlu1 %v4806_v23, %s6888_s16  ;;  %v5316_v61 = vrot.slane %v6355_v20, 1  ;;  %v6260_v49 = vcombine.low %v3722_v45, %v3689_v44  ;;  %v6276_v60 = vcombine.low %v3752_v12, %v9355_v3  ;;  %v9377_v9 = vld [vmem:[#allocation3 + $0xc4] sm:$0xf] }
 0x28e   : > { %v4150_v59 = vshrl.u32 %v9339_v32, 16  ;;  %v4157_v39 = vshll.u32 %v6851_v0, 16  ;;  %v5464_v2 = vsel %vm2781_vm10, %v5432_v7, %v9246_v42  ;;  %v4166_v62 = vrot.slane %v4164_v33, 1  ;;  %v9385_v1 = vld [vmem:[#allocation3 + $0xbc] ss:$0 sps:$4 sm:$0x11]  }
 0x28f   : > { %5221 = vrot.lane.b32.xlu0 %v5160_v38, %s6890_s21  ;;  %v5167_v6 = vor.u32 %v5166_v17, %v5162_v18  ;;  %v5318_v44 = vsel %vm1445_vm6, %v5316_v61, %v5317_v36  ;;  %v4295_v52 = vrot.slane %v6260_v49, 1  ;;  %v4296_v4 = vrot.slane %v6851_v0, 1  ;;  %v3754_v18 = vld [vmem:[#allocation3 + $0xc0] sm:$0xf]  ;;  %v3723_v38 = vld [vmem:[#allocation3 + $0xb4] sm:$0xe] }
 0x290   : > { %v9353_v10 = vpop.permute.xlu0 %4317  ;;  %v4664_v63 = vshll.u32 %v6276_v60, 16  ;;  %v5497_v48 = vsel %vm5485_vm5, %v5464_v2, %v9209_v8  ;;  %v4159_v42 = vrot.slane %v4157_v39, 1  ;;  %v4162_v23 = vshrl.u32 %v9358_v50, 16  ;;  %v3817_v33 = vld [vmem:[#allocation3 + $0xc0] sm:$0xf] }
 0x291   : > { %v9362_v21 = vpop.permute.xlu1 %4699  ;;  %4951 = vrot.lane.b32.xlu1 %v6323_v56, %s6887_s15  ;;  %v5172_v41 = vsel %vm1172_vm4, %v5167_v6, %v5171_v34  ;;  %v4155_v56 = vor.u32 %v4154_v15, %v4150_v59  ;;  %v4169_v5 = vshll.u32 %v6855_v35, 16  ;;  %v5530_v54 = vsel %vm5518_vm15, %v5497_v48, %v9322_v30 }
 0x292   : > { %v4167_v20 = vor.u32 %v4166_v62, %v4162_v23  ;;  %v6261_v8 = vcombine.low %v3723_v38, %v9343_v53  ;;  %v6277_v46 = vcombine.low %v3754_v18, %v9377_v9  ;;  %v4297_v6 = vsel %vm1445_vm6, %v4295_v52, %v4296_v4  ;;  %v9398_v53 = vld [vmem:[#allocation3 + $0xc4] sm:$0xf]  ;;  %v3819_v4 = vld [vmem:[#allocation3 + $0xcc] sm:$0xf] }
 0x293   : > { %5349 = vrot.lane.b32.xlu0 %v5315_v27, %s6889_s17  ;;  %v4160_v40 = vsel %vm1172_vm4, %v4155_v56, %v4159_v42  ;;  %v4666_v7 = vrot.slane %v4664_v63, 1  ;;  %v5370_v30 = vsel %vm2583_vm12, %v8725_v25, %v9259_v19  ;;  %v4171_v36 = vrot.slane %v4169_v5, 1  ;;  %v3786_v19 = vld [vmem:[#allocation3 + $0xb4] sm:$0xe]  ;;  %v9414_v63 = vld [vmem:[#allocation3 + $0xd0] sm:$0xf] }
 0x294   : > { %v5336_v47 = vpop.permute.xlu0 %5335  ;;  %v4662_v15 = vshrl.u32 %v6276_v60, 16  ;;  %v4669_v12 = vshll.u32 %v9385_v1, 16  ;;  %v4298_v49 = vrot.slane %v6261_v8, 1  ;;  %v4299_v25 = vrot.slane %v6855_v35, 1 }
 0x295   : > { %v9373_v29 = vpop.permute.xlu1 %4189  ;;  %5223 = vrot.lane.b32.xlu1 %v5172_v41, %s6890_s21  ;;  %v4172_v27 = vsel %vm1172_vm4, %v4167_v20, %v4171_v36  ;;  %v4676_v41 = vshll.u32 %v6277_v46, 16  ;;  %v5402_v59 = vsel %vm2649_vm14, %v5370_v30, %v9240_v14  ;;  %v6308_v39 = vcombine.low %v3786_v19, %v9355_v3  ;;  %v3787_v20 = vld [vmem:[#allocation3 + $0xc0] sm:$0xe] }
 0x296   : > { %v6324_v2 = vcombine.low %v3817_v33, %v9398_v53  ;;  %v5434_v56 = vsel %vm2715_vm1, %v5402_v59, %v9327_v31  ;;  %v4671_v52 = vrot.slane %v4669_v12, 1  ;;  %v4300_v48 = vsel %vm1445_vm6, %v4298_v49, %v4299_v25 }
 0x297   : > { %5351 = vrot.lane.b32.xlu0 %v5318_v44, %s6889_s17  ;;  %v6861_v44 = vld [vmem:[#allocation3 + $0xc8] ss:$0 sps:$4 sm:$0x11]   ;;  %v4808_v42 = vrot.slane %v9385_v1, 1  ;;  %v4678_v23 = vrot.slane %v4676_v41, 1  ;;  %v4807_v5 = vrot.slane %v6308_v39, 1  ;;  %v6325_v1 = vcombine.low %v3819_v4, %v9414_v63 }
 0x298   : > { %v4826_v17 = vpop.permute.xlu0 %4825  ;;  %v5176_v18 = vshll.u32 %v6324_v2, 16  ;;  %v4674_v38 = vshrl.u32 %v6277_v46, 16  ;;  %v4811_v25 = vrot.slane %v6861_v44, 1 }
 0x299   : > { %v5208_v37 = vpop.permute.xlu1 %5207  ;;  %4201 = vrot.lane.b32.xlu1 %v4160_v40, %s6879_s24  ;;  %v4681_v40 = vshll.u32 %v6861_v44, 16  ;;  %v5186_v59 = vshrl.u32 %v6325_v1, 16 }
 0x29a   : > { %v5563_v0 = vsel %vm5551_vm3, %v5530_v54, %v5208_v37  ;;  %v5178_v30 = vrot.slane %v5176_v18, 1 }
 0x29b   : > { %4329 = vrot.lane.b32.xlu0 %v4297_v6, %s6885_s9  ;;  %v5596_v34 = vsel %vm5584_vm8, %v5563_v0, %v5336_v47  ;;  %v4667_v47 = vor.u32 %v4666_v7, %v4662_v15  ;;  %v4679_v6 = vor.u32 %v4678_v23, %v4674_v38  ;;  %v6309_v0 = vcombine.low %v3787_v20, %v9377_v9  ;;  %v3851_v9 = vld [vmem:[#allocation3 + $0xc0] sm:$0xe] }
 0x29c   : > { %v5210_v45 = vpop.permute.xlu0 %5209  ;;  %6545 = vmatmul.mubr.msk.bf16.gmra.mrb[8].mxu1 %vm5660_vm11, %v5596_v34  ;;  %v4809_v7 = vsel %vm1445_vm6, %v4807_v5, %v4808_v42  ;;  %v4683_v36 = vrot.slane %v4681_v40, 1  ;;  %v6866_v34 = vld [vmem:[#allocation3 + $0xd4] ss:$0 sps:$4 sm:$0x11]   ;;  %v5188_v15 = vshll.u32 %v6325_v1, 16 }
 0x29d   : > { %v9403_v61 = vpop.permute.xlu1 %4187  ;;  %4203 = vrot.lane.b32.xlu1 %v4172_v27, %s6879_s24  ;;  %v4810_v49 = vrot.slane %v6309_v0, 1  ;;  %v5193_v39 = vshll.u32 %v6866_v34, 16 }
 0x29e   : > { %v4684_v33 = vsel %vm1172_vm4, %v4679_v6, %v4683_v36 }
 0x29f   : > { %4441 = vrot.lane.b32.xlu0 %v6276_v60, %s6882_s27  ;;  %v4672_v60 = vsel %vm1172_vm4, %v4667_v47, %v4671_v52  ;;  %v5190_v47 = vrot.slane %v5188_v15, 1  ;;  %v5195_v42 = vrot.slane %v5193_v39, 1 }
 0x2a0   : > { %v4698_v62 = vpop.permute.xlu0 %4697 }
 0x2a1   : > { %v5466_v35 = vsel %vm2781_vm10, %v5434_v56, %v4698_v62  ;;  %v9418_v3 = vpop.permute.xlu1 %4431  ;;  %4331 = vrot.lane.b32.xlu1 %v4300_v48, %s6885_s9  ;;  %v3852_v62 = vld [vmem:[#allocation3 + $0xcc] sm:$0xe]  ;;  %v5191_v48 = vor.u32 %v5190_v47, %v5186_v59 }
 0x2a2   : > { %v5499_v14 = vsel %vm5485_vm5, %v5466_v35, %v4826_v17  ;;  %v4812_v35 = vsel %vm1445_vm6, %v4810_v49, %v4811_v25  ;;  %v6357_v23 = vcombine.low %v3852_v62, %v9414_v63 }
 0x2a3   : > { %v5532_v31 = vsel %vm5518_vm15, %v5499_v14, %v9313_v55  ;;  %4713 = vrot.lane.b32.xlu0 %v4672_v60, %s6884_s6  ;;  %v6862_v55 = vld [vmem:[#allocation3 + $0xc8] ss:$0 sps:$4 sm:$0x11]  }
 0x2a4   : > { %v9426_v54 = vpop.permute.xlu0 %4941  ;;  %v5565_v17 = vsel %vm5551_vm3, %v5532_v31, %v5210_v45  ;;  %v5181_v12 = vshll.u32 %v6862_v55, 16  ;;  %v5320_v14 = vrot.slane %v6862_v55, 1 }
 0x2a5   : > { %v5598_v37 = vsel %vm5584_vm8, %v5565_v17, %v9337_v57  ;;  %v4940_v8 = vpop.permute.xlu1 %4939  ;;  %4443 = vrot.lane.b32.xlu1 %v6277_v46, %s6882_s27  ;;  %v5174_v57 = vshrl.u32 %v6324_v2, 16  ;;  %v6356_v46 = vcombine.low %v3851_v9, %v9398_v53  ;;  %v5372_v53 = vsel %vm2583_vm12, %v8830_v22, %v9403_v61 }
 0x2a6   : > { %6548 = vmatprep.mubr.msk.bf16.mxu1 %vm5660_vm11, %v5598_v37  ;;  %v5183_v56 = vrot.slane %v5181_v12, 1  ;;  %v5404_v60 = vsel %vm2649_vm14, %v5372_v53, %v9346_v24  ;;  %v5196_v22 = vsel %vm1172_vm4, %v5191_v48, %v5195_v42  ;;  %v5322_v61 = vrot.slane %v6357_v23, 1 }
 0x2a7   : > { %4841 = vrot.lane.b32.xlu0 %v4809_v7, %s6888_s16  ;;  %v5179_v19 = vor.u32 %v5178_v30, %v5174_v57  ;;  %v5319_v44 = vrot.slane %v6356_v46, 1  ;;  %v5323_v17 = vrot.slane %v6866_v34, 1  ;;  %v5436_v38 = vsel %vm2715_vm1, %v5404_v60, %v9305_v16 }
 0x2a8   : > { %v4430_v45 = vpop.permute.xlu0 %4429  ;;  %v5468_v24 = vsel %vm2781_vm10, %v5436_v38, %v9362_v21  ;;  %v5374_v16 = vsel %vm2583_vm12, %v8832_v58, %v9373_v29 }
 0x2a9   : > { %v9438_v27 = vpop.permute.xlu1 %4831  ;;  %4715 = vrot.lane.b32.xlu1 %v4684_v33, %s6884_s6  ;;  %v5184_v4 = vsel %vm1172_vm4, %v5179_v19, %v5183_v56  ;;  %v5321_v5 = vsel %vm1445_vm6, %v5319_v44, %v5320_v14  ;;  %v5324_v40 = vsel %vm1445_vm6, %v5322_v61, %v5323_v17  ;;  %v5406_v30 = vsel %vm2649_vm14, %v5374_v16, %v9353_v10 }
 0x2ab   : > { %4953 = vrot.lane.b32.xlu0 %v6324_v2, %s6887_s15 }
 0x2ac   : > { %v5342_v41 = vpop.permute.xlu0 %5341 }
 0x2ad   : > { %v4320_v52 = vpop.permute.xlu1 %4319  ;;  %4843 = vrot.lane.b32.xlu1 %v4812_v35, %s6888_s16 }
 0x2af   : > { %5225 = vrot.lane.b32.xlu0 %v5184_v4, %s6890_s21 }
 0x2b0   : > { %v4322_v2 = vpop.permute.xlu0 %4321 }
 0x2b1   : > { %v4704_v31 = vpop.permute.xlu1 %4703  ;;  %4955 = vrot.lane.b32.xlu1 %v6325_v1, %s6887_s15  ;;  %v5501_v1 = vsel %vm5485_vm5, %v5468_v24, %v9333_v51  ;;  %v5438_v51 = vsel %vm2715_vm1, %v5406_v30, %v4430_v45  ;;  %s9566_s15 = scalar_lea.vmem %s9671_s5, %s6382_s20 }
 0x2b2   : > { %v5534_v55 = vsel %vm5518_vm15, %v5501_v1, %v4940_v8 }
 0x2b3   : > { %5353 = vrot.lane.b32.xlu0 %v5321_v5, %s6889_s17 }
 0x2b4   : > { %v5340_v18 = vpop.permute.xlu0 %5339 }
 0x2b5   : > { %5227 = vrot.lane.b32.xlu1 %v5196_v22, %s6890_s21 }
 0x2b7   : > { %v4194_v63 = vpop.permute.xlu1 %4193 }
 0x2b8   : > { %v4830_v37 = vpop.permute.xlu0 %4829  ;;  %v5378_v56 = vsel %vm2583_vm12, %v8957_v11, %v4194_v63 }
 0x2b9   : > { %5355 = vrot.lane.b32.xlu1 %v5324_v40, %s6889_s17 }
 0x2bd   : > { %v5212_v20 = vpop.permute.xlu1 %5211 }
 0x2be   : > { %v5567_v6 = vsel %vm5551_vm3, %v5534_v55, %v5212_v20  ;;  %v5214_v0 = vpop.permute.xlu0 %5213 }
 0x2bf   : > { %v5600_v7 = vsel %vm5584_vm8, %v5567_v6, %v5340_v18 }
 0x2c0   : > { %6549 = vmatmul.mubr.msk.bf16.gmra.mrb[12].mxu1 %vm5660_vm11, %v5600_v7 }
 0x2c1   : > { %v4192_v21 = vpop.permute.xlu1 %4191 }
 0x2c2   : > { %v4702_v36 = vpop.permute.xlu0 %4701  ;;  %v5376_v45 = vsel %vm2583_vm12, %v9026_v28, %v4192_v21 }
 0x2c3   : > { %v5470_v8 = vsel %vm2781_vm10, %v5438_v51, %v4702_v36  ;;  %v5408_v25 = vsel %vm2649_vm14, %v5376_v45, %v4320_v52 }
 0x2c4   : > { %v5503_v34 = vsel %vm5485_vm5, %v5470_v8, %v4830_v37 }
 0x2c5   : > { %v4436_v15 = vpop.permute.xlu1 %4435  ;;  %v5536_v58 = vsel %vm5518_vm15, %v5503_v34, %v9426_v54  ;;  %v5440_v54 = vsel %vm2715_vm1, %v5408_v25, %v9418_v3  ;;  %v5410_v3 = vsel %vm2649_vm14, %v5378_v56, %v4322_v2 }
 0x2c6   : > { %v4946_v29 = vpop.permute.xlu0 %4945  ;;  %v5569_v57 = vsel %vm5551_vm3, %v5536_v58, %v5214_v0  ;;  %v5472_v59 = vsel %vm2781_vm10, %v5440_v54, %v4704_v31 }
 0x2c7   : > { %v5602_v12 = vsel %vm5584_vm8, %v5569_v57, %v5342_v41  ;;  %v5505_v39 = vsel %vm5485_vm5, %v5472_v59, %v9438_v27 }
 0x2c8   : > { %6552 = vmatprep.mubr.msk.bf16.mxu1 %vm5660_vm11, %v5602_v12 }
 0x2c9   : > { %v4944_v33 = vpop.permute.xlu1 %4943 }
 0x2ca   : > { %v4434_v10 = vpop.permute.xlu0 %4433  ;;  %v5538_v28 = vsel %vm5518_vm15, %v5505_v39, %v4944_v33 }
 0x2cb   : > { %v5442_v4 = vsel %vm2715_vm1, %v5410_v3, %v4434_v10 }
 0x2cd   : > { %v4836_v49 = vpop.permute.xlu1 %4835 }
 0x2ce   : > { %v5344_v9 = vpop.permute.xlu0 %5343 }
 0x2d1   : > { %v4324_v19 = vpop.permute.xlu1 %4323 }
 0x2d2   : > { %v4834_v46 = vpop.permute.xlu0 %4833 }
 0x2d5   : > { %v4708_v47 = vpop.permute.xlu1 %4707 }
 0x2d6   : > { %v5218_v41 = vpop.permute.xlu0 %5217 }
 0x2d9   : > { %v5216_v62 = vpop.permute.xlu1 %5215 }
 0x2da   : > { %v5571_v35 = vsel %vm5551_vm3, %v5538_v28, %v5216_v62 }
 0x2db   : > { %v5604_v52 = vsel %vm5584_vm8, %v5571_v35, %v5344_v9 }
 0x2dc   : > { %6553 = vmatmul.mubr.msk.bf16.gmra.mrb[16].mxu1 %vm5660_vm11, %v5604_v52 }
 0x2dd   : > { %v4706_v44 = vpop.permute.xlu0 %4705 }
 0x2de   : > { %v5474_v14 = vsel %vm2781_vm10, %v5442_v4, %v4706_v44 }
 0x2df   : > { %v5507_v27 = vsel %vm5485_vm5, %v5474_v14, %v4834_v46  ;;  %v4196_v53 = vpop.permute.xlu1 %4195 }
 0x2e0   : > { %v5540_v11 = vsel %vm5518_vm15, %v5507_v27, %v4946_v29  ;;  %v5380_v48 = vsel %vm2583_vm12, %v9119_v43, %v4196_v53 }
 0x2e1   : > { %v5573_v42 = vsel %vm5551_vm3, %v5540_v11, %v5218_v41  ;;  %v5346_v23 = vpop.permute.xlu0 %5345  ;;  %v5412_v2 = vsel %vm2649_vm14, %v5380_v48, %v4324_v19 }
 0x2e2   : > { %v5606_v31 = vsel %vm5584_vm8, %v5573_v42, %v5346_v23  ;;  %v5444_v5 = vsel %vm2715_vm1, %v5412_v2, %v4436_v15 }
 0x2e3   : > { %6556 = vmatprep.mubr.msk.bf16.mxu1 %vm5660_vm11, %v5606_v31  ;;  %v4198_v60 = vpop.permute.xlu1 %4197  ;;  %v5476_v22 = vsel %vm2781_vm10, %v5444_v5, %v4708_v47 }
 0x2e4   : > { %v5509_v38 = vsel %vm5485_vm5, %v5476_v22, %v4836_v49  ;;  %v5382_v21 = vsel %vm2583_vm12, %v9205_v13, %v4198_v60 }
 0x2e5   : > { %v5348_v18 = vpop.permute.xlu0 %5347 }
 0x2e7   : > { %v4948_v61 = vpop.permute.xlu1 %4947 }
 0x2e8   : > { %v5542_v43 = vsel %vm5518_vm15, %v5509_v38, %v4948_v61 }
 0x2e9   : > { %v4326_v17 = vpop.permute.xlu0 %4325 }
 0x2ea   : > { %v5414_v30 = vsel %vm2649_vm14, %v5382_v21, %v4326_v17 }
 0x2eb   : > { %v5220_v63 = vpop.permute.xlu1 %5219 }
 0x2ec   : > { %v5575_v40 = vsel %vm5551_vm3, %v5542_v43, %v5220_v63 }
 0x2ed   : > { %v5608_v24 = vsel %vm5584_vm8, %v5575_v40, %v5348_v18  ;;  %v4438_v1 = vpop.permute.xlu0 %4437  ;;  %v9557_v40 = vld [vmem:[%s9670_s4] ss:$0 sm:$0xff] }
 0x2ee   : > { %6557 = vmatmul.mubr.msk.bf16.gmra.mrb[20].mxu1 %vm5660_vm11, %v5608_v24  ;;  %v5446_v36 = vsel %vm2715_vm1, %v5414_v30, %v4438_v1 }
 0x2ef   : > { %v4200_v37 = vpop.permute.xlu1 %4199 }
 0x2f0   : > { %v5384_v15 = vsel %vm2583_vm12, %v9234_v26, %v4200_v37 }
 0x2f3   : > { %v4328_v55 = vpop.permute.xlu1 %4327 }
 0x2f4   : > { %v5416_v29 = vsel %vm2649_vm14, %v5384_v15, %v4328_v55 }
 0x2f5   : > { %v4710_v20 = vpop.permute.xlu0 %4709 }
 0x2f6   : > { %v5478_v34 = vsel %vm2781_vm10, %v5446_v36, %v4710_v20 }
 0x2f7   : > { %v4440_v6 = vpop.permute.xlu1 %4439 }
 0x2f8   : > { %v5448_v13 = vsel %vm2715_vm1, %v5416_v29, %v4440_v6 }
 0x2f9   : > { %v4838_v16 = vpop.permute.xlu0 %4837 }
 0x2fa   : > { %v5511_v58 = vsel %vm5485_vm5, %v5478_v34, %v4838_v16 }
 0x2fb   : > { %v4712_v0 = vpop.permute.xlu1 %4711 }
 0x2fc   : > { %v5480_v45 = vsel %vm2781_vm10, %v5448_v13, %v4712_v0 }
 0x2fd   : > { %v4950_v7 = vpop.permute.xlu0 %4949 }
 0x2fe   : > { %v5544_v57 = vsel %vm5518_vm15, %v5511_v58, %v4950_v7 }
 0x2ff   : > { %v4840_v51 = vpop.permute.xlu1 %4839 }
 0x300   : > { %v5513_v25 = vsel %vm5485_vm5, %v5480_v45, %v4840_v51 }
 0x301   : > { %v5222_v8 = vpop.permute.xlu0 %5221 }
 0x302   : > { %v5577_v33 = vsel %vm5551_vm3, %v5544_v57, %v5222_v8 }
 0x303   : > { %v4952_v12 = vpop.permute.xlu1 %4951 }
 0x304   : > { %v5546_v26 = vsel %vm5518_vm15, %v5513_v25, %v4952_v12 }
 0x305   : > { %v5350_v10 = vpop.permute.xlu0 %5349 }
 0x306   : > { %v5610_v49 = vsel %vm5584_vm8, %v5577_v33, %v5350_v10 }
 0x307   : > { %6560 = vmatprep.mubr.msk.bf16.mxu1 %vm5660_vm11, %v5610_v49  ;;  %v5224_v9 = vpop.permute.xlu1 %5223 }
 0x308   : > { %v5579_v54 = vsel %vm5551_vm3, %v5546_v26, %v5224_v9 }
 0x309   : > { %v5352_v19 = vpop.permute.xlu0 %5351 }
 0x30a   : > { %v5612_v46 = vsel %vm5584_vm8, %v5579_v54, %v5352_v19 }
 0x30b   : > { %6561 = vmatmul.mubr.msk.bf16.gmra.mrb[24].mxu1 %vm5660_vm11, %v5612_v46  ;;  %v4202_v59 = vpop.permute.xlu1 %4201 }
 0x30c   : > { %v5386_v52 = vsel %vm2583_vm12, %v9339_v32, %v4202_v59 }
 0x30d   : > { %v4330_v47 = vpop.permute.xlu0 %4329 }
 0x30e   : > { %v5418_v44 = vsel %vm2649_vm14, %v5386_v52, %v4330_v47 }
 0x30f   : > { %v4204_v41 = vpop.permute.xlu1 %4203 }
 0x310   : > { %v5388_v32 = vsel %vm2583_vm12, %v9358_v50, %v4204_v41 }
 0x311   : > { %v4442_v39 = vpop.permute.xlu0 %4441 }
 0x312   : > { %v5450_v27 = vsel %vm2715_vm1, %v5418_v44, %v4442_v39 }
 0x313   : > { %v4332_v56 = vpop.permute.xlu1 %4331 }
 0x314   : > { %v5420_v5 = vsel %vm2649_vm14, %v5388_v32, %v4332_v56 }
 0x315   : > { %v4714_v28 = vpop.permute.xlu0 %4713 }
 0x316   : > { %v5482_v11 = vsel %vm2781_vm10, %v5450_v27, %v4714_v28 }
 0x317   : > { %v4444_v62 = vpop.permute.xlu1 %4443 }
 0x318   : > { %v5452_v18 = vsel %vm2715_vm1, %v5420_v5, %v4444_v62 }
 0x319   : > { %v4842_v35 = vpop.permute.xlu0 %4841 }
 0x31a   : > { %v5515_v48 = vsel %vm5485_vm5, %v5482_v11, %v4842_v35 }
 0x31b   : > { %v4716_v3 = vpop.permute.xlu1 %4715 }
 0x31c   : > { %v5484_v61 = vsel %vm2781_vm10, %v5452_v18, %v4716_v3 }
 0x31d   : > { %v4954_v4 = vpop.permute.xlu0 %4953 }
 0x31e   : > { %v5548_v42 = vsel %vm5518_vm15, %v5515_v48, %v4954_v4 }
 0x31f   : > { %v4844_v14 = vpop.permute.xlu1 %4843 }
 0x320   : > { %v5517_v17 = vsel %vm5485_vm5, %v5484_v61, %v4844_v14 }
 0x321   : > { %v5226_v53 = vpop.permute.xlu0 %5225 }
 0x322   : > { %v5581_v2 = vsel %vm5551_vm3, %v5548_v42, %v5226_v53 }
 0x323   : > { %v4956_v23 = vpop.permute.xlu1 %4955 }
 0x324   : > { %v5550_v38 = vsel %vm5518_vm15, %v5517_v17, %v4956_v23 }
 0x325   : > { %v5354_v31 = vpop.permute.xlu0 %5353 }
 0x326   : > { %v5614_v60 = vsel %vm5584_vm8, %v5581_v2, %v5354_v31 }
 0x327   : > { %6564 = vmatprep.mubr.msk.bf16.mxu1 %vm5660_vm11, %v5614_v60  ;;  %v5228_v22 = vpop.permute.xlu1 %5227 }
 0x328   : > { %v5583_v43 = vsel %vm5551_vm3, %v5550_v38, %v5228_v22 }
 0x32b   : > { %v5356_v63 = vpop.permute.xlu1 %5355 }
 0x32c   : > { %v5616_v50 = vsel %vm5584_vm8, %v5583_v43, %v5356_v63 }
 0x32d   : > { %6565 = vmatmul.mubr.msk.bf16.gmra.mrb[28].mxu1 %vm5660_vm11, %v5616_v50 }
 0x32f   : > { %v6538_v24 = vpop.f32.mrb[0].mxu1 }
 0x330   : > { %v5740_v37 = vadd.f32 %v6538_v24, %v9557_v40  ;;  %v5731_v1 = vpop.f32.mrb[1].mxu1 }
 0x331   : > { %v5732_v55 = vadd.f32 %v9557_v40, %v5731_v1  ;;  %v6539_v20 = vpop.f32.mrb[2].mxu1 }
 0x332   : > { %v5860_v6 = vmax.f32 %v5740_v37, 0.0  ;;  %v5743_v16 = vadd.f32 %v6539_v20, %v9557_v40  ;;  %v5734_v0 = vpop.f32.mrb[3].mxu1 }
 0x333   : > { %v5858_v7 = vmax.f32 %v5732_v55, 0.0  ;;  %v5735_v21 = vadd.f32 %v9557_v40, %v5734_v0 }
 0x334   : > { %5892 = vst.msk [vmem:[%s9566_s15 + $0x10] sm:$0xff] %vm2583_vm12, %v5860_v6  ;;  %v5861_v30 = vmax.f32 %v5743_v16, 0.0 }
 0x335   : > { %5890 = vst.msk [vmem:[%s9566_s15] sm:$0xff] %vm2583_vm12, %v5858_v7  ;;  %v5859_v51 = vmax.f32 %v5735_v21, 0.0 }
 0x336   : > { %5893 = vst.msk [vmem:[%s9566_s15 + $0x18] sm:$0xff] %vm2583_vm12, %v5861_v30 }
 0x337   : > { %5891 = vst.msk [vmem:[%s9566_s15 + $0x8] sm:$0xff] %vm2583_vm12, %v5859_v51 }
 0x34f   : > { %v6542_v36 = vpop.f32.mrb[4].mxu1 }
 0x350   : > { %v5756_v8 = vadd.f32 %v6542_v36, %v9557_v40  ;;  %v5747_v34 = vpop.f32.mrb[5].mxu1 }
 0x351   : > { %v5748_v15 = vadd.f32 %v9557_v40, %v5747_v34  ;;  %v6543_v58 = vpop.f32.mrb[6].mxu1 }
 0x352   : > { %v5864_v29 = vmax.f32 %v5756_v8, 0.0  ;;  %v5759_v57 = vadd.f32 %v6543_v58, %v9557_v40  ;;  %v5750_v12 = vpop.f32.mrb[7].mxu1 }
 0x353   : > { %v5862_v13 = vmax.f32 %v5748_v15, 0.0  ;;  %v5751_v33 = vadd.f32 %v9557_v40, %v5750_v12 }
 0x354   : > { %5896 = vst.msk [vmem:[%s9566_s15 + $0x30] sm:$0xff] %vm2583_vm12, %v5864_v29  ;;  %v5865_v10 = vmax.f32 %v5759_v57, 0.0 }
 0x355   : > { %5894 = vst.msk [vmem:[%s9566_s15 + $0x20] sm:$0xff] %vm2583_vm12, %v5862_v13  ;;  %v5863_v45 = vmax.f32 %v5751_v33, 0.0 }
 0x356   : > { %5897 = vst.msk [vmem:[%s9566_s15 + $0x38] sm:$0xff] %vm2583_vm12, %v5865_v10 }
 0x357   : > { %5895 = vst.msk [vmem:[%s9566_s15 + $0x28] sm:$0xff] %vm2583_vm12, %v5863_v45 }
 0x36f   : > { %v6546_v49 = vpop.f32.mrb[8].mxu1 }
 0x370   : > { %v5772_v25 = vadd.f32 %v6546_v49, %v9557_v40  ;;  %v5763_v26 = vpop.f32.mrb[9].mxu1 }
 0x371   : > { %v5764_v9 = vadd.f32 %v9557_v40, %v5763_v26  ;;  %v6547_v19 = vpop.f32.mrb[10].mxu1 }
 0x372   : > { %v5868_v54 = vmax.f32 %v5772_v25, 0.0  ;;  %v5775_v46 = vadd.f32 %v6547_v19, %v9557_v40  ;;  %v5766_v59 = vpop.f32.mrb[11].mxu1 }
 0x373   : > { %v5866_v47 = vmax.f32 %v5764_v9, 0.0  ;;  %v5767_v41 = vadd.f32 %v9557_v40, %v5766_v59 }
 0x374   : > { %5900 = vst.msk [vmem:[%s9566_s15 + $0x50] sm:$0xff] %vm2583_vm12, %v5868_v54  ;;  %v5869_v39 = vmax.f32 %v5775_v46, 0.0 }
 0x375   : > { %5898 = vst.msk [vmem:[%s9566_s15 + $0x40] sm:$0xff] %vm2583_vm12, %v5866_v47  ;;  %v5867_v56 = vmax.f32 %v5767_v41, 0.0 }
 0x376   : > { %5901 = vst.msk [vmem:[%s9566_s15 + $0x58] sm:$0xff] %vm2583_vm12, %v5869_v39 }
 0x377   : > { %5899 = vst.msk [vmem:[%s9566_s15 + $0x48] sm:$0xff] %vm2583_vm12, %v5867_v56 }
 0x393   : > { %v6550_v28 = vpop.f32.mrb[12].mxu1 }
 0x394   : > { %v5788_v62 = vadd.f32 %v6550_v28, %v9557_v40  ;;  %v5779_v35 = vpop.f32.mrb[13].mxu1 }
 0x395   : > { %v5780_v52 = vadd.f32 %v9557_v40, %v5779_v35  ;;  %v6551_v3 = vpop.f32.mrb[14].mxu1 }
 0x396   : > { %v5872_v4 = vmax.f32 %v5788_v62, 0.0  ;;  %v5791_v44 = vadd.f32 %v6551_v3, %v9557_v40  ;;  %v5782_v14 = vpop.f32.mrb[15].mxu1 }
 0x397   : > { %v5870_v27 = vmax.f32 %v5780_v52, 0.0  ;;  %v5783_v53 = vadd.f32 %v9557_v40, %v5782_v14 }
 0x398   : > { %5904 = vst.msk [vmem:[%s9566_s15 + $0x70] sm:$0xff] %vm2583_vm12, %v5872_v4  ;;  %v5873_v11 = vmax.f32 %v5791_v44, 0.0 }
 0x399   : > { %5902 = vst.msk [vmem:[%s9566_s15 + $0x60] sm:$0xff] %vm2583_vm12, %v5870_v27  ;;  %v5871_v48 = vmax.f32 %v5783_v53, 0.0 }
 0x39a   : > { %5905 = vst.msk [vmem:[%s9566_s15 + $0x78] sm:$0xff] %vm2583_vm12, %v5873_v11 }
 0x39b   : > { %5903 = vst.msk [vmem:[%s9566_s15 + $0x68] sm:$0xff] %vm2583_vm12, %v5871_v48 }
 0x3af   : > { %v6554_v42 = vpop.f32.mrb[16].mxu1 }
 0x3b0   : > { %v5804_v23 = vadd.f32 %v6554_v42, %v9557_v40  ;;  %v5795_v2 = vpop.f32.mrb[17].mxu1 }
 0x3b1   : > { %v5796_v31 = vadd.f32 %v9557_v40, %v5795_v2  ;;  %v6555_v32 = vpop.f32.mrb[18].mxu1 }
 0x3b2   : > { %v5876_v60 = vmax.f32 %v5804_v23, 0.0  ;;  %v5807_v5 = vadd.f32 %v6555_v32, %v9557_v40  ;;  %v5798_v18 = vpop.f32.mrb[19].mxu1 }
 0x3b3   : > { %v5874_v22 = vmax.f32 %v5796_v31, 0.0  ;;  %v5799_v61 = vadd.f32 %v9557_v40, %v5798_v18 }
 0x3b4   : > { %5908 = vst.msk [vmem:[%s9566_s15 + $0x90] sm:$0xff] %vm2583_vm12, %v5876_v60  ;;  %v5877_v17 = vmax.f32 %v5807_v5, 0.0 }
 0x3b5   : > { %5906 = vst.msk [vmem:[%s9566_s15 + $0x80] sm:$0xff] %vm2583_vm12, %v5874_v22  ;;  %v5875_v38 = vmax.f32 %v5799_v61, 0.0 }
 0x3b6   : > { %5909 = vst.msk [vmem:[%s9566_s15 + $0x98] sm:$0xff] %vm2583_vm12, %v5877_v17 }
 0x3b7   : > { %5907 = vst.msk [vmem:[%s9566_s15 + $0x88] sm:$0xff] %vm2583_vm12, %v5875_v38 }
 0x3c1   : > { %v6558_v43 = vpop.f32.mrb[20].mxu1 }
 0x3c2   : > { %v5820_v63 = vadd.f32 %v6558_v43, %v9557_v40  ;;  %v5811_v50 = vpop.f32.mrb[21].mxu1 }
 0x3c3   : > { %v5812_v24 = vadd.f32 %v9557_v40, %v5811_v50  ;;  %v6559_v37 = vpop.f32.mrb[22].mxu1 }
 0x3c4   : > { %v5880_v1 = vmax.f32 %v5820_v63, 0.0  ;;  %v5823_v55 = vadd.f32 %v6559_v37, %v9557_v40  ;;  %v5814_v20 = vpop.f32.mrb[23].mxu1 }
 0x3c5   : > { %v5878_v6 = vmax.f32 %v5812_v24, 0.0  ;;  %v5815_v16 = vadd.f32 %v9557_v40, %v5814_v20 }
 0x3c6   : > { %5912 = vst.msk [vmem:[%s9566_s15 + $0xb0] sm:$0xff] %vm2583_vm12, %v5880_v1  ;;  %v5881_v0 = vmax.f32 %v5823_v55, 0.0 }
 0x3c7   : > { %5910 = vst.msk [vmem:[%s9566_s15 + $0xa0] sm:$0xff] %vm2583_vm12, %v5878_v6  ;;  %v5879_v7 = vmax.f32 %v5815_v16, 0.0 }
 0x3c8   : > { %5913 = vst.msk [vmem:[%s9566_s15 + $0xb8] sm:$0xff] %vm2583_vm12, %v5881_v0 }
 0x3c9   : > { %5911 = vst.msk [vmem:[%s9566_s15 + $0xa8] sm:$0xff] %vm2583_vm12, %v5879_v7 }
 0x3de   : > { %v6562_v21 = vpop.f32.mrb[24].mxu1 }
 0x3df   : > { %v5836_v30 = vadd.f32 %v6562_v21, %v9557_v40  ;;  %v5827_v51 = vpop.f32.mrb[25].mxu1 }
 0x3e0   : > { %v5828_v36 = vadd.f32 %v9557_v40, %v5827_v51  ;;  %v6563_v8 = vpop.f32.mrb[26].mxu1 }
 0x3e1   : > { %v5884_v34 = vmax.f32 %v5836_v30, 0.0  ;;  %v5839_v15 = vadd.f32 %v6563_v8, %v9557_v40  ;;  %v5830_v58 = vpop.f32.mrb[27].mxu1 }
 0x3e2   : > { %v5882_v29 = vmax.f32 %v5828_v36, 0.0  ;;  %v5831_v57 = vadd.f32 %v9557_v40, %v5830_v58 }
 0x3e3   : > { %5916 = vst.msk [vmem:[%s9566_s15 + $0xd0] sm:$0xff] %vm2583_vm12, %v5884_v34  ;;  %v5885_v12 = vmax.f32 %v5839_v15, 0.0 }
 0x3e4   : > { %5914 = vst.msk [vmem:[%s9566_s15 + $0xc0] sm:$0xff] %vm2583_vm12, %v5882_v29  ;;  %v5883_v13 = vmax.f32 %v5831_v57, 0.0 }
 0x3e5   : > { %5917 = vst.msk [vmem:[%s9566_s15 + $0xd8] sm:$0xff] %vm2583_vm12, %v5885_v12 }
 0x3e6   : > { %5915 = vst.msk [vmem:[%s9566_s15 + $0xc8] sm:$0xff] %vm2583_vm12, %v5883_v13 }
 0x400   : > { %v6566_v33 = vpop.f32.mrb[28].mxu1 }
 0x401   : > { %v5852_v10 = vadd.f32 %v6566_v33, %v9557_v40  ;;  %v5843_v45 = vpop.f32.mrb[29].mxu1 }
 0x402   : > { %v5844_v49 = vadd.f32 %v9557_v40, %v5843_v45  ;;  %v6567_v25 = vpop.f32.mrb[30].mxu1 }
 0x403   : > { %v5888_v26 = vmax.f32 %v5852_v10, 0.0  ;;  %v5855_v9 = vadd.f32 %v6567_v25, %v9557_v40  ;;  %v5846_v19 = vpop.f32.mrb[31].mxu1 }
 0x404   : > { %v5886_v54 = vmax.f32 %v5844_v49, 0.0  ;;  %v5847_v46 = vadd.f32 %v9557_v40, %v5846_v19 }
 0x405   : > { %5920 = vst.msk [vmem:[%s9566_s15 + $0xf0] sm:$0xff] %vm2583_vm12, %v5888_v26  ;;  %v5889_v59 = vmax.f32 %v5855_v9, 0.0 }
 0x406   : > { %5918 = vst.msk [vmem:[%s9566_s15 + $0xe0] sm:$0xff] %vm2583_vm12, %v5886_v54  ;;  %v5887_v47 = vmax.f32 %v5847_v46, 0.0 }
 0x407   : > { %5921 = vst.msk [vmem:[%s9566_s15 + $0xf8] sm:$0xff] %vm2583_vm12, %v5889_v59 }
 0x408   : > { %5919 = vst.msk [vmem:[%s9566_s15 + $0xe8] sm:$0xff] %vm2583_vm12, %v5887_v47 }
 0x409 PF: > { %s15_s18 = sadd.s32 1, %s6876_s18  }
 0x40a   : > { %p12_p4 = scmp.ge.s32.totalorder %s15_s18, 4  }
 0x40c   :  { %14 = sbr.rel (!%p12_p4) target bundleno = 1 (0x1), region = 74 }

</bundles_post_ra>
